<compile_context>
chip_gen: v7x
topology: tpu7x:2x2x1
jax: 0.10.0
libtpu: 0.0.40
codegen_flags: <defaults>
</compile_context>

<pallas_src>
import functools
import numpy as np
import jax
import jax.numpy as jnp
from jax.experimental import pallas as pl
from jax.experimental.pallas import tpu as pltpu

EPS = 1e-5                      # PyTorch LayerNorm default eps
_F32 = jnp.float32
_BF16 = jnp.bfloat16
_FFN_CHUNK = 512                # multiple of 128 (v5e) and 256 (v6e/v7x) MXU widths


# ------------------------------------------------------------------ helpers --
def _vmem_limit_bytes():
    """Generation-aware scoped-VMEM limit: ~3/4 of physical capacity."""
    try:
        cap = int(pltpu.get_tpu_info().vmem_capacity_bytes)
        if cap > 0:
            return (cap * 3) // 4          # ~48 MiB v7x, ~96 MiB v5e/v6e
    except Exception:
        pass
    return 48 * 1024 * 1024                # conservative default (fits v7x)


_VMEM_LIMIT = _vmem_limit_bytes()


def _const_specs(params, single_buffer):
    """BlockSpecs for grid-invariant weights/biases (full block, fixed index)."""
    specs = []
    for p in params:
        idx = (lambda *args, _nd=p.ndim: (0,) * _nd)
        if single_buffer:
            try:
                specs.append(pl.BlockSpec(p.shape, idx,
                                          pipeline_mode=pl.Buffered(1)))
                continue
            except (TypeError, AttributeError):
                pass
        specs.append(pl.BlockSpec(p.shape, idx))
    return specs


def _erf(x):
    # Abramowitz & Stegun 7.1.26 rational erf approximation (|err| < 1.5e-7).
    # Matches PyTorch's erf-GELU (activation='gelu', approximate='none').
    a1, a2, a3, a4, a5 = 0.254829592, -0.284496736, 1.421413741, -1.453152027, 1.061405429
    p = 0.3275911
    ax = jnp.abs(x)
    t = pl.reciprocal(1.0 + p * ax, approx=True)     # EUP slot, not VALU divide
    poly = ((((a5 * t + a4) * t + a3) * t + a2) * t + a1) * t
    y = 1.0 - poly * jnp.exp(-ax * ax)
    return jnp.where(x >= 0.0, y, -y)


def _gelu(x):
    return 0.5 * x * (1.0 + _erf(x * 0.7071067811865476))


def _layer_norm(x, gamma, beta):
    mu = jnp.mean(x, axis=-1, keepdims=True)
    var = jnp.mean(jnp.square(x - mu), axis=-1, keepdims=True)
    return (x - mu) * jax.lax.rsqrt(var + EPS) * gamma + beta


def _softmax_rows(x):
    m = jnp.max(x, axis=-1, keepdims=True)
    e = jnp.exp(x - m)
    return e * pl.reciprocal(jnp.sum(e, axis=-1, keepdims=True), approx=True)


# -------------------------------------------------- TransformerEncoderLayer --
def _encoder_layer_kernel(x_ref, wqkv_ref, bqkv_ref, wo_ref, bo_ref,
                          g1_ref, be1_ref, w1_ref, b1_ref, w2_ref, b2_ref,
                          g2_ref, be2_ref, o_ref, *, num_heads, pool_input):
    """Post-norm nn.TransformerEncoderLayer (self-attn + GELU FFN), one batch elem.

    When pool_input=True, avg_pool1d(kernel=2, stride=2) over the sequence axis
    is fused in-VMEM before the layer (coarse branch).
    """
    x = x_ref[...].astype(_F32)                       # (S_in, D)
    D = x.shape[1]
    if pool_input:
        sc = x.shape[0] // 2
        x = jnp.mean(x[:2 * sc].reshape(sc, 2, D), axis=1)   # (Sc, D)
    S = x.shape[0]
    H = num_heads
    dh = D // H

    # --- fused QKV projection; 1/sqrt(dh) already folded into the Q columns ---
    qkv = (jnp.dot(x.astype(_BF16), wqkv_ref[...], preferred_element_type=_F32)
           + bqkv_ref[...]).astype(_BF16)             # (S, 3D)
    q = qkv[:, :D].reshape(S, H, dh)
    k = qkv[:, D:2 * D].reshape(S, H, dh)
    v = qkv[:, 2 * D:].reshape(S, H, dh)

    # --- heads-batched attention: one dot_general push sequence, no head loop ---
    scores = jnp.einsum('qhd,khd->hqk', q, k, preferred_element_type=_F32)  # (H,S,S)
    probs = _softmax_rows(scores).astype(_BF16)
    ctx = jnp.einsum('hqk,khd->qhd', probs, v, preferred_element_type=_F32) # (S,H,dh)
    attn = (jnp.dot(ctx.reshape(S, D).astype(_BF16), wo_ref[...],
                    preferred_element_type=_F32) + bo_ref[...])

    x1 = _layer_norm(x + attn, g1_ref[...], be1_ref[...])

    # --- FFN, tiled over ffn_dim to bound the (S, F) intermediate ---
    x1_bf = x1.astype(_BF16)
    F = w1_ref.shape[1]
    chunk = _FFN_CHUNK if F % _FFN_CHUNK == 0 else F
    ffn = jnp.zeros((S, D), _F32)
    for c in range(F // chunk):
        s0 = c * chunk
        hid = _gelu(jnp.dot(x1_bf, w1_ref[:, s0:s0 + chunk],
                            preferred_element_type=_F32) + b1_ref[:, s0:s0 + chunk])
        ffn = ffn + jnp.dot(hid.astype(_BF16), w2_ref[s0:s0 + chunk, :],
                            preferred_element_type=_F32)
    ffn = ffn + b2_ref[...]

    y = _layer_norm(x1 + ffn, g2_ref[...], be2_ref[...])
    o_ref[...] = y.astype(o_ref.dtype)


def transformer_encoder_layer(x_bsd, params, *, num_heads, pool_input=False):
    B, S, D = x_bsd.shape
    s_out = (S // 2) if pool_input else S

    def build(single_buffer_weights):
        in_specs = [pl.BlockSpec((None, S, D), lambda b: (b, 0, 0))]
        in_specs += _const_specs(params, single_buffer_weights)
        return pl.pallas_call(
            functools.partial(_encoder_layer_kernel,
                              num_heads=num_heads, pool_input=pool_input),
            out_shape=jax.ShapeDtypeStruct((B, s_out, D), _BF16),   # bf16 inter-kernel
            grid=(B,),
            in_specs=in_specs,
            out_specs=pl.BlockSpec((None, s_out, D), lambda b: (b, 0, 0)),
            compiler_params=pltpu.CompilerParams(
                dimension_semantics=("parallel",),
                vmem_limit_bytes=_VMEM_LIMIT),
        )

    try:
        return build(True)(x_bsd, *params)
    except Exception:   # fall back to default double-buffered weights
        return build(False)(x_bsd, *params)


# ----------------------------------- fusion / selection / LayerNorm epilogue --
def _fuse_kernel(fine_ref, coarse_ref, gf_ref, gc_ref, gb_ref,
                 wff_ref, wfc_ref, bf_ref, g_ref, be_ref, o_ref, *, upsample2x):
    fine = fine_ref[...].astype(_F32)       # (S, D)
    coarse = coarse_ref[...].astype(_F32)   # (S//2, D) if upsample2x else (S, D)
    S, D = fine.shape
    if upsample2x:
        # F.interpolate(nearest, size=S) for even S: out row i <- coarse row i//2.
        sc = coarse.shape[0]
        coarse = jnp.broadcast_to(coarse[:, None, :], (sc, 2, D)).reshape(2 * sc, D)

    # feature_selector: 2-way softmax == sigmoid of the logit difference,
    # computed as VPU mul + lane reduce + EUP sigmoid (no lane-sparse (T,2) matmul).
    gd = (jnp.sum(fine * gf_ref[...], axis=-1, keepdims=True)
          + jnp.sum(coarse * gc_ref[...], axis=-1, keepdims=True)
          + gb_ref[...])                                             # (S, 1)
    w0 = pl.reciprocal(1.0 + jnp.exp(-gd), approx=True)
    w1 = 1.0 - w0

    # fusion: Linear(2D, D) split into fine/coarse halves, bf16 MXU, f32 acc.
    fused = (jnp.dot(fine.astype(_BF16), wff_ref[...], preferred_element_type=_F32)
             + jnp.dot(coarse.astype(_BF16), wfc_ref[...], preferred_element_type=_F32)
             + bf_ref[...])

    out = fine * w0 + coarse * w1 + fused
    o_ref[...] = _layer_norm(out, g_ref[...], be_ref[...]).astype(o_ref.dtype)


def fuse_select_norm(fine_bsd, coarse_bsd, params, *, upsample2x):
    B, S, D = fine_bsd.shape
    Sc = coarse_bsd.shape[1]

    def build(single_buffer_weights):
        in_specs = [pl.BlockSpec((None, S, D), lambda b: (b, 0, 0)),
                    pl.BlockSpec((None, Sc, D), lambda b: (b, 0, 0))]
        in_specs += _const_specs(params, single_buffer_weights)
        return pl.pallas_call(
            functools.partial(_fuse_kernel, upsample2x=upsample2x),
            out_shape=jax.ShapeDtypeStruct((B, S, D), jnp.float32),
            grid=(B,),
            in_specs=in_specs,
            out_specs=pl.BlockSpec((None, S, D), lambda b: (b, 0, 0)),
            compiler_params=pltpu.CompilerParams(
                dimension_semantics=("parallel",),
                vmem_limit_bytes=_VMEM_LIMIT),
        )

    try:
        return build(True)(fine_bsd, coarse_bsd, *params)
    except Exception:
        return build(False)(fine_bsd, coarse_bsd, *params)


# --------------------------------------------------------------- parameters --
def _normal(key, shape, scale):
    return jax.random.normal(key, shape, jnp.float32) * scale


def make_encoder_layer_params(key, D, F, num_heads):
    ks = jax.random.split(key, 8)
    scale = 1.0 / float(np.sqrt(D // num_heads))
    wqkv = _normal(ks[0], (D, 3 * D), 0.02)                  # fused Wq|Wk|Wv
    bqkv = _normal(ks[1], (1, 3 * D), 0.01)
    # Fold the 1/sqrt(dh) attention scale into the Q projection (exact rewrite).
    wqkv = wqkv.at[:, :D].multiply(scale).astype(_BF16)
    bqkv = bqkv.at[:, :D].multiply(scale)
    wo = _normal(ks[2], (D, D), 0.02).astype(_BF16)
    bo = _normal(ks[3], (1, D), 0.01)
    g1, be1 = jnp.ones((1, D), _F32), jnp.zeros((1, D), _F32)
    w1 = _normal(ks[4], (D, F), 0.02).astype(_BF16)
    b1 = _normal(ks[5], (1, F), 0.01)
    w2 = _normal(ks[6], (F, D), 0.02).astype(_BF16)
    b2 = _normal(ks[7], (1, D), 0.01)
    g2, be2 = jnp.ones((1, D), _F32), jnp.zeros((1, D), _F32)
    return (wqkv, bqkv, wo, bo, g1, be1, w1, b1, w2, b2, g2, be2)


def make_fuse_params(key, D):
    ks = jax.random.split(key, 6)
    # feature_selector = nn.Linear(2D, 2), split by fine/coarse halves of the input.
    wsf = _normal(ks[0], (D, 2), 0.02)
    wsc = _normal(ks[1], (D, 2), 0.02)
    bs = _normal(ks[2], (1, 2), 0.01)
    # 2-way softmax depends only on the logit difference -> fold to gate vectors.
    gf = (wsf[:, 0] - wsf[:, 1]).reshape(1, D)
    gc = (wsc[:, 0] - wsc[:, 1]).reshape(1, D)
    gb = (bs[:, 0] - bs[:, 1]).reshape(1, 1)
    # fusion = nn.Linear(2D, D), split by fine/coarse halves of the input.
    wff = _normal(ks[3], (D, D), 0.02).astype(_BF16)
    wfc = _normal(ks[4], (D, D), 0.02).astype(_BF16)
    bf = _normal(ks[5], (1, D), 0.01)
    g, be = jnp.ones((1, D), _F32), jnp.zeros((1, D), _F32)
    return (gf, gc, gb, wff, wfc, bf, g, be)


def init_params(key, embedding_dim, num_heads, ffn_dim=2048):
    k1, k2, k3 = jax.random.split(key, 3)
    return {
        "fine": make_encoder_layer_params(k1, embedding_dim, ffn_dim,
                                          min(num_heads, 4)),
        "coarse": make_encoder_layer_params(k2, embedding_dim, ffn_dim,
                                            min(num_heads // 2, 2)),
        "fuse": make_fuse_params(k3, embedding_dim),
    }


# ------------------------------------------------------------------ forward --
def hierarchical_context_encoder(features_sbd, attention_mask, params, *, num_heads):
    """features_sbd: (seq, batch, dim) float32, matching the PyTorch forward."""
    del attention_mask  # the PyTorch reference forward also never uses it
    S, B, D = features_sbd.shape
    x_bsd = jnp.transpose(features_sbd, (1, 0, 2))   # -> (B, S, D)

    fine = transformer_encoder_layer(x_bsd, params["fine"],
                                     num_heads=min(num_heads, 4))

    if S >= 8:
        # avg_pool1d fused into the coarse encoder kernel (no pooled HBM tensor).
        coarse = transformer_encoder_layer(x_bsd, params["coarse"],
                                           num_heads=min(num_heads // 2, 2),
                                           pool_input=True)
        if S % 2 == 0:
            # nearest 2x upsample fused into the fuse kernel (no HBM gather).
            out_bsd = fuse_select_norm(fine, coarse, params["fuse"], upsample2x=True)
        else:
            # General nearest mapping for odd S (rare): XLA gather fallback.
            Sc = S // 2
            idx = (jnp.arange(S) * Sc) // S
            coarse_up = coarse[:, idx, :]
            out_bsd = fuse_select_norm(fine, coarse_up, params["fuse"],
                                       upsample2x=False)
    else:
        out_bsd = fuse_select_norm(fine, fine, params["fuse"], upsample2x=False)

    return out_bsd.transpose(1, 0, 2)   # back to (S, B, D), float32


# --------------------------------------------------------------------- main --
if __name__ == "__main__":
    S, B, D, NUM_HEADS = 8, 2, 32, 4
    key = jax.random.PRNGKey(0)
    k_feat, k_params = jax.random.split(key)

    features = jax.random.normal(k_feat, (S, B, D), jnp.float32)  # (seq, batch, dim)
    attention_mask = jnp.ones((B, S), jnp.float32)                # unused by forward
    params = init_params(k_params, D, NUM_HEADS, ffn_dim=2048)

    out = hierarchical_context_encoder(features, attention_mask, params,
                                       num_heads=NUM_HEADS)
    out = jax.block_until_ready(out)
    assert out.shape == (S, B, D) and out.dtype == jnp.float32
    assert bool(jnp.all(jnp.isfinite(out)))
    print("KERNEL_OK")
</pallas_src>

<mosaic_0001>
module attributes {stable_mosaic.version = 11 : i64} {
  func.func @_encoder_layer_kernel(%arg0: i32, %arg1: memref<1x8x32xf32, #tpu.memory_space<vmem>>, %arg2: memref<32x96xbf16, #tpu.memory_space<vmem>>, %arg3: memref<1x96xf32, #tpu.memory_space<vmem>>, %arg4: memref<32x32xbf16, #tpu.memory_space<vmem>>, %arg5: memref<1x32xf32, #tpu.memory_space<vmem>>, %arg6: memref<1x32xf32, #tpu.memory_space<vmem>>, %arg7: memref<1x32xf32, #tpu.memory_space<vmem>>, %arg8: memref<32x2048xbf16, #tpu.memory_space<vmem>>, %arg9: memref<1x2048xf32, #tpu.memory_space<vmem>>, %arg10: memref<2048x32xbf16, #tpu.memory_space<vmem>>, %arg11: memref<1x32xf32, #tpu.memory_space<vmem>>, %arg12: memref<1x32xf32, #tpu.memory_space<vmem>>, %arg13: memref<1x32xf32, #tpu.memory_space<vmem>>, %arg14: memref<1x8x32xbf16, #tpu.memory_space<vmem>>) attributes {dimension_semantics = [#tpu.dimension_semantics<parallel>], iteration_bounds = array<i64: 2>, scalar_prefetch = 0 : i64, scratch_operands = 0 : i64, tpu.core_type = #tpu.core_type<tc>, window_params = [{transform_indices = @transform_0, window_bounds = array<i64: 1, 8, 32>}, {pipeline_mode = #tpu.pipeline_mode<synchronous>, transform_indices = @transform_1, window_bounds = array<i64: 32, 96>}, {pipeline_mode = #tpu.pipeline_mode<synchronous>, transform_indices = @transform_2, window_bounds = array<i64: 1, 96>}, {pipeline_mode = #tpu.pipeline_mode<synchronous>, transform_indices = @transform_3, window_bounds = array<i64: 32, 32>}, {pipeline_mode = #tpu.pipeline_mode<synchronous>, transform_indices = @transform_4, window_bounds = array<i64: 1, 32>}, {pipeline_mode = #tpu.pipeline_mode<synchronous>, transform_indices = @transform_5, window_bounds = array<i64: 1, 32>}, {pipeline_mode = #tpu.pipeline_mode<synchronous>, transform_indices = @transform_6, window_bounds = array<i64: 1, 32>}, {pipeline_mode = #tpu.pipeline_mode<synchronous>, transform_indices = @transform_7, window_bounds = array<i64: 32, 2048>}, {pipeline_mode = #tpu.pipeline_mode<synchronous>, transform_indices = @transform_8, window_bounds = array<i64: 1, 2048>}, {pipeline_mode = #tpu.pipeline_mode<synchronous>, transform_indices = @transform_9, window_bounds = array<i64: 2048, 32>}, {pipeline_mode = #tpu.pipeline_mode<synchronous>, transform_indices = @transform_10, window_bounds = array<i64: 1, 32>}, {pipeline_mode = #tpu.pipeline_mode<synchronous>, transform_indices = @transform_11, window_bounds = array<i64: 1, 32>}, {pipeline_mode = #tpu.pipeline_mode<synchronous>, transform_indices = @transform_12, window_bounds = array<i64: 1, 32>}, {transform_indices = @transform_13, window_bounds = array<i64: 1, 8, 32>}]} {
    %c0 = arith.constant 0 : index
    %c0_0 = arith.constant 0 : index
    %c0_1 = arith.constant 0 : index
    %0 = vector.load %arg1[%c0, %c0_0, %c0_1] : memref<1x8x32xf32, #tpu.memory_space<vmem>>, vector<1x8x32xf32>
    %1 = vector.shape_cast %0 : vector<1x8x32xf32> to vector<8x32xf32>
    %2 = arith.truncf %1 : vector<8x32xf32> to vector<8x32xbf16>
    %c0_2 = arith.constant 0 : index
    %c0_3 = arith.constant 0 : index
    %3 = vector.load %arg2[%c0_2, %c0_3] : memref<32x96xbf16, #tpu.memory_space<vmem>>, vector<32x96xbf16>
    %cst = arith.constant dense<0.000000e+00> : vector<8x96xf32>
    %4 = tpu.matmul %2, %3, %cst {dimension_numbers = #tpu.dot_dimension_numbers<[1], [0], [0], [1], [0, 0, 1, 1], [], []>} : vector<8x32xbf16>, vector<32x96xbf16>, vector<8x96xf32> -> vector<8x96xf32>
    %c0_4 = arith.constant 0 : index
    %c0_5 = arith.constant 0 : index
    %5 = vector.load %arg3[%c0_4, %c0_5] : memref<1x96xf32, #tpu.memory_space<vmem>>, vector<1x96xf32>
    %6 = vector.broadcast %5 : vector<1x96xf32> to vector<8x96xf32>
    %7 = arith.addf %4, %6 : vector<8x96xf32>
    %8 = arith.truncf %7 : vector<8x96xf32> to vector<8x96xbf16>
    %9 = vector.extract_strided_slice %8 {offsets = [0, 0], sizes = [8, 32], strides = [1, 1]} : vector<8x96xbf16> to vector<8x32xbf16>
    %10 = vector.shape_cast %9 : vector<8x32xbf16> to vector<8x4x8xbf16>
    %11 = vector.extract_strided_slice %8 {offsets = [0, 32], sizes = [8, 32], strides = [1, 1]} : vector<8x96xbf16> to vector<8x32xbf16>
    %12 = vector.shape_cast %11 : vector<8x32xbf16> to vector<8x4x8xbf16>
    %13 = vector.extract_strided_slice %8 {offsets = [0, 64], sizes = [8, 32], strides = [1, 1]} : vector<8x96xbf16> to vector<8x32xbf16>
    %14 = vector.shape_cast %13 : vector<8x32xbf16> to vector<8x4x8xbf16>
    "tpu.trace_start"() <{level = 10 : i32, message = "qhd,khd->hqk"}> : () -> ()
    %cst_6 = arith.constant dense<0.000000e+00> : vector<4x8x8xf32>
    %15 = tpu.matmul %10, %12, %cst_6 {dimension_numbers = #tpu.dot_dimension_numbers<[2], [2], [0], [0], [0, 1, 0, 0, 1, 0], [1], [1]>} : vector<8x4x8xbf16>, vector<8x4x8xbf16>, vector<4x8x8xf32> -> vector<4x8x8xf32>
    "tpu.trace_stop"() : () -> ()
    %cst_7 = arith.constant dense<0xFF800000> : vector<4x8xf32>
    %16 = vector.multi_reduction <maximumf>, %15, %cst_7 [2] : vector<4x8x8xf32> to vector<4x8xf32>
    %17 = vector.shape_cast %16 : vector<4x8xf32> to vector<4x8x1xf32>
    %18 = vector.broadcast %17 : vector<4x8x1xf32> to vector<4x8x8xf32>
    %19 = arith.subf %15, %18 : vector<4x8x8xf32>
    %20 = math.exp %19 : vector<4x8x8xf32>
    %cst_8 = arith.constant dense<0.000000e+00> : vector<4x8xf32>
    %21 = vector.multi_reduction <add>, %20, %cst_8 [2] : vector<4x8x8xf32> to vector<4x8xf32>
    %22 = vector.shape_cast %21 : vector<4x8xf32> to vector<4x8x1xf32>
    %23 = tpu.reciprocal %22 {approx = true} : vector<4x8x1xf32> -> vector<4x8x1xf32>
    %24 = vector.broadcast %23 : vector<4x8x1xf32> to vector<4x8x8xf32>
    %25 = arith.mulf %20, %24 : vector<4x8x8xf32>
    %26 = arith.truncf %25 : vector<4x8x8xf32> to vector<4x8x8xbf16>
    "tpu.trace_start"() <{level = 10 : i32, message = "hqk,khd->qhd"}> : () -> ()
    %cst_9 = arith.constant dense<0.000000e+00> : vector<4x8x8xf32>
    %27 = tpu.matmul %14, %26, %cst_9 {dimension_numbers = #tpu.dot_dimension_numbers<[0], [2], [2], [1], [0, 1, 0, 2, 1, 1], [1], [0]>} : vector<8x4x8xbf16>, vector<4x8x8xbf16>, vector<4x8x8xf32> -> vector<4x8x8xf32>
    %28 = tpu.transpose %27, [2, 0, 1] : vector<4x8x8xf32> -> vector<8x4x8xf32>
    "tpu.trace_stop"() : () -> ()
    %29 = vector.shape_cast %28 : vector<8x4x8xf32> to vector<8x32xf32>
    %30 = arith.truncf %29 : vector<8x32xf32> to vector<8x32xbf16>
    %c0_10 = arith.constant 0 : index
    %c0_11 = arith.constant 0 : index
    %31 = vector.load %arg4[%c0_10, %c0_11] : memref<32x32xbf16, #tpu.memory_space<vmem>>, vector<32x32xbf16>
    %cst_12 = arith.constant dense<0.000000e+00> : vector<8x32xf32>
    %32 = tpu.matmul %30, %31, %cst_12 {dimension_numbers = #tpu.dot_dimension_numbers<[1], [0], [0], [1], [0, 0, 1, 1], [], []>} : vector<8x32xbf16>, vector<32x32xbf16>, vector<8x32xf32> -> vector<8x32xf32>
    %c0_13 = arith.constant 0 : index
    %c0_14 = arith.constant 0 : index
    %33 = vector.load %arg5[%c0_13, %c0_14] : memref<1x32xf32, #tpu.memory_space<vmem>>, vector<1x32xf32>
    %34 = vector.broadcast %33 : vector<1x32xf32> to vector<8x32xf32>
    %35 = arith.addf %32, %34 : vector<8x32xf32>
    %36 = arith.addf %1, %35 : vector<8x32xf32>
    %c0_15 = arith.constant 0 : index
    %c0_16 = arith.constant 0 : index
    %37 = vector.load %arg6[%c0_15, %c0_16] : memref<1x32xf32, #tpu.memory_space<vmem>>, vector<1x32xf32>
    %c0_17 = arith.constant 0 : index
    %c0_18 = arith.constant 0 : index
    %38 = vector.load %arg7[%c0_17, %c0_18] : memref<1x32xf32, #tpu.memory_space<vmem>>, vector<1x32xf32>
    %cst_19 = arith.constant dense<0.000000e+00> : vector<8xf32>
    %39 = vector.multi_reduction <add>, %36, %cst_19 [1] : vector<8x32xf32> to vector<8xf32>
    %40 = vector.shape_cast %39 : vector<8xf32> to vector<8x1xf32>
    %cst_20 = arith.constant 3.200000e+01 : f32
    %41 = vector.broadcast %cst_20 : f32 to vector<8x1xf32>
    %42 = arith.divf %40, %41 : vector<8x1xf32>
    %43 = vector.broadcast %42 : vector<8x1xf32> to vector<8x32xf32>
    %44 = arith.subf %36, %43 : vector<8x32xf32>
    %45 = arith.mulf %44, %44 : vector<8x32xf32>
    %cst_21 = arith.constant dense<0.000000e+00> : vector<8xf32>
    %46 = vector.multi_reduction <add>, %45, %cst_21 [1] : vector<8x32xf32> to vector<8xf32>
    %47 = vector.shape_cast %46 : vector<8xf32> to vector<8x1xf32>
    %cst_22 = arith.constant 3.200000e+01 : f32
    %48 = vector.broadcast %cst_22 : f32 to vector<8x1xf32>
    %49 = arith.divf %47, %48 : vector<8x1xf32>
    %50 = vector.broadcast %42 : vector<8x1xf32> to vector<8x32xf32>
    %51 = arith.subf %36, %50 : vector<8x32xf32>
    %cst_23 = arith.constant 9.99999974E-6 : f32
    %52 = vector.broadcast %cst_23 : f32 to vector<8x1xf32>
    %53 = arith.addf %49, %52 : vector<8x1xf32>
    %54 = math.rsqrt %53 : vector<8x1xf32>
    %55 = vector.broadcast %54 : vector<8x1xf32> to vector<8x32xf32>
    %56 = arith.mulf %51, %55 : vector<8x32xf32>
    %57 = vector.broadcast %37 : vector<1x32xf32> to vector<8x32xf32>
    %58 = arith.mulf %56, %57 : vector<8x32xf32>
    %59 = vector.broadcast %38 : vector<1x32xf32> to vector<8x32xf32>
    %60 = arith.addf %58, %59 : vector<8x32xf32>
    %61 = arith.truncf %60 : vector<8x32xf32> to vector<8x32xbf16>
    %cst_24 = arith.constant 0.000000e+00 : f32
    %62 = vector.broadcast %cst_24 : f32 to vector<8x32xf32>
    %c0_25 = arith.constant 0 : index
    %c0_26 = arith.constant 0 : index
    %63 = vector.load %arg8[%c0_25, %c0_26] : memref<32x2048xbf16, #tpu.memory_space<vmem>>, vector<32x512xbf16>
    %cst_27 = arith.constant dense<0.000000e+00> : vector<8x512xf32>
    %64 = tpu.matmul %61, %63, %cst_27 {dimension_numbers = #tpu.dot_dimension_numbers<[1], [0], [0], [1], [0, 0, 1, 1], [], []>} : vector<8x32xbf16>, vector<32x512xbf16>, vector<8x512xf32> -> vector<8x512xf32>
    %c0_28 = arith.constant 0 : index
    %c0_29 = arith.constant 0 : index
    %65 = vector.load %arg9[%c0_28, %c0_29] : memref<1x2048xf32, #tpu.memory_space<vmem>>, vector<1x512xf32>
    %66 = vector.broadcast %65 : vector<1x512xf32> to vector<8x512xf32>
    %67 = arith.addf %64, %66 : vector<8x512xf32>
    %cst_30 = arith.constant 5.000000e-01 : f32
    %68 = vector.broadcast %cst_30 : f32 to vector<8x512xf32>
    %69 = arith.mulf %68, %67 : vector<8x512xf32>
    %cst_31 = arith.constant 0.707106769 : f32
    %70 = vector.broadcast %cst_31 : f32 to vector<8x512xf32>
    %71 = arith.mulf %67, %70 : vector<8x512xf32>
    %72 = math.absf %71 : vector<8x512xf32>
    %cst_32 = arith.constant 0.327591091 : f32
    %73 = vector.broadcast %cst_32 : f32 to vector<8x512xf32>
    %74 = arith.mulf %73, %72 : vector<8x512xf32>
    %cst_33 = arith.constant 1.000000e+00 : f32
    %75 = vector.broadcast %cst_33 : f32 to vector<8x512xf32>
    %76 = arith.addf %75, %74 : vector<8x512xf32>
    %77 = tpu.reciprocal %76 {approx = true} : vector<8x512xf32> -> vector<8x512xf32>
    %cst_34 = arith.constant 1.06140542 : f32
    %78 = vector.broadcast %cst_34 : f32 to vector<8x512xf32>
    %79 = arith.mulf %78, %77 : vector<8x512xf32>
    %cst_35 = arith.constant -1.45315206 : f32
    %80 = vector.broadcast %cst_35 : f32 to vector<8x512xf32>
    %81 = arith.addf %79, %80 : vector<8x512xf32>
    %82 = arith.mulf %81, %77 : vector<8x512xf32>
    %cst_36 = arith.constant 1.42141378 : f32
    %83 = vector.broadcast %cst_36 : f32 to vector<8x512xf32>
    %84 = arith.addf %82, %83 : vector<8x512xf32>
    %85 = arith.mulf %84, %77 : vector<8x512xf32>
    %cst_37 = arith.constant -0.284496725 : f32
    %86 = vector.broadcast %cst_37 : f32 to vector<8x512xf32>
    %87 = arith.addf %85, %86 : vector<8x512xf32>
    %88 = arith.mulf %87, %77 : vector<8x512xf32>
    %cst_38 = arith.constant 0.254829586 : f32
    %89 = vector.broadcast %cst_38 : f32 to vector<8x512xf32>
    %90 = arith.addf %88, %89 : vector<8x512xf32>
    %91 = arith.mulf %90, %77 : vector<8x512xf32>
    %cst_39 = arith.constant 0.000000e+00 : f32
    %92 = vector.broadcast %cst_39 : f32 to vector<8x512xf32>
    %93 = arith.subf %92, %72 : vector<8x512xf32>
    %94 = arith.mulf %93, %72 : vector<8x512xf32>
    %95 = math.exp %94 : vector<8x512xf32>
    %96 = arith.mulf %91, %95 : vector<8x512xf32>
    %cst_40 = arith.constant 1.000000e+00 : f32
    %97 = vector.broadcast %cst_40 : f32 to vector<8x512xf32>
    %98 = arith.subf %97, %96 : vector<8x512xf32>
    %cst_41 = arith.constant 0.000000e+00 : f32
    %99 = vector.broadcast %cst_41 : f32 to vector<8x512xf32>
    %100 = arith.cmpf oge, %71, %99 : vector<8x512xf32>
    %cst_42 = arith.constant 0.000000e+00 : f32
    %101 = vector.broadcast %cst_42 : f32 to vector<8x512xf32>
    %102 = arith.subf %101, %98 : vector<8x512xf32>
    %103 = arith.select %100, %98, %102 : vector<8x512xi1>, vector<8x512xf32>
    %cst_43 = arith.constant 1.000000e+00 : f32
    %104 = vector.broadcast %cst_43 : f32 to vector<8x512xf32>
    %105 = arith.addf %104, %103 : vector<8x512xf32>
    %106 = arith.mulf %69, %105 : vector<8x512xf32>
    %107 = arith.truncf %106 : vector<8x512xf32> to vector<8x512xbf16>
    %c0_44 = arith.constant 0 : index
    %c0_45 = arith.constant 0 : index
    %108 = vector.load %arg10[%c0_44, %c0_45] : memref<2048x32xbf16, #tpu.memory_space<vmem>>, vector<512x32xbf16>
    %cst_46 = arith.constant dense<0.000000e+00> : vector<8x32xf32>
    %109 = tpu.matmul %107, %108, %cst_46 {dimension_numbers = #tpu.dot_dimension_numbers<[1], [0], [0], [1], [0, 0, 1, 1], [], []>} : vector<8x512xbf16>, vector<512x32xbf16>, vector<8x32xf32> -> vector<8x32xf32>
    %110 = arith.addf %62, %109 : vector<8x32xf32>
    %c0_47 = arith.constant 0 : index
    %c512 = arith.constant 512 : index
    %111 = vector.load %arg8[%c0_47, %c512] : memref<32x2048xbf16, #tpu.memory_space<vmem>>, vector<32x512xbf16>
    %cst_48 = arith.constant dense<0.000000e+00> : vector<8x512xf32>
    %112 = tpu.matmul %61, %111, %cst_48 {dimension_numbers = #tpu.dot_dimension_numbers<[1], [0], [0], [1], [0, 0, 1, 1], [], []>} : vector<8x32xbf16>, vector<32x512xbf16>, vector<8x512xf32> -> vector<8x512xf32>
    %c0_49 = arith.constant 0 : index
    %c512_50 = arith.constant 512 : index
    %113 = vector.load %arg9[%c0_49, %c512_50] : memref<1x2048xf32, #tpu.memory_space<vmem>>, vector<1x512xf32>
    %114 = vector.broadcast %113 : vector<1x512xf32> to vector<8x512xf32>
    %115 = arith.addf %112, %114 : vector<8x512xf32>
    %cst_51 = arith.constant 5.000000e-01 : f32
    %116 = vector.broadcast %cst_51 : f32 to vector<8x512xf32>
    %117 = arith.mulf %116, %115 : vector<8x512xf32>
    %cst_52 = arith.constant 0.707106769 : f32
    %118 = vector.broadcast %cst_52 : f32 to vector<8x512xf32>
    %119 = arith.mulf %115, %118 : vector<8x512xf32>
    %120 = math.absf %119 : vector<8x512xf32>
    %cst_53 = arith.constant 0.327591091 : f32
    %121 = vector.broadcast %cst_53 : f32 to vector<8x512xf32>
    %122 = arith.mulf %121, %120 : vector<8x512xf32>
    %cst_54 = arith.constant 1.000000e+00 : f32
    %123 = vector.broadcast %cst_54 : f32 to vector<8x512xf32>
    %124 = arith.addf %123, %122 : vector<8x512xf32>
    %125 = tpu.reciprocal %124 {approx = true} : vector<8x512xf32> -> vector<8x512xf32>
    %cst_55 = arith.constant 1.06140542 : f32
    %126 = vector.broadcast %cst_55 : f32 to vector<8x512xf32>
    %127 = arith.mulf %126, %125 : vector<8x512xf32>
    %cst_56 = arith.constant -1.45315206 : f32
    %128 = vector.broadcast %cst_56 : f32 to vector<8x512xf32>
    %129 = arith.addf %127, %128 : vector<8x512xf32>
    %130 = arith.mulf %129, %125 : vector<8x512xf32>
    %cst_57 = arith.constant 1.42141378 : f32
    %131 = vector.broadcast %cst_57 : f32 to vector<8x512xf32>
    %132 = arith.addf %130, %131 : vector<8x512xf32>
    %133 = arith.mulf %132, %125 : vector<8x512xf32>
    %cst_58 = arith.constant -0.284496725 : f32
    %134 = vector.broadcast %cst_58 : f32 to vector<8x512xf32>
    %135 = arith.addf %133, %134 : vector<8x512xf32>
    %136 = arith.mulf %135, %125 : vector<8x512xf32>
    %cst_59 = arith.constant 0.254829586 : f32
    %137 = vector.broadcast %cst_59 : f32 to vector<8x512xf32>
    %138 = arith.addf %136, %137 : vector<8x512xf32>
    %139 = arith.mulf %138, %125 : vector<8x512xf32>
    %cst_60 = arith.constant 0.000000e+00 : f32
    %140 = vector.broadcast %cst_60 : f32 to vector<8x512xf32>
    %141 = arith.subf %140, %120 : vector<8x512xf32>
    %142 = arith.mulf %141, %120 : vector<8x512xf32>
    %143 = math.exp %142 : vector<8x512xf32>
    %144 = arith.mulf %139, %143 : vector<8x512xf32>
    %cst_61 = arith.constant 1.000000e+00 : f32
    %145 = vector.broadcast %cst_61 : f32 to vector<8x512xf32>
    %146 = arith.subf %145, %144 : vector<8x512xf32>
    %cst_62 = arith.constant 0.000000e+00 : f32
    %147 = vector.broadcast %cst_62 : f32 to vector<8x512xf32>
    %148 = arith.cmpf oge, %119, %147 : vector<8x512xf32>
    %cst_63 = arith.constant 0.000000e+00 : f32
    %149 = vector.broadcast %cst_63 : f32 to vector<8x512xf32>
    %150 = arith.subf %149, %146 : vector<8x512xf32>
    %151 = arith.select %148, %146, %150 : vector<8x512xi1>, vector<8x512xf32>
    %cst_64 = arith.constant 1.000000e+00 : f32
    %152 = vector.broadcast %cst_64 : f32 to vector<8x512xf32>
    %153 = arith.addf %152, %151 : vector<8x512xf32>
    %154 = arith.mulf %117, %153 : vector<8x512xf32>
    %155 = arith.truncf %154 : vector<8x512xf32> to vector<8x512xbf16>
    %c512_65 = arith.constant 512 : index
    %c0_66 = arith.constant 0 : index
    %156 = vector.load %arg10[%c512_65, %c0_66] : memref<2048x32xbf16, #tpu.memory_space<vmem>>, vector<512x32xbf16>
    %cst_67 = arith.constant dense<0.000000e+00> : vector<8x32xf32>
    %157 = tpu.matmul %155, %156, %cst_67 {dimension_numbers = #tpu.dot_dimension_numbers<[1], [0], [0], [1], [0, 0, 1, 1], [], []>} : vector<8x512xbf16>, vector<512x32xbf16>, vector<8x32xf32> -> vector<8x32xf32>
    %158 = arith.addf %110, %157 : vector<8x32xf32>
    %c0_68 = arith.constant 0 : index
    %c1024 = arith.constant 1024 : index
    %159 = vector.load %arg8[%c0_68, %c1024] : memref<32x2048xbf16, #tpu.memory_space<vmem>>, vector<32x512xbf16>
    %cst_69 = arith.constant dense<0.000000e+00> : vector<8x512xf32>
    %160 = tpu.matmul %61, %159, %cst_69 {dimension_numbers = #tpu.dot_dimension_numbers<[1], [0], [0], [1], [0, 0, 1, 1], [], []>} : vector<8x32xbf16>, vector<32x512xbf16>, vector<8x512xf32> -> vector<8x512xf32>
    %c0_70 = arith.constant 0 : index
    %c1024_71 = arith.constant 1024 : index
    %161 = vector.load %arg9[%c0_70, %c1024_71] : memref<1x2048xf32, #tpu.memory_space<vmem>>, vector<1x512xf32>
    %162 = vector.broadcast %161 : vector<1x512xf32> to vector<8x512xf32>
    %163 = arith.addf %160, %162 : vector<8x512xf32>
    %cst_72 = arith.constant 5.000000e-01 : f32
    %164 = vector.broadcast %cst_72 : f32 to vector<8x512xf32>
    %165 = arith.mulf %164, %163 : vector<8x512xf32>
    %cst_73 = arith.constant 0.707106769 : f32
    %166 = vector.broadcast %cst_73 : f32 to vector<8x512xf32>
    %167 = arith.mulf %163, %166 : vector<8x512xf32>
    %168 = math.absf %167 : vector<8x512xf32>
    %cst_74 = arith.constant 0.327591091 : f32
    %169 = vector.broadcast %cst_74 : f32 to vector<8x512xf32>
    %170 = arith.mulf %169, %168 : vector<8x512xf32>
    %cst_75 = arith.constant 1.000000e+00 : f32
    %171 = vector.broadcast %cst_75 : f32 to vector<8x512xf32>
    %172 = arith.addf %171, %170 : vector<8x512xf32>
    %173 = tpu.reciprocal %172 {approx = true} : vector<8x512xf32> -> vector<8x512xf32>
    %cst_76 = arith.constant 1.06140542 : f32
    %174 = vector.broadcast %cst_76 : f32 to vector<8x512xf32>
    %175 = arith.mulf %174, %173 : vector<8x512xf32>
    %cst_77 = arith.constant -1.45315206 : f32
    %176 = vector.broadcast %cst_77 : f32 to vector<8x512xf32>
    %177 = arith.addf %175, %176 : vector<8x512xf32>
    %178 = arith.mulf %177, %173 : vector<8x512xf32>
    %cst_78 = arith.constant 1.42141378 : f32
    %179 = vector.broadcast %cst_78 : f32 to vector<8x512xf32>
    %180 = arith.addf %178, %179 : vector<8x512xf32>
    %181 = arith.mulf %180, %173 : vector<8x512xf32>
    %cst_79 = arith.constant -0.284496725 : f32
    %182 = vector.broadcast %cst_79 : f32 to vector<8x512xf32>
    %183 = arith.addf %181, %182 : vector<8x512xf32>
    %184 = arith.mulf %183, %173 : vector<8x512xf32>
    %cst_80 = arith.constant 0.254829586 : f32
    %185 = vector.broadcast %cst_80 : f32 to vector<8x512xf32>
    %186 = arith.addf %184, %185 : vector<8x512xf32>
    %187 = arith.mulf %186, %173 : vector<8x512xf32>
    %cst_81 = arith.constant 0.000000e+00 : f32
    %188 = vector.broadcast %cst_81 : f32 to vector<8x512xf32>
    %189 = arith.subf %188, %168 : vector<8x512xf32>
    %190 = arith.mulf %189, %168 : vector<8x512xf32>
    %191 = math.exp %190 : vector<8x512xf32>
    %192 = arith.mulf %187, %191 : vector<8x512xf32>
    %cst_82 = arith.constant 1.000000e+00 : f32
    %193 = vector.broadcast %cst_82 : f32 to vector<8x512xf32>
    %194 = arith.subf %193, %192 : vector<8x512xf32>
    %cst_83 = arith.constant 0.000000e+00 : f32
    %195 = vector.broadcast %cst_83 : f32 to vector<8x512xf32>
    %196 = arith.cmpf oge, %167, %195 : vector<8x512xf32>
    %cst_84 = arith.constant 0.000000e+00 : f32
    %197 = vector.broadcast %cst_84 : f32 to vector<8x512xf32>
    %198 = arith.subf %197, %194 : vector<8x512xf32>
    %199 = arith.select %196, %194, %198 : vector<8x512xi1>, vector<8x512xf32>
    %cst_85 = arith.constant 1.000000e+00 : f32
    %200 = vector.broadcast %cst_85 : f32 to vector<8x512xf32>
    %201 = arith.addf %200, %199 : vector<8x512xf32>
    %202 = arith.mulf %165, %201 : vector<8x512xf32>
    %203 = arith.truncf %202 : vector<8x512xf32> to vector<8x512xbf16>
    %c1024_86 = arith.constant 1024 : index
    %c0_87 = arith.constant 0 : index
    %204 = vector.load %arg10[%c1024_86, %c0_87] : memref<2048x32xbf16, #tpu.memory_space<vmem>>, vector<512x32xbf16>
    %cst_88 = arith.constant dense<0.000000e+00> : vector<8x32xf32>
    %205 = tpu.matmul %203, %204, %cst_88 {dimension_numbers = #tpu.dot_dimension_numbers<[1], [0], [0], [1], [0, 0, 1, 1], [], []>} : vector<8x512xbf16>, vector<512x32xbf16>, vector<8x32xf32> -> vector<8x32xf32>
    %206 = arith.addf %158, %205 : vector<8x32xf32>
    %c0_89 = arith.constant 0 : index
    %c1536 = arith.constant 1536 : index
    %207 = vector.load %arg8[%c0_89, %c1536] : memref<32x2048xbf16, #tpu.memory_space<vmem>>, vector<32x512xbf16>
    %cst_90 = arith.constant dense<0.000000e+00> : vector<8x512xf32>
    %208 = tpu.matmul %61, %207, %cst_90 {dimension_numbers = #tpu.dot_dimension_numbers<[1], [0], [0], [1], [0, 0, 1, 1], [], []>} : vector<8x32xbf16>, vector<32x512xbf16>, vector<8x512xf32> -> vector<8x512xf32>
    %c0_91 = arith.constant 0 : index
    %c1536_92 = arith.constant 1536 : index
    %209 = vector.load %arg9[%c0_91, %c1536_92] : memref<1x2048xf32, #tpu.memory_space<vmem>>, vector<1x512xf32>
    %210 = vector.broadcast %209 : vector<1x512xf32> to vector<8x512xf32>
    %211 = arith.addf %208, %210 : vector<8x512xf32>
    %cst_93 = arith.constant 5.000000e-01 : f32
    %212 = vector.broadcast %cst_93 : f32 to vector<8x512xf32>
    %213 = arith.mulf %212, %211 : vector<8x512xf32>
    %cst_94 = arith.constant 0.707106769 : f32
    %214 = vector.broadcast %cst_94 : f32 to vector<8x512xf32>
    %215 = arith.mulf %211, %214 : vector<8x512xf32>
    %216 = math.absf %215 : vector<8x512xf32>
    %cst_95 = arith.constant 0.327591091 : f32
    %217 = vector.broadcast %cst_95 : f32 to vector<8x512xf32>
    %218 = arith.mulf %217, %216 : vector<8x512xf32>
    %cst_96 = arith.constant 1.000000e+00 : f32
    %219 = vector.broadcast %cst_96 : f32 to vector<8x512xf32>
    %220 = arith.addf %219, %218 : vector<8x512xf32>
    %221 = tpu.reciprocal %220 {approx = true} : vector<8x512xf32> -> vector<8x512xf32>
    %cst_97 = arith.constant 1.06140542 : f32
    %222 = vector.broadcast %cst_97 : f32 to vector<8x512xf32>
    %223 = arith.mulf %222, %221 : vector<8x512xf32>
    %cst_98 = arith.constant -1.45315206 : f32
    %224 = vector.broadcast %cst_98 : f32 to vector<8x512xf32>
    %225 = arith.addf %223, %224 : vector<8x512xf32>
    %226 = arith.mulf %225, %221 : vector<8x512xf32>
    %cst_99 = arith.constant 1.42141378 : f32
    %227 = vector.broadcast %cst_99 : f32 to vector<8x512xf32>
    %228 = arith.addf %226, %227 : vector<8x512xf32>
    %229 = arith.mulf %228, %221 : vector<8x512xf32>
    %cst_100 = arith.constant -0.284496725 : f32
    %230 = vector.broadcast %cst_100 : f32 to vector<8x512xf32>
    %231 = arith.addf %229, %230 : vector<8x512xf32>
    %232 = arith.mulf %231, %221 : vector<8x512xf32>
    %cst_101 = arith.constant 0.254829586 : f32
    %233 = vector.broadcast %cst_101 : f32 to vector<8x512xf32>
    %234 = arith.addf %232, %233 : vector<8x512xf32>
    %235 = arith.mulf %234, %221 : vector<8x512xf32>
    %cst_102 = arith.constant 0.000000e+00 : f32
    %236 = vector.broadcast %cst_102 : f32 to vector<8x512xf32>
    %237 = arith.subf %236, %216 : vector<8x512xf32>
    %238 = arith.mulf %237, %216 : vector<8x512xf32>
    %239 = math.exp %238 : vector<8x512xf32>
    %240 = arith.mulf %235, %239 : vector<8x512xf32>
    %cst_103 = arith.constant 1.000000e+00 : f32
    %241 = vector.broadcast %cst_103 : f32 to vector<8x512xf32>
    %242 = arith.subf %241, %240 : vector<8x512xf32>
    %cst_104 = arith.constant 0.000000e+00 : f32
    %243 = vector.broadcast %cst_104 : f32 to vector<8x512xf32>
    %244 = arith.cmpf oge, %215, %243 : vector<8x512xf32>
    %cst_105 = arith.constant 0.000000e+00 : f32
    %245 = vector.broadcast %cst_105 : f32 to vector<8x512xf32>
    %246 = arith.subf %245, %242 : vector<8x512xf32>
    %247 = arith.select %244, %242, %246 : vector<8x512xi1>, vector<8x512xf32>
    %cst_106 = arith.constant 1.000000e+00 : f32
    %248 = vector.broadcast %cst_106 : f32 to vector<8x512xf32>
    %249 = arith.addf %248, %247 : vector<8x512xf32>
    %250 = arith.mulf %213, %249 : vector<8x512xf32>
    %251 = arith.truncf %250 : vector<8x512xf32> to vector<8x512xbf16>
    %c1536_107 = arith.constant 1536 : index
    %c0_108 = arith.constant 0 : index
    %252 = vector.load %arg10[%c1536_107, %c0_108] : memref<2048x32xbf16, #tpu.memory_space<vmem>>, vector<512x32xbf16>
    %cst_109 = arith.constant dense<0.000000e+00> : vector<8x32xf32>
    %253 = tpu.matmul %251, %252, %cst_109 {dimension_numbers = #tpu.dot_dimension_numbers<[1], [0], [0], [1], [0, 0, 1, 1], [], []>} : vector<8x512xbf16>, vector<512x32xbf16>, vector<8x32xf32> -> vector<8x32xf32>
    %254 = arith.addf %206, %253 : vector<8x32xf32>
    %c0_110 = arith.constant 0 : index
    %c0_111 = arith.constant 0 : index
    %255 = vector.load %arg11[%c0_110, %c0_111] : memref<1x32xf32, #tpu.memory_space<vmem>>, vector<1x32xf32>
    %256 = vector.broadcast %255 : vector<1x32xf32> to vector<8x32xf32>
    %257 = arith.addf %254, %256 : vector<8x32xf32>
    %258 = arith.addf %60, %257 : vector<8x32xf32>
    %c0_112 = arith.constant 0 : index
    %c0_113 = arith.constant 0 : index
    %259 = vector.load %arg12[%c0_112, %c0_113] : memref<1x32xf32, #tpu.memory_space<vmem>>, vector<1x32xf32>
    %c0_114 = arith.constant 0 : index
    %c0_115 = arith.constant 0 : index
    %260 = vector.load %arg13[%c0_114, %c0_115] : memref<1x32xf32, #tpu.memory_space<vmem>>, vector<1x32xf32>
    %cst_116 = arith.constant dense<0.000000e+00> : vector<8xf32>
    %261 = vector.multi_reduction <add>, %258, %cst_116 [1] : vector<8x32xf32> to vector<8xf32>
    %262 = vector.shape_cast %261 : vector<8xf32> to vector<8x1xf32>
    %cst_117 = arith.constant 3.200000e+01 : f32
    %263 = vector.broadcast %cst_117 : f32 to vector<8x1xf32>
    %264 = arith.divf %262, %263 : vector<8x1xf32>
    %265 = vector.broadcast %264 : vector<8x1xf32> to vector<8x32xf32>
    %266 = arith.subf %258, %265 : vector<8x32xf32>
    %267 = arith.mulf %266, %266 : vector<8x32xf32>
    %cst_118 = arith.constant dense<0.000000e+00> : vector<8xf32>
    %268 = vector.multi_reduction <add>, %267, %cst_118 [1] : vector<8x32xf32> to vector<8xf32>
    %269 = vector.shape_cast %268 : vector<8xf32> to vector<8x1xf32>
    %cst_119 = arith.constant 3.200000e+01 : f32
    %270 = vector.broadcast %cst_119 : f32 to vector<8x1xf32>
    %271 = arith.divf %269, %270 : vector<8x1xf32>
    %272 = vector.broadcast %264 : vector<8x1xf32> to vector<8x32xf32>
    %273 = arith.subf %258, %272 : vector<8x32xf32>
    %cst_120 = arith.constant 9.99999974E-6 : f32
    %274 = vector.broadcast %cst_120 : f32 to vector<8x1xf32>
    %275 = arith.addf %271, %274 : vector<8x1xf32>
    %276 = math.rsqrt %275 : vector<8x1xf32>
    %277 = vector.broadcast %276 : vector<8x1xf32> to vector<8x32xf32>
    %278 = arith.mulf %273, %277 : vector<8x32xf32>
    %279 = vector.broadcast %259 : vector<1x32xf32> to vector<8x32xf32>
    %280 = arith.mulf %278, %279 : vector<8x32xf32>
    %281 = vector.broadcast %260 : vector<1x32xf32> to vector<8x32xf32>
    %282 = arith.addf %280, %281 : vector<8x32xf32>
    %283 = arith.truncf %282 : vector<8x32xf32> to vector<8x32xbf16>
    %c0_121 = arith.constant 0 : index
    %c0_122 = arith.constant 0 : index
    %c0_123 = arith.constant 0 : index
    %284 = vector.load %arg14[%c0_121, %c0_122, %c0_123] : memref<1x8x32xbf16, #tpu.memory_space<vmem>>, vector<1x8x32xbf16>
    %285 = vector.shape_cast %284 : vector<1x8x32xbf16> to vector<8x32xbf16>
    %286 = vector.shape_cast %283 : vector<8x32xbf16> to vector<1x8x32xbf16>
    tpu.vector_store %arg14[%c0_121, %c0_122, %c0_123], %286 {strides = array<i32>} : memref<1x8x32xbf16, #tpu.memory_space<vmem>>, vector<1x8x32xbf16>,
    return
  }
  func.func @transform_0(%arg0: i32) -> (i32, i32, i32) {
    %c0_i32 = arith.constant 0 : i32
    %c0_i32_0 = arith.constant 0 : i32
    %c0_i32_1 = arith.constant 0 : i32
    return %arg0, %c0_i32, %c0_i32_0 : i32, i32, i32
  }
  func.func @transform_1(%arg0: i32) -> (i32, i32) {
    %c0_i32 = arith.constant 0 : i32
    %c0_i32_0 = arith.constant 0 : i32
    %c0_i32_1 = arith.constant 0 : i32
    return %c0_i32, %c0_i32_0 : i32, i32
  }
  func.func @transform_2(%arg0: i32) -> (i32, i32) {
    %c0_i32 = arith.constant 0 : i32
    %c0_i32_0 = arith.constant 0 : i32
    %c0_i32_1 = arith.constant 0 : i32
    return %c0_i32, %c0_i32_0 : i32, i32
  }
  func.func @transform_3(%arg0: i32) -> (i32, i32) {
    %c0_i32 = arith.constant 0 : i32
    %c0_i32_0 = arith.constant 0 : i32
    %c0_i32_1 = arith.constant 0 : i32
    return %c0_i32, %c0_i32_0 : i32, i32
  }
  func.func @transform_4(%arg0: i32) -> (i32, i32) {
    %c0_i32 = arith.constant 0 : i32
    %c0_i32_0 = arith.constant 0 : i32
    %c0_i32_1 = arith.constant 0 : i32
    return %c0_i32, %c0_i32_0 : i32, i32
  }
  func.func @transform_5(%arg0: i32) -> (i32, i32) {
    %c0_i32 = arith.constant 0 : i32
    %c0_i32_0 = arith.constant 0 : i32
    %c0_i32_1 = arith.constant 0 : i32
    return %c0_i32, %c0_i32_0 : i32, i32
  }
  func.func @transform_6(%arg0: i32) -> (i32, i32) {
    %c0_i32 = arith.constant 0 : i32
    %c0_i32_0 = arith.constant 0 : i32
    %c0_i32_1 = arith.constant 0 : i32
    return %c0_i32, %c0_i32_0 : i32, i32
  }
  func.func @transform_7(%arg0: i32) -> (i32, i32) {
    %c0_i32 = arith.constant 0 : i32
    %c0_i32_0 = arith.constant 0 : i32
    %c0_i32_1 = arith.constant 0 : i32
    return %c0_i32, %c0_i32_0 : i32, i32
  }
  func.func @transform_8(%arg0: i32) -> (i32, i32) {
    %c0_i32 = arith.constant 0 : i32
    %c0_i32_0 = arith.constant 0 : i32
    %c0_i32_1 = arith.constant 0 : i32
    return %c0_i32, %c0_i32_0 : i32, i32
  }
  func.func @transform_9(%arg0: i32) -> (i32, i32) {
    %c0_i32 = arith.constant 0 : i32
    %c0_i32_0 = arith.constant 0 : i32
    %c0_i32_1 = arith.constant 0 : i32
    return %c0_i32, %c0_i32_0 : i32, i32
  }
  func.func @transform_10(%arg0: i32) -> (i32, i32) {
    %c0_i32 = arith.constant 0 : i32
    %c0_i32_0 = arith.constant 0 : i32
    %c0_i32_1 = arith.constant 0 : i32
    return %c0_i32, %c0_i32_0 : i32, i32
  }
  func.func @transform_11(%arg0: i32) -> (i32, i32) {
    %c0_i32 = arith.constant 0 : i32
    %c0_i32_0 = arith.constant 0 : i32
    %c0_i32_1 = arith.constant 0 : i32
    return %c0_i32, %c0_i32_0 : i32, i32
  }
  func.func @transform_12(%arg0: i32) -> (i32, i32) {
    %c0_i32 = arith.constant 0 : i32
    %c0_i32_0 = arith.constant 0 : i32
    %c0_i32_1 = arith.constant 0 : i32
    return %c0_i32, %c0_i32_0 : i32, i32
  }
  func.func @transform_13(%arg0: i32) -> (i32, i32, i32) {
    %c0_i32 = arith.constant 0 : i32
    %c0_i32_0 = arith.constant 0 : i32
    %c0_i32_1 = arith.constant 0 : i32
    return %arg0, %c0_i32, %c0_i32_0 : i32, i32, i32
  }
}

module attributes {stable_mosaic.version = 11 : i64} {
  func.func @_encoder_layer_kernel(%arg0: i32, %arg1: memref<1x8x32xf32, #tpu.memory_space<vmem>>, %arg2: memref<32x96xbf16, #tpu.memory_space<vmem>>, %arg3: memref<1x96xf32, #tpu.memory_space<vmem>>, %arg4: memref<32x32xbf16, #tpu.memory_space<vmem>>, %arg5: memref<1x32xf32, #tpu.memory_space<vmem>>, %arg6: memref<1x32xf32, #tpu.memory_space<vmem>>, %arg7: memref<1x32xf32, #tpu.memory_space<vmem>>, %arg8: memref<32x2048xbf16, #tpu.memory_space<vmem>>, %arg9: memref<1x2048xf32, #tpu.memory_space<vmem>>, %arg10: memref<2048x32xbf16, #tpu.memory_space<vmem>>, %arg11: memref<1x32xf32, #tpu.memory_space<vmem>>, %arg12: memref<1x32xf32, #tpu.memory_space<vmem>>, %arg13: memref<1x32xf32, #tpu.memory_space<vmem>>, %arg14: memref<1x8x32xbf16, #tpu.memory_space<vmem>>) attributes {dimension_semantics = [#tpu.dimension_semantics<parallel>], iteration_bounds = array<i64: 2>, scalar_prefetch = 0 : i64, scratch_operands = 0 : i64, tpu.core_type = #tpu.core_type<tc>, window_params = [{transform_indices = @transform_0, window_bounds = array<i64: 1, 8, 32>}, {pipeline_mode = #tpu.pipeline_mode<synchronous>, transform_indices = @transform_1, window_bounds = array<i64: 32, 96>}, {pipeline_mode = #tpu.pipeline_mode<synchronous>, transform_indices = @transform_2, window_bounds = array<i64: 1, 96>}, {pipeline_mode = #tpu.pipeline_mode<synchronous>, transform_indices = @transform_3, window_bounds = array<i64: 32, 32>}, {pipeline_mode = #tpu.pipeline_mode<synchronous>, transform_indices = @transform_4, window_bounds = array<i64: 1, 32>}, {pipeline_mode = #tpu.pipeline_mode<synchronous>, transform_indices = @transform_5, window_bounds = array<i64: 1, 32>}, {pipeline_mode = #tpu.pipeline_mode<synchronous>, transform_indices = @transform_6, window_bounds = array<i64: 1, 32>}, {pipeline_mode = #tpu.pipeline_mode<synchronous>, transform_indices = @transform_7, window_bounds = array<i64: 32, 2048>}, {pipeline_mode = #tpu.pipeline_mode<synchronous>, transform_indices = @transform_8, window_bounds = array<i64: 1, 2048>}, {pipeline_mode = #tpu.pipeline_mode<synchronous>, transform_indices = @transform_9, window_bounds = array<i64: 2048, 32>}, {pipeline_mode = #tpu.pipeline_mode<synchronous>, transform_indices = @transform_10, window_bounds = array<i64: 1, 32>}, {pipeline_mode = #tpu.pipeline_mode<synchronous>, transform_indices = @transform_11, window_bounds = array<i64: 1, 32>}, {pipeline_mode = #tpu.pipeline_mode<synchronous>, transform_indices = @transform_12, window_bounds = array<i64: 1, 32>}, {transform_indices = @transform_13, window_bounds = array<i64: 1, 8, 32>}]} {
    %c0 = arith.constant 0 : index
    %c0_0 = arith.constant 0 : index
    %c0_1 = arith.constant 0 : index
    %0 = vector.load %arg1[%c0, %c0_0, %c0_1] : memref<1x8x32xf32, #tpu.memory_space<vmem>>, vector<1x8x32xf32>
    %1 = vector.shape_cast %0 : vector<1x8x32xf32> to vector<8x32xf32>
    %2 = arith.truncf %1 : vector<8x32xf32> to vector<8x32xbf16>
    %c0_2 = arith.constant 0 : index
    %c0_3 = arith.constant 0 : index
    %3 = vector.load %arg2[%c0_2, %c0_3] : memref<32x96xbf16, #tpu.memory_space<vmem>>, vector<32x96xbf16>
    %cst = arith.constant dense<0.000000e+00> : vector<8x96xf32>
    %4 = tpu.matmul %2, %3, %cst {dimension_numbers = #tpu.dot_dimension_numbers<[1], [0], [0], [1], [0, 0, 1, 1], [], []>} : vector<8x32xbf16>, vector<32x96xbf16>, vector<8x96xf32> -> vector<8x96xf32>
    %c0_4 = arith.constant 0 : index
    %c0_5 = arith.constant 0 : index
    %5 = vector.load %arg3[%c0_4, %c0_5] : memref<1x96xf32, #tpu.memory_space<vmem>>, vector<1x96xf32>
    %6 = vector.broadcast %5 : vector<1x96xf32> to vector<8x96xf32>
    %7 = arith.addf %4, %6 : vector<8x96xf32>
    %8 = arith.truncf %7 : vector<8x96xf32> to vector<8x96xbf16>
    %9 = vector.extract_strided_slice %8 {offsets = [0, 0], sizes = [8, 32], strides = [1, 1]} : vector<8x96xbf16> to vector<8x32xbf16>
    %10 = vector.shape_cast %9 : vector<8x32xbf16> to vector<8x4x8xbf16>
    %11 = vector.extract_strided_slice %8 {offsets = [0, 32], sizes = [8, 32], strides = [1, 1]} : vector<8x96xbf16> to vector<8x32xbf16>
    %12 = vector.shape_cast %11 : vector<8x32xbf16> to vector<8x4x8xbf16>
    %13 = vector.extract_strided_slice %8 {offsets = [0, 64], sizes = [8, 32], strides = [1, 1]} : vector<8x96xbf16> to vector<8x32xbf16>
    %14 = vector.shape_cast %13 : vector<8x32xbf16> to vector<8x4x8xbf16>
    "tpu.trace_start"() <{level = 10 : i32, message = "qhd,khd->hqk"}> : () -> ()
    %cst_6 = arith.constant dense<0.000000e+00> : vector<4x8x8xf32>
    %15 = tpu.matmul %10, %12, %cst_6 {dimension_numbers = #tpu.dot_dimension_numbers<[2], [2], [0], [0], [0, 1, 0, 0, 1, 0], [1], [1]>} : vector<8x4x8xbf16>, vector<8x4x8xbf16>, vector<4x8x8xf32> -> vector<4x8x8xf32>
    "tpu.trace_stop"() : () -> ()
    %cst_7 = arith.constant dense<0xFF800000> : vector<4x8xf32>
    %16 = vector.multi_reduction <maximumf>, %15, %cst_7 [2] : vector<4x8x8xf32> to vector<4x8xf32>
    %17 = vector.shape_cast %16 : vector<4x8xf32> to vector<4x8x1xf32>
    %18 = vector.broadcast %17 : vector<4x8x1xf32> to vector<4x8x8xf32>
    %19 = arith.subf %15, %18 : vector<4x8x8xf32>
    %20 = math.exp %19 : vector<4x8x8xf32>
    %cst_8 = arith.constant dense<0.000000e+00> : vector<4x8xf32>
    %21 = vector.multi_reduction <add>, %20, %cst_8 [2] : vector<4x8x8xf32> to vector<4x8xf32>
    %22 = vector.shape_cast %21 : vector<4x8xf32> to vector<4x8x1xf32>
    %23 = tpu.reciprocal %22 {approx = true} : vector<4x8x1xf32> -> vector<4x8x1xf32>
    %24 = vector.broadcast %23 : vector<4x8x1xf32> to vector<4x8x8xf32>
    %25 = arith.mulf %20, %24 : vector<4x8x8xf32>
    %26 = arith.truncf %25 : vector<4x8x8xf32> to vector<4x8x8xbf16>
    "tpu.trace_start"() <{level = 10 : i32, message = "hqk,khd->qhd"}> : () -> ()
    %cst_9 = arith.constant dense<0.000000e+00> : vector<4x8x8xf32>
    %27 = tpu.matmul %14, %26, %cst_9 {dimension_numbers = #tpu.dot_dimension_numbers<[0], [2], [2], [1], [0, 1, 0, 2, 1, 1], [1], [0]>} : vector<8x4x8xbf16>, vector<4x8x8xbf16>, vector<4x8x8xf32> -> vector<4x8x8xf32>
    %28 = tpu.transpose %27, [2, 0, 1] : vector<4x8x8xf32> -> vector<8x4x8xf32>
    "tpu.trace_stop"() : () -> ()
    %29 = vector.shape_cast %28 : vector<8x4x8xf32> to vector<8x32xf32>
    %30 = arith.truncf %29 : vector<8x32xf32> to vector<8x32xbf16>
    %c0_10 = arith.constant 0 : index
    %c0_11 = arith.constant 0 : index
    %31 = vector.load %arg4[%c0_10, %c0_11] : memref<32x32xbf16, #tpu.memory_space<vmem>>, vector<32x32xbf16>
    %cst_12 = arith.constant dense<0.000000e+00> : vector<8x32xf32>
    %32 = tpu.matmul %30, %31, %cst_12 {dimension_numbers = #tpu.dot_dimension_numbers<[1], [0], [0], [1], [0, 0, 1, 1], [], []>} : vector<8x32xbf16>, vector<32x32xbf16>, vector<8x32xf32> -> vector<8x32xf32>
    %c0_13 = arith.constant 0 : index
    %c0_14 = arith.constant 0 : index
    %33 = vector.load %arg5[%c0_13, %c0_14] : memref<1x32xf32, #tpu.memory_space<vmem>>, vector<1x32xf32>
    %34 = vector.broadcast %33 : vector<1x32xf32> to vector<8x32xf32>
    %35 = arith.addf %32, %34 : vector<8x32xf32>
    %36 = arith.addf %1, %35 : vector<8x32xf32>
    %c0_15 = arith.constant 0 : index
    %c0_16 = arith.constant 0 : index
    %37 = vector.load %arg6[%c0_15, %c0_16] : memref<1x32xf32, #tpu.memory_space<vmem>>, vector<1x32xf32>
    %c0_17 = arith.constant 0 : index
    %c0_18 = arith.constant 0 : index
    %38 = vector.load %arg7[%c0_17, %c0_18] : memref<1x32xf32, #tpu.memory_space<vmem>>, vector<1x32xf32>
    %cst_19 = arith.constant dense<0.000000e+00> : vector<8xf32>
    %39 = vector.multi_reduction <add>, %36, %cst_19 [1] : vector<8x32xf32> to vector<8xf32>
    %40 = vector.shape_cast %39 : vector<8xf32> to vector<8x1xf32>
    %cst_20 = arith.constant 3.200000e+01 : f32
    %41 = vector.broadcast %cst_20 : f32 to vector<8x1xf32>
    %42 = arith.divf %40, %41 : vector<8x1xf32>
    %43 = vector.broadcast %42 : vector<8x1xf32> to vector<8x32xf32>
    %44 = arith.subf %36, %43 : vector<8x32xf32>
    %45 = arith.mulf %44, %44 : vector<8x32xf32>
    %cst_21 = arith.constant dense<0.000000e+00> : vector<8xf32>
    %46 = vector.multi_reduction <add>, %45, %cst_21 [1] : vector<8x32xf32> to vector<8xf32>
    %47 = vector.shape_cast %46 : vector<8xf32> to vector<8x1xf32>
    %cst_22 = arith.constant 3.200000e+01 : f32
    %48 = vector.broadcast %cst_22 : f32 to vector<8x1xf32>
    %49 = arith.divf %47, %48 : vector<8x1xf32>
    %50 = vector.broadcast %42 : vector<8x1xf32> to vector<8x32xf32>
    %51 = arith.subf %36, %50 : vector<8x32xf32>
    %cst_23 = arith.constant 9.99999974E-6 : f32
    %52 = vector.broadcast %cst_23 : f32 to vector<8x1xf32>
    %53 = arith.addf %49, %52 : vector<8x1xf32>
    %54 = math.rsqrt %53 : vector<8x1xf32>
    %55 = vector.broadcast %54 : vector<8x1xf32> to vector<8x32xf32>
    %56 = arith.mulf %51, %55 : vector<8x32xf32>
    %57 = vector.broadcast %37 : vector<1x32xf32> to vector<8x32xf32>
    %58 = arith.mulf %56, %57 : vector<8x32xf32>
    %59 = vector.broadcast %38 : vector<1x32xf32> to vector<8x32xf32>
    %60 = arith.addf %58, %59 : vector<8x32xf32>
    %61 = arith.truncf %60 : vector<8x32xf32> to vector<8x32xbf16>
    %cst_24 = arith.constant 0.000000e+00 : f32
    %62 = vector.broadcast %cst_24 : f32 to vector<8x32xf32>
    %c0_25 = arith.constant 0 : index
    %c0_26 = arith.constant 0 : index
    %63 = vector.load %arg8[%c0_25, %c0_26] : memref<32x2048xbf16, #tpu.memory_space<vmem>>, vector<32x512xbf16>
    %cst_27 = arith.constant dense<0.000000e+00> : vector<8x512xf32>
    %64 = tpu.matmul %61, %63, %cst_27 {dimension_numbers = #tpu.dot_dimension_numbers<[1], [0], [0], [1], [0, 0, 1, 1], [], []>} : vector<8x32xbf16>, vector<32x512xbf16>, vector<8x512xf32> -> vector<8x512xf32>
    %c0_28 = arith.constant 0 : index
    %c0_29 = arith.constant 0 : index
    %65 = vector.load %arg9[%c0_28, %c0_29] : memref<1x2048xf32, #tpu.memory_space<vmem>>, vector<1x512xf32>
    %66 = vector.broadcast %65 : vector<1x512xf32> to vector<8x512xf32>
    %67 = arith.addf %64, %66 : vector<8x512xf32>
    %cst_30 = arith.constant 5.000000e-01 : f32
    %68 = vector.broadcast %cst_30 : f32 to vector<8x512xf32>
    %69 = arith.mulf %68, %67 : vector<8x512xf32>
    %cst_31 = arith.constant 0.707106769 : f32
    %70 = vector.broadcast %cst_31 : f32 to vector<8x512xf32>
    %71 = arith.mulf %67, %70 : vector<8x512xf32>
    %72 = math.absf %71 : vector<8x512xf32>
    %cst_32 = arith.constant 0.327591091 : f32
    %73 = vector.broadcast %cst_32 : f32 to vector<8x512xf32>
    %74 = arith.mulf %73, %72 : vector<8x512xf32>
    %cst_33 = arith.constant 1.000000e+00 : f32
    %75 = vector.broadcast %cst_33 : f32 to vector<8x512xf32>
    %76 = arith.addf %75, %74 : vector<8x512xf32>
    %77 = tpu.reciprocal %76 {approx = true} : vector<8x512xf32> -> vector<8x512xf32>
    %cst_34 = arith.constant 1.06140542 : f32
    %78 = vector.broadcast %cst_34 : f32 to vector<8x512xf32>
    %79 = arith.mulf %78, %77 : vector<8x512xf32>
    %cst_35 = arith.constant -1.45315206 : f32
    %80 = vector.broadcast %cst_35 : f32 to vector<8x512xf32>
    %81 = arith.addf %79, %80 : vector<8x512xf32>
    %82 = arith.mulf %81, %77 : vector<8x512xf32>
    %cst_36 = arith.constant 1.42141378 : f32
    %83 = vector.broadcast %cst_36 : f32 to vector<8x512xf32>
    %84 = arith.addf %82, %83 : vector<8x512xf32>
    %85 = arith.mulf %84, %77 : vector<8x512xf32>
    %cst_37 = arith.constant -0.284496725 : f32
    %86 = vector.broadcast %cst_37 : f32 to vector<8x512xf32>
    %87 = arith.addf %85, %86 : vector<8x512xf32>
    %88 = arith.mulf %87, %77 : vector<8x512xf32>
    %cst_38 = arith.constant 0.254829586 : f32
    %89 = vector.broadcast %cst_38 : f32 to vector<8x512xf32>
    %90 = arith.addf %88, %89 : vector<8x512xf32>
    %91 = arith.mulf %90, %77 : vector<8x512xf32>
    %cst_39 = arith.constant 0.000000e+00 : f32
    %92 = vector.broadcast %cst_39 : f32 to vector<8x512xf32>
    %93 = arith.subf %92, %72 : vector<8x512xf32>
    %94 = arith.mulf %93, %72 : vector<8x512xf32>
    %95 = math.exp %94 : vector<8x512xf32>
    %96 = arith.mulf %91, %95 : vector<8x512xf32>
    %cst_40 = arith.constant 1.000000e+00 : f32
    %97 = vector.broadcast %cst_40 : f32 to vector<8x512xf32>
    %98 = arith.subf %97, %96 : vector<8x512xf32>
    %cst_41 = arith.constant 0.000000e+00 : f32
    %99 = vector.broadcast %cst_41 : f32 to vector<8x512xf32>
    %100 = arith.cmpf oge, %71, %99 : vector<8x512xf32>
    %cst_42 = arith.constant 0.000000e+00 : f32
    %101 = vector.broadcast %cst_42 : f32 to vector<8x512xf32>
    %102 = arith.subf %101, %98 : vector<8x512xf32>
    %103 = arith.select %100, %98, %102 : vector<8x512xi1>, vector<8x512xf32>
    %cst_43 = arith.constant 1.000000e+00 : f32
    %104 = vector.broadcast %cst_43 : f32 to vector<8x512xf32>
    %105 = arith.addf %104, %103 : vector<8x512xf32>
    %106 = arith.mulf %69, %105 : vector<8x512xf32>
    %107 = arith.truncf %106 : vector<8x512xf32> to vector<8x512xbf16>
    %c0_44 = arith.constant 0 : index
    %c0_45 = arith.constant 0 : index
    %108 = vector.load %arg10[%c0_44, %c0_45] : memref<2048x32xbf16, #tpu.memory_space<vmem>>, vector<512x32xbf16>
    %cst_46 = arith.constant dense<0.000000e+00> : vector<8x32xf32>
    %109 = tpu.matmul %107, %108, %cst_46 {dimension_numbers = #tpu.dot_dimension_numbers<[1], [0], [0], [1], [0, 0, 1, 1], [], []>} : vector<8x512xbf16>, vector<512x32xbf16>, vector<8x32xf32> -> vector<8x32xf32>
    %110 = arith.addf %62, %109 : vector<8x32xf32>
    %c0_47 = arith.constant 0 : index
    %c512 = arith.constant 512 : index
    %111 = vector.load %arg8[%c0_47, %c512] : memref<32x2048xbf16, #tpu.memory_space<vmem>>, vector<32x512xbf16>
    %cst_48 = arith.constant dense<0.000000e+00> : vector<8x512xf32>
    %112 = tpu.matmul %61, %111, %cst_48 {dimension_numbers = #tpu.dot_dimension_numbers<[1], [0], [0], [1], [0, 0, 1, 1], [], []>} : vector<8x32xbf16>, vector<32x512xbf16>, vector<8x512xf32> -> vector<8x512xf32>
    %c0_49 = arith.constant 0 : index
    %c512_50 = arith.constant 512 : index
    %113 = vector.load %arg9[%c0_49, %c512_50] : memref<1x2048xf32, #tpu.memory_space<vmem>>, vector<1x512xf32>
    %114 = vector.broadcast %113 : vector<1x512xf32> to vector<8x512xf32>
    %115 = arith.addf %112, %114 : vector<8x512xf32>
    %cst_51 = arith.constant 5.000000e-01 : f32
    %116 = vector.broadcast %cst_51 : f32 to vector<8x512xf32>
    %117 = arith.mulf %116, %115 : vector<8x512xf32>
    %cst_52 = arith.constant 0.707106769 : f32
    %118 = vector.broadcast %cst_52 : f32 to vector<8x512xf32>
    %119 = arith.mulf %115, %118 : vector<8x512xf32>
    %120 = math.absf %119 : vector<8x512xf32>
    %cst_53 = arith.constant 0.327591091 : f32
    %121 = vector.broadcast %cst_53 : f32 to vector<8x512xf32>
    %122 = arith.mulf %121, %120 : vector<8x512xf32>
    %cst_54 = arith.constant 1.000000e+00 : f32
    %123 = vector.broadcast %cst_54 : f32 to vector<8x512xf32>
    %124 = arith.addf %123, %122 : vector<8x512xf32>
    %125 = tpu.reciprocal %124 {approx = true} : vector<8x512xf32> -> vector<8x512xf32>
    %cst_55 = arith.constant 1.06140542 : f32
    %126 = vector.broadcast %cst_55 : f32 to vector<8x512xf32>
    %127 = arith.mulf %126, %125 : vector<8x512xf32>
    %cst_56 = arith.constant -1.45315206 : f32
    %128 = vector.broadcast %cst_56 : f32 to vector<8x512xf32>
    %129 = arith.addf %127, %128 : vector<8x512xf32>
    %130 = arith.mulf %129, %125 : vector<8x512xf32>
    %cst_57 = arith.constant 1.42141378 : f32
    %131 = vector.broadcast %cst_57 : f32 to vector<8x512xf32>
    %132 = arith.addf %130, %131 : vector<8x512xf32>
    %133 = arith.mulf %132, %125 : vector<8x512xf32>
    %cst_58 = arith.constant -0.284496725 : f32
    %134 = vector.broadcast %cst_58 : f32 to vector<8x512xf32>
    %135 = arith.addf %133, %134 : vector<8x512xf32>
    %136 = arith.mulf %135, %125 : vector<8x512xf32>
    %cst_59 = arith.constant 0.254829586 : f32
    %137 = vector.broadcast %cst_59 : f32 to vector<8x512xf32>
    %138 = arith.addf %136, %137 : vector<8x512xf32>
    %139 = arith.mulf %138, %125 : vector<8x512xf32>
    %cst_60 = arith.constant 0.000000e+00 : f32
    %140 = vector.broadcast %cst_60 : f32 to vector<8x512xf32>
    %141 = arith.subf %140, %120 : vector<8x512xf32>
    %142 = arith.mulf %141, %120 : vector<8x512xf32>
    %143 = math.exp %142 : vector<8x512xf32>
    %144 = arith.mulf %139, %143 : vector<8x512xf32>
    %cst_61 = arith.constant 1.000000e+00 : f32
    %145 = vector.broadcast %cst_61 : f32 to vector<8x512xf32>
    %146 = arith.subf %145, %144 : vector<8x512xf32>
    %cst_62 = arith.constant 0.000000e+00 : f32
    %147 = vector.broadcast %cst_62 : f32 to vector<8x512xf32>
    %148 = arith.cmpf oge, %119, %147 : vector<8x512xf32>
    %cst_63 = arith.constant 0.000000e+00 : f32
    %149 = vector.broadcast %cst_63 : f32 to vector<8x512xf32>
    %150 = arith.subf %149, %146 : vector<8x512xf32>
    %151 = arith.select %148, %146, %150 : vector<8x512xi1>, vector<8x512xf32>
    %cst_64 = arith.constant 1.000000e+00 : f32
    %152 = vector.broadcast %cst_64 : f32 to vector<8x512xf32>
    %153 = arith.addf %152, %151 : vector<8x512xf32>
    %154 = arith.mulf %117, %153 : vector<8x512xf32>
    %155 = arith.truncf %154 : vector<8x512xf32> to vector<8x512xbf16>
    %c512_65 = arith.constant 512 : index
    %c0_66 = arith.constant 0 : index
    %156 = vector.load %arg10[%c512_65, %c0_66] : memref<2048x32xbf16, #tpu.memory_space<vmem>>, vector<512x32xbf16>
    %cst_67 = arith.constant dense<0.000000e+00> : vector<8x32xf32>
    %157 = tpu.matmul %155, %156, %cst_67 {dimension_numbers = #tpu.dot_dimension_numbers<[1], [0], [0], [1], [0, 0, 1, 1], [], []>} : vector<8x512xbf16>, vector<512x32xbf16>, vector<8x32xf32> -> vector<8x32xf32>
    %158 = arith.addf %110, %157 : vector<8x32xf32>
    %c0_68 = arith.constant 0 : index
    %c1024 = arith.constant 1024 : index
    %159 = vector.load %arg8[%c0_68, %c1024] : memref<32x2048xbf16, #tpu.memory_space<vmem>>, vector<32x512xbf16>
    %cst_69 = arith.constant dense<0.000000e+00> : vector<8x512xf32>
    %160 = tpu.matmul %61, %159, %cst_69 {dimension_numbers = #tpu.dot_dimension_numbers<[1], [0], [0], [1], [0, 0, 1, 1], [], []>} : vector<8x32xbf16>, vector<32x512xbf16>, vector<8x512xf32> -> vector<8x512xf32>
    %c0_70 = arith.constant 0 : index
    %c1024_71 = arith.constant 1024 : index
    %161 = vector.load %arg9[%c0_70, %c1024_71] : memref<1x2048xf32, #tpu.memory_space<vmem>>, vector<1x512xf32>
    %162 = vector.broadcast %161 : vector<1x512xf32> to vector<8x512xf32>
    %163 = arith.addf %160, %162 : vector<8x512xf32>
    %cst_72 = arith.constant 5.000000e-01 : f32
    %164 = vector.broadcast %cst_72 : f32 to vector<8x512xf32>
    %165 = arith.mulf %164, %163 : vector<8x512xf32>
    %cst_73 = arith.constant 0.707106769 : f32
    %166 = vector.broadcast %cst_73 : f32 to vector<8x512xf32>
    %167 = arith.mulf %163, %166 : vector<8x512xf32>
    %168 = math.absf %167 : vector<8x512xf32>
    %cst_74 = arith.constant 0.327591091 : f32
    %169 = vector.broadcast %cst_74 : f32 to vector<8x512xf32>
    %170 = arith.mulf %169, %168 : vector<8x512xf32>
    %cst_75 = arith.constant 1.000000e+00 : f32
    %171 = vector.broadcast %cst_75 : f32 to vector<8x512xf32>
    %172 = arith.addf %171, %170 : vector<8x512xf32>
    %173 = tpu.reciprocal %172 {approx = true} : vector<8x512xf32> -> vector<8x512xf32>
    %cst_76 = arith.constant 1.06140542 : f32
    %174 = vector.broadcast %cst_76 : f32 to vector<8x512xf32>
    %175 = arith.mulf %174, %173 : vector<8x512xf32>
    %cst_77 = arith.constant -1.45315206 : f32
    %176 = vector.broadcast %cst_77 : f32 to vector<8x512xf32>
    %177 = arith.addf %175, %176 : vector<8x512xf32>
    %178 = arith.mulf %177, %173 : vector<8x512xf32>
    %cst_78 = arith.constant 1.42141378 : f32
    %179 = vector.broadcast %cst_78 : f32 to vector<8x512xf32>
    %180 = arith.addf %178, %179 : vector<8x512xf32>
    %181 = arith.mulf %180, %173 : vector<8x512xf32>
    %cst_79 = arith.constant -0.284496725 : f32
    %182 = vector.broadcast %cst_79 : f32 to vector<8x512xf32>
    %183 = arith.addf %181, %182 : vector<8x512xf32>
    %184 = arith.mulf %183, %173 : vector<8x512xf32>
    %cst_80 = arith.constant 0.254829586 : f32
    %185 = vector.broadcast %cst_80 : f32 to vector<8x512xf32>
    %186 = arith.addf %184, %185 : vector<8x512xf32>
    %187 = arith.mulf %186, %173 : vector<8x512xf32>
    %cst_81 = arith.constant 0.000000e+00 : f32
    %188 = vector.broadcast %cst_81 : f32 to vector<8x512xf32>
    %189 = arith.subf %188, %168 : vector<8x512xf32>
    %190 = arith.mulf %189, %168 : vector<8x512xf32>
    %191 = math.exp %190 : vector<8x512xf32>
    %192 = arith.mulf %187, %191 : vector<8x512xf32>
    %cst_82 = arith.constant 1.000000e+00 : f32
    %193 = vector.broadcast %cst_82 : f32 to vector<8x512xf32>
    %194 = arith.subf %193, %192 : vector<8x512xf32>
    %cst_83 = arith.constant 0.000000e+00 : f32
    %195 = vector.broadcast %cst_83 : f32 to vector<8x512xf32>
    %196 = arith.cmpf oge, %167, %195 : vector<8x512xf32>
    %cst_84 = arith.constant 0.000000e+00 : f32
    %197 = vector.broadcast %cst_84 : f32 to vector<8x512xf32>
    %198 = arith.subf %197, %194 : vector<8x512xf32>
    %199 = arith.select %196, %194, %198 : vector<8x512xi1>, vector<8x512xf32>
    %cst_85 = arith.constant 1.000000e+00 : f32
    %200 = vector.broadcast %cst_85 : f32 to vector<8x512xf32>
    %201 = arith.addf %200, %199 : vector<8x512xf32>
    %202 = arith.mulf %165, %201 : vector<8x512xf32>
    %203 = arith.truncf %202 : vector<8x512xf32> to vector<8x512xbf16>
    %c1024_86 = arith.constant 1024 : index
    %c0_87 = arith.constant 0 : index
    %204 = vector.load %arg10[%c1024_86, %c0_87] : memref<2048x32xbf16, #tpu.memory_space<vmem>>, vector<512x32xbf16>
    %cst_88 = arith.constant dense<0.000000e+00> : vector<8x32xf32>
    %205 = tpu.matmul %203, %204, %cst_88 {dimension_numbers = #tpu.dot_dimension_numbers<[1], [0], [0], [1], [0, 0, 1, 1], [], []>} : vector<8x512xbf16>, vector<512x32xbf16>, vector<8x32xf32> -> vector<8x32xf32>
    %206 = arith.addf %158, %205 : vector<8x32xf32>
    %c0_89 = arith.constant 0 : index
    %c1536 = arith.constant 1536 : index
    %207 = vector.load %arg8[%c0_89, %c1536] : memref<32x2048xbf16, #tpu.memory_space<vmem>>, vector<32x512xbf16>
    %cst_90 = arith.constant dense<0.000000e+00> : vector<8x512xf32>
    %208 = tpu.matmul %61, %207, %cst_90 {dimension_numbers = #tpu.dot_dimension_numbers<[1], [0], [0], [1], [0, 0, 1, 1], [], []>} : vector<8x32xbf16>, vector<32x512xbf16>, vector<8x512xf32> -> vector<8x512xf32>
    %c0_91 = arith.constant 0 : index
    %c1536_92 = arith.constant 1536 : index
    %209 = vector.load %arg9[%c0_91, %c1536_92] : memref<1x2048xf32, #tpu.memory_space<vmem>>, vector<1x512xf32>
    %210 = vector.broadcast %209 : vector<1x512xf32> to vector<8x512xf32>
    %211 = arith.addf %208, %210 : vector<8x512xf32>
    %cst_93 = arith.constant 5.000000e-01 : f32
    %212 = vector.broadcast %cst_93 : f32 to vector<8x512xf32>
    %213 = arith.mulf %212, %211 : vector<8x512xf32>
    %cst_94 = arith.constant 0.707106769 : f32
    %214 = vector.broadcast %cst_94 : f32 to vector<8x512xf32>
    %215 = arith.mulf %211, %214 : vector<8x512xf32>
    %216 = math.absf %215 : vector<8x512xf32>
    %cst_95 = arith.constant 0.327591091 : f32
    %217 = vector.broadcast %cst_95 : f32 to vector<8x512xf32>
    %218 = arith.mulf %217, %216 : vector<8x512xf32>
    %cst_96 = arith.constant 1.000000e+00 : f32
    %219 = vector.broadcast %cst_96 : f32 to vector<8x512xf32>
    %220 = arith.addf %219, %218 : vector<8x512xf32>
    %221 = tpu.reciprocal %220 {approx = true} : vector<8x512xf32> -> vector<8x512xf32>
    %cst_97 = arith.constant 1.06140542 : f32
    %222 = vector.broadcast %cst_97 : f32 to vector<8x512xf32>
    %223 = arith.mulf %222, %221 : vector<8x512xf32>
    %cst_98 = arith.constant -1.45315206 : f32
    %224 = vector.broadcast %cst_98 : f32 to vector<8x512xf32>
    %225 = arith.addf %223, %224 : vector<8x512xf32>
    %226 = arith.mulf %225, %221 : vector<8x512xf32>
    %cst_99 = arith.constant 1.42141378 : f32
    %227 = vector.broadcast %cst_99 : f32 to vector<8x512xf32>
    %228 = arith.addf %226, %227 : vector<8x512xf32>
    %229 = arith.mulf %228, %221 : vector<8x512xf32>
    %cst_100 = arith.constant -0.284496725 : f32
    %230 = vector.broadcast %cst_100 : f32 to vector<8x512xf32>
    %231 = arith.addf %229, %230 : vector<8x512xf32>
    %232 = arith.mulf %231, %221 : vector<8x512xf32>
    %cst_101 = arith.constant 0.254829586 : f32
    %233 = vector.broadcast %cst_101 : f32 to vector<8x512xf32>
    %234 = arith.addf %232, %233 : vector<8x512xf32>
    %235 = arith.mulf %234, %221 : vector<8x512xf32>
    %cst_102 = arith.constant 0.000000e+00 : f32
    %236 = vector.broadcast %cst_102 : f32 to vector<8x512xf32>
    %237 = arith.subf %236, %216 : vector<8x512xf32>
    %238 = arith.mulf %237, %216 : vector<8x512xf32>
    %239 = math.exp %238 : vector<8x512xf32>
    %240 = arith.mulf %235, %239 : vector<8x512xf32>
    %cst_103 = arith.constant 1.000000e+00 : f32
    %241 = vector.broadcast %cst_103 : f32 to vector<8x512xf32>
    %242 = arith.subf %241, %240 : vector<8x512xf32>
    %cst_104 = arith.constant 0.000000e+00 : f32
    %243 = vector.broadcast %cst_104 : f32 to vector<8x512xf32>
    %244 = arith.cmpf oge, %215, %243 : vector<8x512xf32>
    %cst_105 = arith.constant 0.000000e+00 : f32
    %245 = vector.broadcast %cst_105 : f32 to vector<8x512xf32>
    %246 = arith.subf %245, %242 : vector<8x512xf32>
    %247 = arith.select %244, %242, %246 : vector<8x512xi1>, vector<8x512xf32>
    %cst_106 = arith.constant 1.000000e+00 : f32
    %248 = vector.broadcast %cst_106 : f32 to vector<8x512xf32>
    %249 = arith.addf %248, %247 : vector<8x512xf32>
    %250 = arith.mulf %213, %249 : vector<8x512xf32>
    %251 = arith.truncf %250 : vector<8x512xf32> to vector<8x512xbf16>
    %c1536_107 = arith.constant 1536 : index
    %c0_108 = arith.constant 0 : index
    %252 = vector.load %arg10[%c1536_107, %c0_108] : memref<2048x32xbf16, #tpu.memory_space<vmem>>, vector<512x32xbf16>
    %cst_109 = arith.constant dense<0.000000e+00> : vector<8x32xf32>
    %253 = tpu.matmul %251, %252, %cst_109 {dimension_numbers = #tpu.dot_dimension_numbers<[1], [0], [0], [1], [0, 0, 1, 1], [], []>} : vector<8x512xbf16>, vector<512x32xbf16>, vector<8x32xf32> -> vector<8x32xf32>
    %254 = arith.addf %206, %253 : vector<8x32xf32>
    %c0_110 = arith.constant 0 : index
    %c0_111 = arith.constant 0 : index
    %255 = vector.load %arg11[%c0_110, %c0_111] : memref<1x32xf32, #tpu.memory_space<vmem>>, vector<1x32xf32>
    %256 = vector.broadcast %255 : vector<1x32xf32> to vector<8x32xf32>
    %257 = arith.addf %254, %256 : vector<8x32xf32>
    %258 = arith.addf %60, %257 : vector<8x32xf32>
    %c0_112 = arith.constant 0 : index
    %c0_113 = arith.constant 0 : index
    %259 = vector.load %arg12[%c0_112, %c0_113] : memref<1x32xf32, #tpu.memory_space<vmem>>, vector<1x32xf32>
    %c0_114 = arith.constant 0 : index
    %c0_115 = arith.constant 0 : index
    %260 = vector.load %arg13[%c0_114, %c0_115] : memref<1x32xf32, #tpu.memory_space<vmem>>, vector<1x32xf32>
    %cst_116 = arith.constant dense<0.000000e+00> : vector<8xf32>
    %261 = vector.multi_reduction <add>, %258, %cst_116 [1] : vector<8x32xf32> to vector<8xf32>
    %262 = vector.shape_cast %261 : vector<8xf32> to vector<8x1xf32>
    %cst_117 = arith.constant 3.200000e+01 : f32
    %263 = vector.broadcast %cst_117 : f32 to vector<8x1xf32>
    %264 = arith.divf %262, %263 : vector<8x1xf32>
    %265 = vector.broadcast %264 : vector<8x1xf32> to vector<8x32xf32>
    %266 = arith.subf %258, %265 : vector<8x32xf32>
    %267 = arith.mulf %266, %266 : vector<8x32xf32>
    %cst_118 = arith.constant dense<0.000000e+00> : vector<8xf32>
    %268 = vector.multi_reduction <add>, %267, %cst_118 [1] : vector<8x32xf32> to vector<8xf32>
    %269 = vector.shape_cast %268 : vector<8xf32> to vector<8x1xf32>
    %cst_119 = arith.constant 3.200000e+01 : f32
    %270 = vector.broadcast %cst_119 : f32 to vector<8x1xf32>
    %271 = arith.divf %269, %270 : vector<8x1xf32>
    %272 = vector.broadcast %264 : vector<8x1xf32> to vector<8x32xf32>
    %273 = arith.subf %258, %272 : vector<8x32xf32>
    %cst_120 = arith.constant 9.99999974E-6 : f32
    %274 = vector.broadcast %cst_120 : f32 to vector<8x1xf32>
    %275 = arith.addf %271, %274 : vector<8x1xf32>
    %276 = math.rsqrt %275 : vector<8x1xf32>
    %277 = vector.broadcast %276 : vector<8x1xf32> to vector<8x32xf32>
    %278 = arith.mulf %273, %277 : vector<8x32xf32>
    %279 = vector.broadcast %259 : vector<1x32xf32> to vector<8x32xf32>
    %280 = arith.mulf %278, %279 : vector<8x32xf32>
    %281 = vector.broadcast %260 : vector<1x32xf32> to vector<8x32xf32>
    %282 = arith.addf %280, %281 : vector<8x32xf32>
    %283 = arith.truncf %282 : vector<8x32xf32> to vector<8x32xbf16>
    %c0_121 = arith.constant 0 : index
    %c0_122 = arith.constant 0 : index
    %c0_123 = arith.constant 0 : index
    %284 = vector.load %arg14[%c0_121, %c0_122, %c0_123] : memref<1x8x32xbf16, #tpu.memory_space<vmem>>, vector<1x8x32xbf16>
    %285 = vector.shape_cast %284 : vector<1x8x32xbf16> to vector<8x32xbf16>
    %286 = vector.shape_cast %283 : vector<8x32xbf16> to vector<1x8x32xbf16>
    tpu.vector_store %arg14[%c0_121, %c0_122, %c0_123], %286 {strides = array<i32>} : memref<1x8x32xbf16, #tpu.memory_space<vmem>>, vector<1x8x32xbf16>,
    return
  }
  func.func @transform_0(%arg0: i32) -> (i32, i32, i32) {
    %c0_i32 = arith.constant 0 : i32
    %c0_i32_0 = arith.constant 0 : i32
    %c0_i32_1 = arith.constant 0 : i32
    return %arg0, %c0_i32, %c0_i32_0 : i32, i32, i32
  }
  func.func @transform_1(%arg0: i32) -> (i32, i32) {
    %c0_i32 = arith.constant 0 : i32
    %c0_i32_0 = arith.constant 0 : i32
    %c0_i32_1 = arith.constant 0 : i32
    return %c0_i32, %c0_i32_0 : i32, i32
  }
  func.func @transform_2(%arg0: i32) -> (i32, i32) {
    %c0_i32 = arith.constant 0 : i32
    %c0_i32_0 = arith.constant 0 : i32
    %c0_i32_1 = arith.constant 0 : i32
    return %c0_i32, %c0_i32_0 : i32, i32
  }
  func.func @transform_3(%arg0: i32) -> (i32, i32) {
    %c0_i32 = arith.constant 0 : i32
    %c0_i32_0 = arith.constant 0 : i32
    %c0_i32_1 = arith.constant 0 : i32
    return %c0_i32, %c0_i32_0 : i32, i32
  }
  func.func @transform_4(%arg0: i32) -> (i32, i32) {
    %c0_i32 = arith.constant 0 : i32
    %c0_i32_0 = arith.constant 0 : i32
    %c0_i32_1 = arith.constant 0 : i32
    return %c0_i32, %c0_i32_0 : i32, i32
  }
  func.func @transform_5(%arg0: i32) -> (i32, i32) {
    %c0_i32 = arith.constant 0 : i32
    %c0_i32_0 = arith.constant 0 : i32
    %c0_i32_1 = arith.constant 0 : i32
    return %c0_i32, %c0_i32_0 : i32, i32
  }
  func.func @transform_6(%arg0: i32) -> (i32, i32) {
    %c0_i32 = arith.constant 0 : i32
    %c0_i32_0 = arith.constant 0 : i32
    %c0_i32_1 = arith.constant 0 : i32
    return %c0_i32, %c0_i32_0 : i32, i32
  }
  func.func @transform_7(%arg0: i32) -> (i32, i32) {
    %c0_i32 = arith.constant 0 : i32
    %c0_i32_0 = arith.constant 0 : i32
    %c0_i32_1 = arith.constant 0 : i32
    return %c0_i32, %c0_i32_0 : i32, i32
  }
  func.func @transform_8(%arg0: i32) -> (i32, i32) {
    %c0_i32 = arith.constant 0 : i32
    %c0_i32_0 = arith.constant 0 : i32
    %c0_i32_1 = arith.constant 0 : i32
    return %c0_i32, %c0_i32_0 : i32, i32
  }
  func.func @transform_9(%arg0: i32) -> (i32, i32) {
    %c0_i32 = arith.constant 0 : i32
    %c0_i32_0 = arith.constant 0 : i32
    %c0_i32_1 = arith.constant 0 : i32
    return %c0_i32, %c0_i32_0 : i32, i32
  }
  func.func @transform_10(%arg0: i32) -> (i32, i32) {
    %c0_i32 = arith.constant 0 : i32
    %c0_i32_0 = arith.constant 0 : i32
    %c0_i32_1 = arith.constant 0 : i32
    return %c0_i32, %c0_i32_0 : i32, i32
  }
  func.func @transform_11(%arg0: i32) -> (i32, i32) {
    %c0_i32 = arith.constant 0 : i32
    %c0_i32_0 = arith.constant 0 : i32
    %c0_i32_1 = arith.constant 0 : i32
    return %c0_i32, %c0_i32_0 : i32, i32
  }
  func.func @transform_12(%arg0: i32) -> (i32, i32) {
    %c0_i32 = arith.constant 0 : i32
    %c0_i32_0 = arith.constant 0 : i32
    %c0_i32_1 = arith.constant 0 : i32
    return %c0_i32, %c0_i32_0 : i32, i32
  }
  func.func @transform_13(%arg0: i32) -> (i32, i32, i32) {
    %c0_i32 = arith.constant 0 : i32
    %c0_i32_0 = arith.constant 0 : i32
    %c0_i32_1 = arith.constant 0 : i32
    return %arg0, %c0_i32, %c0_i32_0 : i32, i32, i32
  }
}

</mosaic_0001>

<bundles_post_ra>
// kernel: tpu_custom_call.1
= control target key start
LH: loop header
LB: loop body
LE: loop exit
PB: predicated region body
PF: predicated region fallthrough
CT: control target
= control target key end

     0   :  { %s5854_s0 = inlined_call_operand.vmem [shape: f32[2,8,32], index: 0, kind: input, shape index: {}]   ;;  %s5855_s1 = inlined_call_operand.vmem [shape: bf16[32,96], index: 1, kind: input, shape index: {}]   ;;  %s5856_s2 = inlined_call_operand.vmem [shape: f32[1,96], index: 2, kind: input, shape index: {}]   ;;  %s5857_s3 = inlined_call_operand.vmem [shape: bf16[32,32], index: 3, kind: input, shape index: {}]   ;;  %s5858_s4 = inlined_call_operand.vmem [shape: f32[1,32], index: 4, kind: input, shape index: {}]   ;;  %s5859_s5 = inlined_call_operand.vmem [shape: f32[1,32], index: 5, kind: input, shape index: {}]   ;;  %s5860_s6 = inlined_call_operand.vmem [shape: f32[1,32], index: 6, kind: input, shape index: {}]   ;;  %s5861_s7 = inlined_call_operand.vmem [shape: bf16[32,2048], index: 7, kind: input, shape index: {}]   ;;  %s5862_s8 = inlined_call_operand.vmem [shape: f32[1,2048], index: 8, kind: input, shape index: {}]   ;;  %s5863_s9 = inlined_call_operand.vmem [shape: bf16[2048,32], index: 9, kind: input, shape index: {}]   ;;  %s5864_s10 = inlined_call_operand.vmem [shape: f32[1,32], index: 10, kind: input, shape index: {}]   ;;  %s5865_s11 = inlined_call_operand.vmem [shape: f32[1,32], index: 11, kind: input, shape index: {}]   ;;  %s5866_s12 = inlined_call_operand.vmem [shape: f32[1,32], index: 12, kind: input, shape index: {}]   ;;  %s5867_s13 = inlined_call_operand.hbm [shape: bf16[2,8,32], index: 13, kind: output, shape index: {}]  }
   0x1   :  { %5868 = sst [smem:[#allocation5_spill]] %s5854_s0 }
   0x2   :  { %5869 = sst [smem:[#allocation6_spill]] %s5855_s1 }
   0x3   :  { %5870 = sst [smem:[#allocation7_spill]] %s5856_s2 }
   0x4   :  { %5871 = sst [smem:[#allocation8_spill]] %s5857_s3 }
   0x5   :  { %18 = vsyncpa [#allocation3], 0 }
   0x6   :  { %20 = vsyncpa [#allocation3 + $0x1], 0  ;;  %s4846_s25 = smov 0   ;;  %s4848_s26 = smov 0  }
   0x7   :  { %s4850_s27 = smov 0   ;;  %s4852_s28 = smov 0  }
   0x8 LB: > { %s4867_s29 = sadd.s32 4294967295, %s4760_s28   ;;  %s3967_s30 = sadd.s32 4294967294, %s4760_s28   ;;  %s4760_s28 = sphi %s4852_s28, %s5881_s28   ;;  %s4756_s27 = sphi %s4850_s27, %s5880_s27   ;;  %s4752_s26 = sphi %s4848_s26, %s5879_s26   ;;  %s4748_s25 = sphi %s4846_s25, %s5878_s25  }
   0x9   : > { %s4871_s14 = sadd.s32 1, %s4760_s28   ;;  %s311_s15 = sadd.s32 1, %s4756_s27 }
   0xa   : > { %s308_s16 = ssub.s32 %s4760_s28, %s4871_s14  ;;  %p321_p0 = scmp.ne.s32.totalorder %s4756_s27, %s4752_s26 }
   0xb   : > { %p309_p1 = scmp.eq.s32.totalorder %s308_s16, 0  ;;  %p322_p2 = scmp.eq.s32.totalorder %s4867_s29, 1 }
   0xc   : > { %p327_p3 = scmp.ne.s32.totalorder %s4752_s26, %s4748_s25  ;;  %p328_p4 = scmp.eq.s32.totalorder %s3967_s30, 1 }
   0xd   : > { %s4882_s17 = scalar_select %p309_p1, %s4756_s27, %s311_s15  }
   0xe   : > { %p4884_p5 = por %p322_p2, %p321_p0  ;;  %p4888_p6 = por %p328_p4, %p327_p3 }
   0xf   : > { %p3970_p7 = scmp.ge.s32.totalorder %s4760_s28, 1  ;;  %p389_p8 = scmp.lt.s32.totalorder %s4760_s28, 3 }
  0x11   : > { %p390_p9 = pnand %p3970_p7, %p389_p8 }
  0x12   : > { %s5874_s1 = sld [smem:[#allocation6_spill]] (!%p390_p9)  ;;  %v4762_v1 = vmov (!%p390_p9), 0.0   ;;  %vm4763_vm0 = vmmov (!%p390_p9), 0   ;;  %p432_p10 = scmp.lt.s32.totalorder (!%p390_p9), %s4867_s29, 1  ;;  %vm462_vm1 = vcmask (!%p390_p9), 261120   ;;  %vm594_vm2 = vcmask (!%p390_p9), 1043456  }
  0x13   : > { %393 = sbr.rel (%p390_p9) target bundleno = 3633 (0xe31), region = 72  ;;  %4366 = vmatprep.subr.bf16.mxu0 (!%p390_p9), %v4762_v1  ;;  %4374 = vmatprep.subr.bf16.mxu1 (!%p390_p9), %v4762_v1  ;;  %s5875_s0 = sld [smem:[#allocation5_spill]] (!%p390_p9)  ;;  %vm590_vm3 = vcmask (!%p390_p9), 64512   ;;  %vm1361_vm4 = vcmask (!%p390_p9), 130048   ;;  %vm1363_vm5 = vcmask (!%p390_p9), 195584  }
  0x14   : > { %4370 = vmatprep.mubr.msk.bf16.mxu0 (!%p390_p9), %vm4763_vm0, %v4762_v1  ;;  %4376 = vmatprep.mubr.msk.bf16.mxu1 (!%p390_p9), %vm4763_vm0, %v4762_v1  ;;  %s5876_s2 = sld [smem:[#allocation7_spill]] (!%p390_p9)  ;;  %s4764_s23 = smov (!%p390_p9), 104  }
  0x15   : > { %s4767_s15 = smov (!%p390_p9), 112   ;;  %s4768_s16 = smov (!%p390_p9), 64  }
  0x16   : > { %s5877_s3 = sld [smem:[#allocation8_spill]] (!%p390_p9)  ;;  %s429_s21 = sand.u32 (!%p390_p9), 1, %s4752_s26  }
  0x17   : > { %s3971_s22 = sshll.u32 (!%p390_p9), %s429_s21, 2 }
  0x18   : > { %v4482_v0 = vld [vmem:[%s5874_s1] sm:$0xff] (!%p390_p9)   ;;  %v4483_v2 = vld [vmem:[%s5874_s1 + $0x8] sm:$0xff] (!%p390_p9)  }
  0x19   : > { %4367 = vmatpush3.bf16.msra.mxu0 (!%p390_p9), %v4482_v0 }
  0x1a   : > { %4368 = vmatprep.subr.bf16.mxu0 %v4762_v1  ;;  %s433_s24 = scalar_select %p432_p10, %s4867_s29, 1  ;;  %v3973_v5 = vld [vmem:[%s5876_s2] ss:$0 sm:$0xff] }
  0x1c   : > { %s3972_s30 = sshll.u32 %s433_s24, 3  ;;  %s4765_s24 = smov 120  }
  0x1d   : > { %4369 = vmatpush3.bf16.msra.mxu0 %v4483_v2  ;;  %s435_s20 = scalar_lea.vmem %s5875_s0, %s3972_s30  ;;  %s4766_s30 = smov 96  }
  0x1e   : > { %4386 = vmatprep.subr.bf16.mxu0 %v4762_v1  ;;  %v4913_v3 = vld [vmem:[%s435_s20] sm:$0xff]  ;;  %s3895_s0 = scalar_lea.sflag [#allocation3], %s429_s21 }
  0x1f   : > { %v438_v4 = vpack.c.bf16 %v4913_v3, %v4913_v3 }
  0x21   : > { %4371 = vmatmul.mubr.msk.bf16.vlgmr.msra.gmra.mrb[0].mxu0 %vm462_vm1, %v438_v4 }
  0x22   : > { %4388 = vmatprep.mubr.msk.bf16.mxu0 %vm4763_vm0, %v4762_v1 }
  0xf4   : > { %v500_v6 = vpop.f32.mrb[0].mxu0 }
  0xf5   : > { %v501_v7 = vadd.f32 %v3973_v5, %v500_v6  ;;  %v4372_v8 = vpop.f32.mrb[1].mxu0 }
  0xf6   : > { %v503_v9 = vpop.f32.mrb[2].mxu0 }
  0xf7   : > { %v4923_v10 = vpack.c.bf16 %v501_v7, %v501_v7  ;;  %v4373_v11 = vpop.f32.mrb[3].mxu0 }
  0xf9   : > { %512 = vrot.lane.b32.xlu1 %v4923_v10, %s4764_s23  ;;  %508 = vrot.lane.b32.xlu0 %v4923_v10, %s4765_s24  ;;  %s4771_s24 = smov 16  }
  0xfd   : > { %514 = vrot.lane.b32.xlu1 %v4923_v10, %s4766_s30  ;;  %510 = vrot.lane.b32.xlu0 %v4923_v10, %s4767_s15  ;;  %s4773_s15 = smov 24  }
 0x16b   : > { %v4929_v12 = vpop.permute.xlu0 %508  ;;  %v4932_v13 = vpop.permute.xlu1 %512 }
 0x16c   : > { %516 = vrot.lane.b32.xlu0 %v4929_v12, %s4766_s30 }
 0x16f   : > { %v4934_v14 = vpop.permute.xlu0 %510  ;;  %v515_v15 = vpop.permute.xlu1 %514 }
 0x170   : > { %520 = vrot.lane.b32.xlu0 %v4932_v13, %s4766_s30  ;;  %518 = vrot.lane.b32.xlu1 %v4934_v14, %s4766_s30  ;;  %s4772_s30 = smov 8  }
 0x193   : > { %526 = vxpose.xlu1.c.b16.start.end [1/1] (short) (narrow) %v515_v15, 16 }
 0x1de   : > { %v517_v16 = vpop.permute.xlu0 %516 }
 0x1df   : > { %542 = vxpose.xlu0.c.b16.start.end [1/1] (short) (narrow) %v517_v16, 16 }
 0x1e2   : > { %v519_v17 = vpop.permute.xlu1 %518  ;;  %v521_v18 = vpop.permute.xlu0 %520 }
 0x1e3   : > { %558 = vxpose.xlu0.c.b16.start.end [1/1] (short) (narrow) %v519_v17, 16  ;;  %574 = vxpose.xlu1.c.b16.start.end [1/1] (short) (narrow) %v521_v18, 16 }
 0x1f9   : > { %v534_v19 = vpop.trf.xlu1 }
 0x1fa   : > { %v596_v20 = vsel %vm594_vm2, %v534_v19, 0 }
 0x1fb   : > { %4375 = vmatpush3.bf16.msra.mxu1 %v596_v20 }
 0x1fc   : > { %4380 = vmatprep.subr.bf16.mxu1 %v4762_v1 }
 0x1fe   : > { %4377 = vmatmul.mubr.msk.bf16.vlgmr.msra.gmra.mrb[0].mxu1 %vm590_vm3, %v4923_v10 }
 0x1ff   : > { %4382 = vmatprep.mubr.msk.bf16.mxu1 %vm4763_vm0, %v4762_v1 }
 0x245   : > { %v550_v21 = vpop.trf.xlu0 }
 0x246   : > { %v642_v22 = vsel %vm594_vm2, %v550_v21, 0 }
 0x247   : > { %4381 = vmatpush3.bf16.msra.mxu1 %v642_v22 }
 0x248   : > { %4392 = vmatprep.subr.bf16.mxu1 %v4762_v1 }
 0x249   : > { %v566_v23 = vpop.trf.xlu0  ;;  %v582_v24 = vpop.trf.xlu1 }
 0x24a   : > { %v688_v25 = vsel %vm594_vm2, %v566_v23, 0  ;;  %4383 = vmatmul.mubr.msk.bf16.vlgmr.msra.gmra.mrb[4].mxu1 %vm590_vm3, %v4929_v12  ;;  %v734_v26 = vsel %vm594_vm2, %v582_v24, 0 }
 0x24b   : > { %4387 = vmatpush3.bf16.msra.mxu0 %v688_v25  ;;  %4393 = vmatpush3.bf16.msra.mxu1 %v734_v26 }
 0x24c   : > { %4394 = vmatprep.mubr.msk.bf16.mxu1 %vm4763_vm0, %v4762_v1  ;;  %4398 = vmatprep.subr.bf16.mxu0 %v4762_v1 }
 0x24d   : > { %4404 = vmatprep.subr.bf16.mxu1 %v4762_v1 }
 0x24e   : > { %4389 = vmatmul.mubr.msk.bf16.vlgmr.msra.gmra.mrb[4].mxu0 %vm590_vm3, %v4934_v14 }
 0x24f   : > { %4400 = vmatprep.mubr.msk.bf16.mxu0 %vm4763_vm0, %v4762_v1 }
 0x252   : > { %4395 = vmatmul.mubr.msk.bf16.vlgmr.msra.gmra.mrb[8].mxu1 %vm590_vm3, %v4932_v13 }
 0x253   : > { %4406 = vmatprep.mubr.msk.bf16.mxu1 %vm4763_vm0, %v4762_v1 }
 0x2d1   : > { %v632_v27 = vpop.f32.mrb[0].mxu1 }
 0x2d2   : > { %v4378_v28 = vpop.f32.mrb[1].mxu1  ;;  %v776_v29 = vsel %vm590_vm3, %v632_v27, -inf }
 0x2d3   : > { %v635_v30 = vpop.f32.mrb[2].mxu1  ;;  %777 = vmax.xlane.f32.xlu0 %v776_v29 }
 0x2d4   : > { %v4379_v31 = vpop.f32.mrb[3].mxu1 }
 0x31d   : > { %v678_v32 = vpop.f32.mrb[4].mxu1 }
 0x31e   : > { %v4384_v33 = vpop.f32.mrb[5].mxu1  ;;  %v779_v34 = vsel %vm590_vm3, %v678_v32, -inf }
 0x31f   : > { %780 = vmax.xlane.f32.xlu1 %v779_v34  ;;  %v681_v35 = vpop.f32.mrb[6].mxu1 }
 0x320   : > { %v4385_v36 = vpop.f32.mrb[7].mxu1 }
 0x321   : > { %v724_v37 = vpop.f32.mrb[4].mxu0 }
 0x322   : > { %v4390_v38 = vpop.f32.mrb[5].mxu0  ;;  %v782_v39 = vsel %vm590_vm3, %v724_v37, -inf }
 0x323   : > { %783 = vmax.xlane.f32.xlu0 %v782_v39  ;;  %v727_v40 = vpop.f32.mrb[6].mxu0 }
 0x324   : > { %v4391_v41 = vpop.f32.mrb[7].mxu0 }
 0x325   : > { %v770_v42 = vpop.f32.mrb[8].mxu1 }
 0x326   : > { %v4396_v43 = vpop.f32.mrb[9].mxu1  ;;  %v785_v44 = vsel %vm590_vm3, %v770_v42, -inf }
 0x327   : > { %786 = vmax.xlane.f32.xlu1 %v785_v44  ;;  %v773_v45 = vpop.f32.mrb[10].mxu1 }
 0x328   : > { %v4397_v46 = vpop.f32.mrb[11].mxu1 }
 0x338   : > { %826 = vrot.lane.b32.xlu1 %v4929_v12, %s4768_s16 }
 0x339   : > { %824 = vrot.lane.b32.xlu0 %v4923_v10, %s4768_s16 }
 0x360   : > { %v778_v47 = vpop.xlane.xlu0 %777 }
 0x361   : > { %v788_v48 = vsub.f32 %v632_v27, %v778_v47 }
 0x363   : > { %v792_v49 = vmul.f32 1.442695, %v788_v48 }
 0x365   : > { %4614 = vpow2.f32 %v792_v49 }
 0x36f   : > { %v4615_v50 = vpop.eup %4614 }
 0x370   : > { %v800_v51 = vsel %vm590_vm3, %v4615_v50, 0.0 }
 0x371   : > { %801 = vadd.xlane.f32.xlu1 %v800_v51 }
 0x382   : > { %830 = vrot.lane.b32.xlu1 %v4932_v13, %s4768_s16 }
 0x3ac   : > { %v781_v52 = vpop.xlane.xlu1 %780 }
 0x3ad   : > { %v789_v53 = vsub.f32 %v678_v32, %v781_v52  ;;  %v1217_v52 = vlaneseq }
 0x3af   : > { %v794_v54 = vmul.f32 1.442695, %v789_v53  ;;  %v4770_v53 = vmov 1934713408  }
 0x3b0   : > { %v784_v55 = vpop.xlane.xlu0 %783 }
 0x3b1   : > { %4616 = vpow2.f32 %v794_v54  ;;  %v790_v56 = vsub.f32 %v724_v37, %v784_v55  ;;  %v1247_v54 = vunpack.c.l.s4 %v4770_v53 }
 0x3b3   : > { %v796_v57 = vmul.f32 1.442695, %v790_v56  ;;  %v4991_v56 = vshrl.u32 %v1217_v52, 7 }
 0x3b4   : > { %v787_v62 = vpop.xlane.xlu1 %786  ;;  %v825_v12 = vpop.permute.xlu0 %824 }
 0x3b5   : > { %4618 = vpow2.f32 %v796_v57  ;;  %v791_v63 = vsub.f32 %v770_v42, %v787_v62 }
 0x3b7   : > { %v798_v0 = vmul.f32 1.442695, %v791_v63 }
 0x3b8   : > { %v827_v2 = vpop.permute.xlu1 %826 }
 0x3b9   : > { %4620 = vpow2.f32 %v798_v0 }
 0x3bb   : > { %v4617_v58 = vpop.eup %4616 }
 0x3bc   : > { %v803_v59 = vsel %vm590_vm3, %v4617_v58, 0.0 }
 0x3bd   : > { %804 = vadd.xlane.f32.xlu0 %v803_v59  ;;  %v1248_v59 = vunpack.c.0.s8 %v1247_v54 }
 0x3bf   : > { %v4619_v60 = vpop.eup %4618 }
 0x3c0   : > { %v806_v61 = vsel %vm590_vm3, %v4619_v60, 0.0 }
 0x3c1   : > { %807 = vadd.xlane.f32.xlu1 %v806_v61 }
 0x3c3   : > { %v4621_v4 = vpop.eup %4620 }
 0x3c4   : > { %v809_v5 = vsel %vm590_vm3, %v4621_v4, 0.0 }
 0x3d3   : > { %828 = vrot.lane.b32.xlu0 %v4934_v14, %s4768_s16 }
 0x3ee   : > { %852 = vxpose.xlu1.c.b16.start.end [1/1] (short) (narrow) %v827_v2, 16 }
 0x3f2   : > { %810 = vadd.xlane.f32.xlu0 %v809_v5 }
 0x3fe   : > { %v802_v6 = vpop.xlane.xlu1 %801 }
 0x3ff   : > { %4622 = vrcp.f32 %v802_v6 }
 0x402   : > { %v831_v7 = vpop.permute.xlu1 %830 }
 0x403   : > { %884 = vxpose.xlu1.c.b16.start.end [1/1] (short) (narrow) %v831_v7, 16 }
 0x409   : > { %v4623_v8 = vpop.eup %4622 }
 0x40a   : > { %v816_v9 = vmul.f32 %v4623_v8, %v4615_v50  ;;  %v4769_v50 = vmov 1983009808  }
 0x40b   : > { %v1215_v51 = vunpack.c.l.s4 %v4769_v50 }
 0x40c   : > { %v820_v10 = vpack.c.bf16 %v816_v9, %v816_v9 }
 0x40d   : > { %v1216_v55 = vunpack.c.0.s8 %v1215_v51 }
 0x40e   : > { %v904_v11 = vsel %vm590_vm3, %v820_v10, 0 }
 0x40f   : > { %4399 = vmatpush3.bf16.xpose.msra.mxu0 %v904_v11 }
 0x410   : > { %4410 = vmatprep.subr.bf16.mxu0 %v4762_v1 }
 0x41f   : > { %836 = vxpose.xlu0.c.b16.start.end [1/1] (short) (narrow) %v825_v12, 16 }
 0x44a   : > { %v805_v13 = vpop.xlane.xlu0 %804 }
 0x44b   : > { %4624 = vrcp.f32 %v805_v13  ;;  %v4484_v13 = vld [vmem:[%s5877_s3] sm:$0xff]  }
 0x44e   : > { %v829_v14 = vpop.permute.xlu0 %828  ;;  %v808_v19 = vpop.xlane.xlu1 %807 }
 0x44f   : > { %868 = vxpose.xlu0.c.b16.start.end [1/1] (short) (narrow) %v829_v14, 16  ;;  %4626 = vrcp.f32 %v808_v19 }
 0x454   : > { %v860_v20 = vpop.trf.xlu1 }
 0x455   : > { %v4625_v15 = vpop.eup %4624 }
 0x456   : > { %v817_v16 = vmul.f32 %v4625_v15, %v4617_v58 }
 0x458   : > { %v821_v17 = vpack.c.bf16 %v817_v16, %v817_v16 }
 0x459   : > { %v4627_v21 = vpop.eup %4626 }
 0x45a   : > { %v950_v18 = vsel %vm590_vm3, %v821_v17, 0  ;;  %v818_v22 = vmul.f32 %v4627_v21, %v4619_v60  ;;  %v1219_v60 = vsub.s32 %v1216_v55, %v4991_v56 }
 0x45b   : > { %4405 = vmatpush3.bf16.xpose.msra.mxu1 %v950_v18 }
 0x45c   : > { %4416 = vmatprep.subr.bf16.mxu1 %v4762_v1  ;;  %v822_v24 = vpack.c.bf16 %v818_v22, %v818_v22  ;;  %v4485_v22 = vld [vmem:[%s5877_s3 + $0x8] sm:$0xff]  }
 0x45e   : > { %v996_v26 = vsel %vm590_vm3, %v822_v24, 0 }
 0x462   : > { %4407 = vmatmul.mubr.msk.bf16.vlgmr.msra.gmra.mrb[12].mxu1 %vm590_vm3, %v860_v20 }
 0x463   : > { %4418 = vmatprep.mubr.msk.bf16.mxu1 %vm4763_vm0, %v4762_v1 }
 0x469   : > { %v892_v31 = vpop.trf.xlu1 }
 0x47f   : > { %v811_v23 = vpop.xlane.xlu0 %810 }
 0x480   : > { %4628 = vrcp.f32 %v811_v23 }
 0x485   : > { %v844_v25 = vpop.trf.xlu0 }
 0x486   : > { %4401 = vmatmul.mubr.msk.bf16.vlgmr.msra.gmra.mrb[8].mxu0 %vm590_vm3, %v844_v25 }
 0x487   : > { %4411 = vmatpush3.bf16.xpose.msra.mxu0 %v996_v26  ;;  %4412 = vmatprep.mubr.msk.bf16.mxu0 %vm4763_vm0, %v4762_v1 }
 0x488   : > { %4422 = vmatprep.subr.bf16.mxu0 %v4762_v1 }
 0x48a   : > { %v4629_v27 = vpop.eup %4628 }
 0x48b   : > { %v819_v28 = vmul.f32 %v4629_v27, %v4621_v4  ;;  %v1251_v4 = vsub.s32 %v1248_v59, %v4991_v56  ;;  %v1464_v59 = vld [vmem:[%s5861_s7] sm:$0xff] }
 0x48d   : > { %v823_v29 = vpack.c.bf16 %v819_v28, %v819_v28 }
 0x48f   : > { %v1042_v30 = vsel %vm590_vm3, %v823_v29, 0 }
 0x490   : > { %4417 = vmatpush3.bf16.xpose.msra.mxu1 %v1042_v30 }
 0x497   : > { %4419 = vmatmul.mubr.msk.bf16.vlgmr.msra.gmra.mrb[16].mxu1 %vm590_vm3, %v892_v31 }
 0x4b5   : > { %v876_v32 = vpop.trf.xlu0 }
 0x4b6   : > { %4413 = vmatmul.mubr.msk.bf16.vlgmr.msra.gmra.mrb[12].mxu0 %vm590_vm3, %v876_v32 }
 0x4b7   : > { %4426 = vmatprep.mubr.msk.bf16.mxu0 %vm4763_vm0, %v4762_v1  ;;  %4423 = vmatpush3.bf16.msra.mxu0 %v4484_v13  ;;  %v1793_v13 = vld [vmem:[%s5861_s7 + $0x50] sm:$0xff] }
 0x4b8   : > { %4424 = vmatprep.subr.bf16.mxu0 %v4762_v1 }
 0x4bb   : > { %4425 = vmatpush3.bf16.msra.mxu0 %v4485_v22 }
 0x535   : > { %v986_v33 = vpop.f32.mrb[12].mxu1 }
 0x536   : > { %v4408_v34 = vpop.f32.mrb[13].mxu1  ;;  %1116 = vxpose.xlu1.b32.start.end [1/1] (short) (narrow) %v986_v33, 8 }
 0x537   : > { %v989_v35 = vpop.f32.mrb[14].mxu1 }
 0x538   : > { %v4409_v36 = vpop.f32.mrb[15].mxu1 }
 0x559   : > { %v940_v37 = vpop.f32.mrb[8].mxu0 }
 0x55a   : > { %v4402_v38 = vpop.f32.mrb[9].mxu0  ;;  %1084 = vxpose.xlu0.b32.start.end [1/1] (short) (narrow) %v940_v37, 8 }
 0x55b   : > { %v943_v39 = vpop.f32.mrb[10].mxu0 }
 0x55c   : > { %v4403_v40 = vpop.f32.mrb[11].mxu0 }
 0x56a   : > { %v1078_v41 = vpop.f32.mrb[16].mxu1 }
 0x56b   : > { %v4420_v42 = vpop.f32.mrb[17].mxu1 }
 0x56c   : > { %v1081_v43 = vpop.f32.mrb[18].mxu1 }
 0x56d   : > { %v4421_v44 = vpop.f32.mrb[19].mxu1 }
 0x589   : > { %v1032_v45 = vpop.f32.mrb[12].mxu0 }
 0x58a   : > { %1148 = vxpose.xlu0.b32.start.end [1/1] (short) (narrow) %v1032_v45, 8  ;;  %v4414_v46 = vpop.f32.mrb[13].mxu0  ;;  %v3987_v45 = vld [vmem:[%s5858_s4] ss:$0 sm:$0xff] }
 0x58b   : > { %v1035_v47 = vpop.f32.mrb[14].mxu0 }
 0x58c   : > { %v4415_v48 = vpop.f32.mrb[15].mxu0 }
 0x58e   : > { %1180 = vxpose.xlu0.b32.start.end [1/1] (short) (narrow) %v1078_v41, 8 }
 0x5b6   : > { %v1132_v58 = vpop.trf.xlu1 }
 0x5da   : > { %v1100_v49 = vpop.trf.xlu0 }
 0x60a   : > { %v1164_v57 = vpop.trf.xlu0 }
 0x60b   : > { %v1212_v61 = vcombine.low %v1100_v49, %v1164_v57  ;;  %v1213_v62 = vcombine.high %v1100_v49, %v1164_v57 }
 0x60d   : > { %v1220_v5 = vrot.slane %v1212_v61, %v1219_v60  ;;  %v1227_v6 = vrot.slane %v1213_v62, %v1219_v60  ;;  %v1467_v62 = vld [vmem:[%s5861_s7 + $0x48] sm:$0xff] }
 0x60e   : > { %v1196_v63 = vpop.trf.xlu0 }
 0x60f   : > { %v1228_v0 = vcombine.low %v1132_v58, %v1196_v63  ;;  %v1229_v2 = vcombine.high %v1132_v58, %v1196_v63 }
 0x611   : > { %v1236_v7 = vrot.slane %v1228_v0, %v1219_v60  ;;  %v1243_v8 = vrot.slane %v1229_v2, %v1219_v60 }
 0x613   : > { %v1244_v9 = vcombine.low %v1220_v5, %v1236_v7  ;;  %v1245_v10 = vcombine.high %v1220_v5, %v1236_v7  ;;  %v1260_v11 = vcombine.low %v1227_v6, %v1243_v8  ;;  %v1261_v12 = vcombine.high %v1227_v6, %v1243_v8  ;;  %v1470_v5 = vld [vmem:[%s5861_s7 + $0xc0] sm:$0xff]  ;;  %v1469_v6 = vld [vmem:[%s5861_s7 + $0x88] sm:$0xff] }
 0x614   : > { %v1471_v8 = vld [vmem:[%s5861_s7 + $0xc8] sm:$0xff] }
 0x615   : > { %v1252_v14 = vrot.slane %v1244_v9, %v1251_v4  ;;  %v1259_v15 = vrot.slane %v1245_v10, %v1251_v4  ;;  %v1268_v16 = vrot.slane %v1260_v11, %v1251_v4  ;;  %v1275_v17 = vrot.slane %v1261_v12, %v1251_v4  ;;  %v1791_v12 = vld [vmem:[%s5861_s7 + $0x10] sm:$0xff] }
 0x616   : > { %v3999_v10 = vcombine.low %v1469_v6, %v1471_v8  ;;  %v4000_v11 = vcombine.high %v1469_v6, %v1471_v8  ;;  %v4516_v6 = vld [vmem:[%s5863_s9 + $0x138] sm:$0xff]   ;;  %v4518_v8 = vld [vmem:[%s5863_s9 + $0x40] sm:$0xff]  }
 0x617   : > { %v1280_v18 = vcombine.low %v1252_v14, %v1259_v15  ;;  %v3985_v19 = vcombine.high %v1252_v14, %v1259_v15  ;;  %v1296_v20 = vcombine.low %v1268_v16, %v1275_v17  ;;  %v3986_v21 = vcombine.high %v1268_v16, %v1275_v17  ;;  %v1792_v14 = vld [vmem:[%s5861_s7 + $0x18] sm:$0xff] }
 0x618   : > { %v4774_v15 = vmov 0   ;;  %v4004_v16 = vcombine.high %v1791_v12, %v1793_v13  ;;  %v1794_v17 = vld [vmem:[%s5861_s7 + $0x58] sm:$0xff] }
 0x619   : > { %v1287_v23 = vrot.slane %v1280_v18, %v1219_v60  ;;  %v1295_v24 = vrot.slane %v3985_v19, %v1219_v60  ;;  %v1303_v25 = vrot.slane %v1296_v20, %v1219_v60  ;;  %v1311_v26 = vrot.slane %v3986_v21, %v1219_v60  ;;  %v1466_v60 = vld [vmem:[%s5861_s7 + $0x40] sm:$0xff]  ;;  %1569 = vmatprep.mubr.bf16.mxu1 %v4774_v15 }
 0x61a   : > { %v3994_v61 = vcombine.high %v1464_v59, %v1466_v60  ;;  %v3993_v63 = vcombine.low %v1464_v59, %v1466_v60  ;;  %v4003_v18 = vcombine.low %v1791_v12, %v1793_v13  ;;  %v4005_v19 = vcombine.low %v1792_v14, %v1794_v17  ;;  %v4506_v59 = vld [vmem:[%s5863_s9 + $0x168] sm:$0xff]  }
 0x61b   : > { %v1313_v27 = vcombine.high %v1287_v23, %v1295_v24  ;;  %v1329_v28 = vcombine.high %v1303_v25, %v1311_v26  ;;  %v1312_v29 = vcombine.low %v1287_v23, %v1295_v24  ;;  %v1328_v30 = vcombine.low %v1303_v25, %v1311_v26  ;;  %v3991_v25 = vld [vmem:[%s5859_s5] ss:$0 sm:$0xff]  ;;  %v4507_v60 = vld [vmem:[%s5863_s9 + $0x1e8] sm:$0xff]  }
 0x61c   : > { %1537 = vmatprep.subr.bf16.mxu1 %v3994_v61  ;;  %v4006_v20 = vcombine.high %v1792_v14, %v1794_v17  ;;  %v4509_v61 = vld [vmem:[%s5863_s9 + $0x1a8] sm:$0xff]   ;;  %v5191_v12 = vsub.s32 1, %v4991_v56  ;;  %v5194_v13 = vsub.s32 3, %v4991_v56  ;;  %v5197_v14 = vsub.s32 2, %v4991_v56 }
 0x61d   : > { %v1327_v31 = vrot.slane %v1313_v27, %v1251_v4  ;;  %v1343_v32 = vrot.slane %v1329_v28, %v1251_v4  ;;  %v1320_v1 = vrot.slane %v1312_v29, %v1251_v4  ;;  %v1336_v33 = vrot.slane %v1328_v30, %v1251_v4  ;;  %1538 = vmatpush1.bf16.msra.mxu1 %v3993_v63  ;;  %v1468_v4 = vld [vmem:[%s5861_s7 + $0x80] sm:$0xff]  ;;  %v1795_v29 = vld [vmem:[%s5861_s7 + $0x90] sm:$0xff] }
 0x61e   : > { %v3998_v7 = vcombine.high %v1468_v4, %v1470_v5  ;;  %v3997_v9 = vcombine.low %v1468_v4, %v1470_v5  ;;  %v3992_v27 = vld [vmem:[%s5860_s6] ss:$0 sm:$0xff]  ;;  %v1797_v30 = vld [vmem:[%s5861_s7 + $0xd0] sm:$0xff]  ;;  %v4514_v4 = vld [vmem:[%s5863_s9 + $0x178] sm:$0xff]  }
 0x61f   : > { %v1346_v34 = vcombine.low %v1327_v31, %v1343_v32  ;;  %v1345_v35 = vcombine.high %v1320_v1, %v1336_v33  ;;  %v1344_v36 = vcombine.low %v1320_v1, %v1336_v33  ;;  %v1347_v37 = vcombine.high %v1327_v31, %v1343_v32  ;;  %v1796_v31 = vld [vmem:[%s5861_s7 + $0x98] sm:$0xff]  ;;  %v4511_v63 = vld [vmem:[%s5863_s9 + $0x1f0] sm:$0xff]  }
 0x620   : > { %1539 = vmatprep.subr.bf16.mxu1 %v3998_v7  ;;  %v1798_v32 = vld [vmem:[%s5861_s7 + $0xd8] sm:$0xff] }
 0x621   : > { %1353 = vrot.lane.b32.xlu0 %v1346_v34, %s4771_s24  ;;  %1349 = vrot.lane.b32.xlu1 %v1345_v35, %s4772_s30  ;;  %v4008_v34 = vcombine.high %v1795_v29, %v1797_v30  ;;  %v4010_v35 = vcombine.high %v1796_v31, %v1798_v32  ;;  %v4515_v5 = vld [vmem:[%s5863_s9 + $0x1f8] sm:$0xff]   ;;  %s4165_s30 = sshll.u32 %s4867_s29, 6  ;;  %s4775_s29 = smov [#allocation2]  }
 0x622   : > { %1540 = vmatpush1.bf16.msra.mxu1 %v3997_v9  ;;  %v4517_v7 = vld [vmem:[%s5863_s9 + $0x1b8] sm:$0xff]   ;;  %v4519_v9 = vld [vmem:[%s5863_s9 + $0xc0] sm:$0xff]   ;;  %s5812_s3 = scalar_lea.hbm %s5867_s13, %s4165_s30 }
 0x623   : > { %1861 = vmatprep.subr.bf16.mxu1 %v4004_v16 }
 0x625   : > { %1357 = vrot.lane.b32.xlu1 %v1347_v37, %s4773_s15  ;;  %v4009_v37 = vcombine.low %v1796_v31, %v1798_v32  ;;  %s431_s15 = scalar_lea.vmem [#allocation2], %s3971_s22  ;;  %s4702_s22 = sshll.u32 %s4775_s29, 4  ;;  %s4703_s22 = int_to_ptr.vmem [resolvable:$false] %s4702_s22 }
 0x626   : > { %s3908_s16 = sshll.u32 %s431_s15, 4  ;;  %s4704_s23 = scalar_lea.vmem %s4703_s22, 128  ;;  %s5814_s16 = int_to_ptr.vmem [resolvable:$true] %s3908_s16 }
 0x627   : > { %s4698_s1 = scalar_lea.vmem %s5814_s16, 64  ;;  %p4705_p0 = scmp.lt.s32.totalorder %s5814_s16, %s4703_s22 }
 0x628   : > { %p4699_p11 = scmp.ne.s32.totalorder %s5814_s16, %s4698_s1  ;;  %p4706_p1 = scmp.lt.s32.totalorder %s4704_s23, %s4698_s1 }
 0x62a   : > { %p4700_p12 = pnand %p4699_p11, %p4884_p5  ;;  %p4707_p2 = por %p4706_p1, %p4705_p0 }
 0x62c   : > { %p4701_p13 = pneg %p4700_p12 }
 0x62e   : > { %p4708_p3 = pnand %p4707_p2, %p4701_p13 }
 0x693   : > { %v1350_v38 = vpop.permute.xlu1 %1349  ;;  %v1354_v39 = vpop.permute.xlu0 %1353 }
 0x694   : > { %v1360_v40 = vsel %vm590_vm3, %v1344_v36, %v1350_v38  ;;  %v4007_v36 = vcombine.low %v1795_v29, %v1797_v30  ;;  %v4486_v38 = vld [vmem:[%s5863_s9 + $0x140] sm:$0xff]  }
 0x695   : > { %v1362_v42 = vsel %vm1361_vm4, %v1360_v40, %v1354_v39  ;;  %v4487_v39 = vld [vmem:[%s5863_s9 + $0x1c0] sm:$0xff]  }
 0x696   : > { %v4488_v40 = vld [vmem:[%s5863_s9 + $0x100] sm:$0xff]  }
 0x697   : > { %v1358_v41 = vpop.permute.xlu1 %1357  ;;  %v1799_v29 = vld [vmem:[%s5862_s8 + $0x4] sm:$0xf] }
 0x698   : > { %v1364_v43 = vsel %vm1363_vm5, %v1362_v42, %v1358_v41  ;;  %v4489_v41 = vld [vmem:[%s5863_s9 + $0x180] sm:$0xff]   ;;  %v4490_v42 = vld [vmem:[%s5863_s9 + $0x148] sm:$0xff]  }
 0x699   : > { %v1365_v44 = vpack.c.bf16 %v1364_v43, %v1364_v43  ;;  %v4491_v43 = vld [vmem:[%s5863_s9 + $0x1c8] sm:$0xff]  }
 0x69b   : > { %4427 = vmatmul.mubr.msk.bf16.vlgmr.msra.gmra.mrb[16].mxu0 %vm462_vm1, %v1365_v44  ;;  %v4492_v44 = vld [vmem:[%s5863_s9 + $0x108] sm:$0xff]  }
 0x69c   : > { %1610 = vmatprep.mubr.bf16.mxu0 %v4774_v15 }
 0x76e   : > { %v1426_v46 = vpop.f32.mrb[16].mxu0 }
 0x76f   : > { %v1427_v47 = vadd.f32 %v3987_v45, %v1426_v46  ;;  %v4428_v48 = vpop.f32.mrb[17].mxu0  ;;  %v4493_v45 = vld [vmem:[%s5863_s9 + $0x188] sm:$0xff]   ;;  %v4494_v46 = vld [vmem:[%s5863_s9 + $0x150] sm:$0xff]  }
 0x770   : > { %v1429_v49 = vpop.f32.mrb[18].mxu0  ;;  %v4496_v48 = vld [vmem:[%s5863_s9 + $0x110] sm:$0xff]  }
 0x771   : > { %v4429_v50 = vpop.f32.mrb[19].mxu0  ;;  %v1432_v51 = vadd.f32 %v1427_v47, %v4913_v3  ;;  %v1465_v3 = vld [vmem:[%s5861_s7 + $0x8] sm:$0xff]  ;;  %v4495_v47 = vld [vmem:[%s5863_s9 + $0x1d0] sm:$0xff]  }
 0x772   : > { %v3995_v0 = vcombine.low %v1465_v3, %v1467_v62  ;;  %v3996_v2 = vcombine.high %v1465_v3, %v1467_v62  ;;  %v4497_v49 = vld [vmem:[%s5863_s9 + $0x190] sm:$0xff]   ;;  %v4498_v50 = vld [vmem:[%s5863_s9 + $0x158] sm:$0xff]   ;;  %v4508_v3 = vld [vmem:[%s5863_s9 + $0x128] sm:$0xff]  }
 0x773   : > { %v1435_v52 = vsel %vm462_vm1, %v1432_v51, 0.0  ;;  %v4510_v62 = vld [vmem:[%s5863_s9 + $0x170] sm:$0xff]  }
 0x774   : > { %1436 = vadd.xlane.f32.xlu1 %v1435_v52  ;;  %1578 = vmatprep.subr.bf16.mxu0 %v3996_v2  ;;  %v4500_v52 = vld [vmem:[%s5863_s9 + $0x118] sm:$0xff]   ;;  %v4513_v2 = vld [vmem:[%s5863_s9 + $0x1b0] sm:$0xff]  }
 0x775   : > { %1579 = vmatpush1.bf16.msra.mxu0 %v3995_v0  ;;  %v4512_v0 = vld [vmem:[%s5863_s9 + $0x130] sm:$0xff]  }
 0x776   : > { %1580 = vmatprep.subr.bf16.mxu0 %v4000_v11  ;;  %v1472_v11 = vld [vmem:[%s5862_s8] sm:$0xf] }
 0x777   : > { %v1481_v17 = vrot.slane %v1472_v11, %v5191_v12 }
 0x779   : > { %1581 = vmatpush1.bf16.msra.mxu0 %v3999_v10  ;;  %v5185_v10 = vsub.s32 0, %v4991_v56 }
 0x77a   : > { %1902 = vmatprep.subr.bf16.mxu0 %v4006_v20 }
 0x77b   : > { %v1477_v16 = vrot.slane %v1472_v11, %v5185_v10 }
 0x801   : > { %v1437_v53 = vpop.xlane.xlu1 %1436 }
 0x802   : > { %v1439_v54 = vmul.f32 0.03125, %v1437_v53  ;;  %v4501_v53 = vld [vmem:[%s5863_s9 + $0x198] sm:$0xff]  }
 0x804   : > { %v1440_v55 = vsub.f32 %v1432_v51, %v1439_v54  ;;  %v4499_v51 = vld [vmem:[%s5863_s9 + $0x1d8] sm:$0xff]   ;;  %v4502_v54 = vld [vmem:[%s5863_s9 + $0x160] sm:$0xff]  }
 0x806   : > { %v1441_v57 = vmul.f32 %v1440_v55, %v1440_v55 }
 0x808   : > { %v1442_v58 = vsel %vm462_vm1, %v1441_v57, 0.0  ;;  %v4504_v57 = vld [vmem:[%s5863_s9 + $0x120] sm:$0xff]  }
 0x809   : > { %1443 = vadd.xlane.f32.xlu0 %v1442_v58  ;;  %v4505_v58 = vld [vmem:[%s5863_s9 + $0x1a0] sm:$0xff]  }
 0x896   : > { %v1444_v21 = vpop.xlane.xlu0 %1443 }
 0x897   : > { %v1445_v22 = vmul.f32 0.03125, %v1444_v21 }
 0x899   : > { %v1446_v23 = vadd.f32 1e-05, %v1445_v22 }
 0x89b   : > { %4630 = vrsqrt.f32 %v1446_v23 }
 0x8a5   : > { %v4631_v24 = vpop.eup %4630 }
 0x8a6   : > { %v1448_v26 = vmul.f32 %v4631_v24, %v1440_v55  ;;  %v4503_v55 = vld [vmem:[%s5863_s9 + $0x1e0] sm:$0xff]  }
 0x8a8   : > { %v1455_v28 = vmul.f32 %v3991_v25, %v1448_v26 }
 0x8aa   : > { %v5066_v1 = vadd.f32 %v3992_v27, %v1455_v28 }
 0x8ac   : > { %v5070_v33 = vpack.c.bf16 %v5066_v1, %v5066_v1 }
 0x8ae   : > { %4001 = vmatmul.mubr.msk.bf16.vlgmr.msra.gmra.mrb[20].mxu1 %vm462_vm1, %v5070_v33  ;;  %4002 = vmatmul.mubr.msk.bf16.vlgmr.msra.gmra.mrb[20].mxu0 %vm462_vm1, %v5070_v33 }
 0x8af   : > { %1862 = vmatpush1.bf16.msra.mxu1 %v4003_v18  ;;  %1903 = vmatpush1.bf16.msra.mxu0 %v4005_v19  ;;  %v1489_v18 = vrot.slane %v1472_v11, %v5194_v13  ;;  %v1485_v19 = vrot.slane %v1472_v11, %v5197_v14 }
 0x8b0   : > { %1863 = vmatprep.subr.bf16.mxu1 %v4008_v34  ;;  %1904 = vmatprep.subr.bf16.mxu0 %v4010_v35 }
 0x8b1   : > { %1893 = vmatprep.mubr.bf16.mxu1 %v4774_v15  ;;  %1934 = vmatprep.mubr.bf16.mxu0 %v4774_v15 }
 0x8b3   : > { %1864 = vmatpush1.bf16.msra.mxu1 %v4007_v36  ;;  %1905 = vmatpush1.bf16.msra.mxu0 %v4009_v37  ;;  %v1804_v37 = vrot.slane %v1799_v29, %v5185_v10 }
 0x8b4   : > { %4190 = vmatprep.subr.bf16.mxu1 %v4486_v38  ;;  %4212 = vmatprep.subr.bf16.mxu0 %v4487_v39 }
 0x8b6   : > { %4011 = vmatmul.mubr.msk.bf16.vlgmr.msra.gmra.mrb[24].mxu1 %vm462_vm1, %v5070_v33  ;;  %4012 = vmatmul.mubr.msk.bf16.vlgmr.msra.gmra.mrb[24].mxu0 %vm462_vm1, %v5070_v33 }
 0x8b7   : > { %4191 = vmatpush3.bf16.msra.mxu1 %v4488_v40  ;;  %4213 = vmatpush3.bf16.msra.mxu0 %v4489_v41  ;;  %v1812_v40 = vrot.slane %v1799_v29, %v5197_v14 }
 0x8b8   : > { %4192 = vmatprep.subr.bf16.mxu1 %v4490_v42  ;;  %4214 = vmatprep.subr.bf16.mxu0 %v4491_v43 }
 0x8bb   : > { %4193 = vmatpush3.bf16.msra.mxu1 %v4492_v44  ;;  %4215 = vmatpush3.bf16.msra.mxu0 %v4493_v45  ;;  %v1808_v44 = vrot.slane %v1799_v29, %v5191_v12 }
 0x8bc   : > { %4194 = vmatprep.subr.bf16.mxu1 %v4494_v46  ;;  %4216 = vmatprep.subr.bf16.mxu0 %v4495_v47 }
 0x8bf   : > { %4195 = vmatpush3.bf16.msra.mxu1 %v4496_v48  ;;  %4217 = vmatpush3.bf16.msra.mxu0 %v4497_v49 }
 0x8c0   : > { %4196 = vmatprep.subr.bf16.mxu1 %v4498_v50  ;;  %4218 = vmatprep.subr.bf16.mxu0 %v4499_v51  ;;  %v1816_v51 = vrot.slane %v1799_v29, %v5194_v13 }
 0x8c3   : > { %4197 = vmatpush3.bf16.msra.mxu1 %v4500_v52  ;;  %4219 = vmatpush3.bf16.msra.mxu0 %v4501_v53 }
 0x8c4   : > { %4198 = vmatprep.subr.bf16.mxu1 %v4502_v54  ;;  %4220 = vmatprep.subr.bf16.mxu0 %v4503_v55 }
 0x8c7   : > { %4199 = vmatpush3.bf16.msra.mxu1 %v4504_v57  ;;  %4221 = vmatpush3.bf16.msra.mxu0 %v4505_v58 }
 0x8c8   : > { %4200 = vmatprep.subr.bf16.mxu1 %v4506_v59  ;;  %4222 = vmatprep.subr.bf16.mxu0 %v4507_v60 }
 0x8cb   : > { %4201 = vmatpush3.bf16.msra.mxu1 %v4508_v3  ;;  %4223 = vmatpush3.bf16.msra.mxu0 %v4509_v61 }
 0x8cc   : > { %4202 = vmatprep.subr.bf16.mxu1 %v4510_v62  ;;  %4224 = vmatprep.subr.bf16.mxu0 %v4511_v63 }
 0x8cf   : > { %4203 = vmatpush3.bf16.msra.mxu1 %v4512_v0  ;;  %4225 = vmatpush3.bf16.msra.mxu0 %v4513_v2 }
 0x8d0   : > { %4204 = vmatprep.subr.bf16.mxu1 %v4514_v4  ;;  %4226 = vmatprep.subr.bf16.mxu0 %v4515_v5 }
 0x8d3   : > { %4205 = vmatpush3.bf16.msra.mxu1 %v4516_v6  ;;  %4227 = vmatpush3.bf16.msra.mxu0 %v4517_v7 }
 0x8d4   : > { %4234 = vmatprep.subr.bf16.mxu1 %v4518_v8  ;;  %4256 = vmatprep.subr.bf16.mxu0 %v4519_v9 }
 0x981   : > { %v1571_v20 = vpop.f32.mrb[20].mxu1  ;;  %v1612_v21 = vpop.f32.mrb[20].mxu0 }
 0x982   : > { %v5203_v22 = vadd.f32 %v1571_v20, %v1477_v16  ;;  %v1573_v23 = vpop.f32.mrb[21].mxu1  ;;  %v1614_v24 = vpop.f32.mrb[21].mxu0  ;;  %v5209_v28 = vadd.f32 %v1612_v21, %v1485_v19 }
 0x983   : > { %v5205_v25 = vadd.f32 %v1573_v23, %v1481_v17  ;;  %v5207_v26 = vadd.f32 %v1614_v24, %v1489_v18  ;;  %v1575_v56 = vpop.f32.mrb[22].mxu1  ;;  %v1616_v27 = vpop.f32.mrb[22].mxu0 }
 0x984   : > { %v5215_v30 = vmul.f32 0.70710677, %v5203_v22  ;;  %v5226_v36 = vmul.f32 0.70710677, %v5209_v28  ;;  %v1576_v42 = vpop.f32.mrb[23].mxu1  ;;  %v1617_v43 = vpop.f32.mrb[23].mxu0 }
 0x985   : > { %v5218_v31 = vmul.f32 0.70710677, %v5205_v25  ;;  %v5221_v32 = vmul.f32 0.70710677, %v5207_v26 }
 0x986   : > { %v5230_v38 = vand.u32 2147483647, %v5215_v30  ;;  %v5235_v47 = vand.u32 2147483647, %v5226_v36  ;;  %vm1703_vm12 = vcmp.ge.f32.partialorder %v5215_v30, 0.0  ;;  %vm1705_vm13 = vcmp.ge.f32.partialorder %v5226_v36, 0.0 }
 0x987   : > { %v1628_v34 = vand.u32 2147483647, %v5218_v31  ;;  %v1630_v35 = vand.u32 2147483647, %v5221_v32  ;;  %vm1704_vm6 = vcmp.ge.f32.partialorder %v5218_v31, 0.0  ;;  %vm1706_vm7 = vcmp.ge.f32.partialorder %v5221_v32, 0.0 }
 0x988   : > { %v1631_v53 = vmul.f32 0.3275911, %v5230_v38  ;;  %v1633_v63 = vmul.f32 0.3275911, %v5235_v47  ;;  %v4543_v30 = vld [vmem:[%s5863_s9 + $0xf0] sm:$0xff]   ;;  %v2659_v36 = vld [vmem:[%s5861_s7 + $0x20] sm:$0xff] }
 0x989   : > { %v1632_v39 = vmul.f32 0.3275911, %v1628_v34  ;;  %v1634_v41 = vmul.f32 0.3275911, %v1630_v35  ;;  %v1895_v45 = vpop.f32.mrb[24].mxu1  ;;  %v1936_v46 = vpop.f32.mrb[24].mxu0 }
 0x98a   : > { %v5237_v49 = vadd.f32 %v1895_v45, %v1804_v37  ;;  %v1897_v50 = vpop.f32.mrb[25].mxu1  ;;  %v1938_v52 = vpop.f32.mrb[25].mxu0  ;;  %v5241_v54 = vadd.f32 %v1936_v46, %v1812_v40  ;;  %v1635_v4 = vadd.f32 1.0, %v1631_v53  ;;  %v1637_v17 = vadd.f32 1.0, %v1633_v63 }
 0x98b   : > { %v1636_v48 = vadd.f32 1.0, %v1632_v39  ;;  %v1899_v55 = vpop.f32.mrb[26].mxu1  ;;  %v1940_v57 = vpop.f32.mrb[26].mxu0  ;;  %v1638_v58 = vadd.f32 1.0, %v1634_v41  ;;  %v5246_v60 = vadd.f32 %v1897_v50, %v1808_v44  ;;  %v5253_v2 = vadd.f32 %v1938_v52, %v1816_v51 }
 0x98c   : > { %v5244_v59 = vmul.f32 0.70710677, %v5237_v49  ;;  %v1900_v3 = vpop.f32.mrb[27].mxu1  ;;  %v1941_v61 = vpop.f32.mrb[27].mxu0  ;;  %v5249_v62 = vmul.f32 0.70710677, %v5241_v54 }
 0x98d   : > { %4632 = vrcp.f32 %v1636_v48  ;;  %v5257_v6 = vmul.f32 0.70710677, %v5246_v60  ;;  %v5261_v16 = vmul.f32 0.70710677, %v5253_v2  ;;  %v1680_v20 = vsub.f32 0.0, %v1628_v34 }
 0x98e   : > { %v1951_v0 = vand.u32 2147483647, %v5244_v59  ;;  %v1953_v5 = vand.u32 2147483647, %v5249_v62  ;;  %4634 = vrcp.f32 %v1638_v58  ;;  %v1682_v24 = vsub.f32 0.0, %v1630_v35 }
 0x98f   : > { %v1952_v9 = vand.u32 2147483647, %v5257_v6  ;;  %4636 = vrcp.f32 %v1635_v4  ;;  %v1954_v21 = vand.u32 2147483647, %v5261_v16  ;;  %v1684_v29 = vmul.f32 %v1680_v20, %v1628_v34 }
 0x990   : > { %v1955_v7 = vmul.f32 0.3275911, %v1951_v0  ;;  %v1957_v8 = vmul.f32 0.3275911, %v1953_v5  ;;  %v2003_v39 = vsub.f32 0.0, %v1951_v0  ;;  %v1686_v42 = vmul.f32 %v1682_v24, %v1630_v35 }
 0x991   : > { %v1956_v19 = vmul.f32 0.3275911, %v1952_v9  ;;  %v1958_v56 = vmul.f32 0.3275911, %v1954_v21  ;;  %v2005_v43 = vsub.f32 0.0, %v1953_v5  ;;  %v2004_v46 = vsub.f32 0.0, %v1952_v9 }
 0x992   : > { %v1959_v11 = vadd.f32 1.0, %v1955_v7  ;;  %v1961_v18 = vadd.f32 1.0, %v1957_v8  ;;  %v1689_v45 = vmul.f32 1.442695, %v1684_v29  ;;  %v2007_v51 = vmul.f32 %v2003_v39, %v1951_v0 }
 0x993   : > { %v1960_v23 = vadd.f32 1.0, %v1956_v19  ;;  %v1962_v37 = vadd.f32 1.0, %v1958_v56  ;;  %v1693_v53 = vmul.f32 1.442695, %v1686_v42  ;;  %v2009_v58 = vmul.f32 %v2005_v43, %v1953_v5 }
 0x994   : > { %4638 = vrcp.f32 %v1959_v11  ;;  %v2008_v63 = vmul.f32 %v2004_v46, %v1952_v9  ;;  %v2011_v8 = vmul.f32 1.442695, %v2007_v51  ;;  %v2006_v11 = vsub.f32 0.0, %v1954_v21 }
 0x995   : > { %4640 = vrcp.f32 %v1961_v18  ;;  %v2015_v24 = vmul.f32 1.442695, %v2009_v58  ;;  %vm2027_vm8 = vcmp.ge.f32.partialorder %v5244_v59, 0.0  ;;  %vm2029_vm9 = vcmp.ge.f32.partialorder %v5249_v62, 0.0 }
 0x996   : > { %4642 = vrcp.f32 %v1637_v17  ;;  %v2013_v39 = vmul.f32 1.442695, %v2008_v63  ;;  %vm2028_vm10 = vcmp.ge.f32.partialorder %v5257_v6, 0.0  ;;  %v1943_v31 = vmul.f32 0.5, %v5237_v49 }
 0x997   : > { %v5264_v27 = vpop.eup %4632  ;;  %4644 = vrcp.f32 %v1960_v23  ;;  %v1944_v6 = vmul.f32 0.5, %v5246_v60  ;;  %vm2030_vm11 = vcmp.ge.f32.partialorder %v5261_v16, 0.0  ;;  %v1622_v49 = vmul.f32 0.5, %v5207_v26 }
 0x998   : > { %v1644_v40 = vmul.f32 1.0614054, %v5264_v27  ;;  %v5267_v41 = vpop.eup %4634  ;;  %4646 = vrcp.f32 %v1962_v37 }
 0x999   : > { %v1646_v48 = vmul.f32 1.0614054, %v5267_v41  ;;  %v5270_v50 = vpop.eup %4636  ;;  %4648 = vpow2.f32 %v1689_v45 }
 0x99a   : > { %v1648_v44 = vadd.f32 -1.4531521, %v1644_v40  ;;  %v1643_v19 = vmul.f32 1.0614054, %v5270_v50  ;;  %4650 = vpow2.f32 %v1693_v53 }
 0x99b   : > { %v1650_v55 = vadd.f32 -1.4531521, %v1646_v48  ;;  %4652 = vpow2.f32 %v2011_v8 }
 0x99c   : > { %v1652_v34 = vmul.f32 %v5264_v27, %v1648_v44  ;;  %v2010_v44 = vmul.f32 %v2006_v11, %v1954_v21  ;;  %4654 = vpow2.f32 %v2015_v24  ;;  %v1647_v58 = vadd.f32 -1.4531521, %v1643_v19 }
 0x99d   : > { %v1654_v4 = vmul.f32 %v5267_v41, %v1650_v55  ;;  %4656 = vpow2.f32 %v2013_v39 }
 0x99e   : > { %v5273_v52 = vpop.eup %4638  ;;  %v1656_v3 = vadd.f32 1.4214138, %v1652_v34  ;;  %v1651_v39 = vmul.f32 %v5270_v50, %v1647_v58 }
 0x99f   : > { %v5275_v57 = vpop.eup %4640  ;;  %v1967_v35 = vmul.f32 1.0614054, %v5273_v52  ;;  %v1658_v20 = vadd.f32 1.4214138, %v1654_v4  ;;  %v2017_v4 = vmul.f32 1.442695, %v2010_v44 }
 0x9a0   : > { %v1969_v61 = vmul.f32 1.0614054, %v5275_v57  ;;  %v5280_v7 = vpop.eup %4642  ;;  %v1660_v17 = vmul.f32 %v5264_v27, %v1656_v3 }
 0x9a1   : > { %v1971_v0 = vadd.f32 -1.4531521, %v1967_v35  ;;  %v5283_v18 = vpop.eup %4644  ;;  %v1645_v29 = vmul.f32 1.0614054, %v5280_v7  ;;  %v1662_v40 = vmul.f32 %v5267_v41, %v1658_v20  ;;  %4658 = vpow2.f32 %v2017_v4 }
 0x9a2   : > { %v1973_v5 = vadd.f32 -1.4531521, %v1969_v61  ;;  %v1968_v9 = vmul.f32 1.0614054, %v5283_v18  ;;  %v1664_v56 = vadd.f32 -0.28449672, %v1660_v17  ;;  %v5291_v42 = vpop.eup %4646 }
 0x9a3   : > { %v1975_v23 = vmul.f32 %v5273_v52, %v1971_v0  ;;  %v1970_v51 = vmul.f32 1.0614054, %v5291_v42  ;;  %v1666_v34 = vadd.f32 -0.28449672, %v1662_v40  ;;  %v4649_v11 = vpop.eup %4648 }
 0x9a4   : > { %v1977_v37 = vmul.f32 %v5275_v57, %v1973_v5  ;;  %v1972_v45 = vadd.f32 -1.4531521, %v1968_v9  ;;  %v1668_v46 = vmul.f32 %v5264_v27, %v1664_v56  ;;  %v4651_v9 = vpop.eup %4650 }
 0x9a5   : > { %v1979_v43 = vadd.f32 1.4214138, %v1975_v23  ;;  %v1974_v61 = vadd.f32 -1.4531521, %v1970_v51  ;;  %v1670_v21 = vmul.f32 %v5267_v41, %v1666_v34 }
 0x9a6   : > { %v1981_v48 = vadd.f32 1.4214138, %v1977_v37  ;;  %v1976_v55 = vmul.f32 %v5283_v18, %v1972_v45  ;;  %v1672_v35 = vadd.f32 0.2548296, %v1668_v46 }
 0x9a7   : > { %v1983_v53 = vmul.f32 %v5273_v52, %v1979_v43  ;;  %v1978_v5 = vmul.f32 %v5291_v42, %v1974_v61  ;;  %v1674_v20 = vadd.f32 0.2548296, %v1670_v21  ;;  %v1649_v43 = vadd.f32 -1.4531521, %v1645_v29 }
 0x9a8   : > { %v1985_v3 = vmul.f32 %v5275_v57, %v1981_v48  ;;  %v1980_v0 = vadd.f32 1.4214138, %v1976_v55  ;;  %v1676_v8 = vmul.f32 %v5264_v27, %v1672_v35  ;;  %v5308_v48 = vmul.f32 0.5, %v5205_v25  ;;  %v4653_v55 = vpop.eup %4652 }
 0x9a9   : > { %v1987_v63 = vadd.f32 -0.28449672, %v1983_v53  ;;  %v1982_v37 = vadd.f32 1.4214138, %v1978_v5  ;;  %v1678_v40 = vmul.f32 %v5267_v41, %v1674_v20  ;;  %v1679_v41 = vsub.f32 0.0, %v5230_v38  ;;  %v4655_v61 = vpop.eup %4654 }
 0x9aa   : > { %v1989_v17 = vadd.f32 -0.28449672, %v1985_v3  ;;  %v1984_v19 = vmul.f32 %v5283_v18, %v1980_v0  ;;  %v1696_v24 = vmul.f32 %v4649_v11, %v1676_v8  ;;  %v1653_v58 = vmul.f32 %v5280_v7, %v1649_v43  ;;  %v4657_v5 = vpop.eup %4656 }
 0x9ab   : > { %v1991_v23 = vmul.f32 %v5273_v52, %v1987_v63  ;;  %v1986_v46 = vmul.f32 %v5291_v42, %v1982_v37  ;;  %v1698_v3 = vmul.f32 %v4651_v9, %v1678_v40  ;;  %v1655_v63 = vadd.f32 1.4214138, %v1651_v39 }
 0x9ac   : > { %v1993_v56 = vmul.f32 %v5275_v57, %v1989_v17  ;;  %v1988_v27 = vadd.f32 -0.28449672, %v1984_v19  ;;  %v1700_v53 = vsub.f32 1.0, %v1696_v24  ;;  %v1683_v20 = vmul.f32 %v1679_v41, %v5230_v38 }
 0x9ad   : > { %v1995_v44 = vadd.f32 0.2548296, %v1991_v23  ;;  %v1990_v35 = vadd.f32 -0.28449672, %v1986_v46  ;;  %v1657_v24 = vadd.f32 1.4214138, %v1653_v58  ;;  %v1659_v37 = vmul.f32 %v5270_v50, %v1655_v63 }
 0x9ae   : > { %v1997_v45 = vadd.f32 0.2548296, %v1993_v56  ;;  %v1992_v34 = vmul.f32 %v5283_v18, %v1988_v27  ;;  %v1708_v17 = vsub.f32 0.0, %v1700_v53  ;;  %v1687_v46 = vmul.f32 1.442695, %v1683_v20 }
 0x9af   : > { %v1999_v51 = vmul.f32 %v5273_v52, %v1995_v44  ;;  %v1681_v52 = vsub.f32 0.0, %v5235_v47  ;;  %v1994_v0 = vmul.f32 %v5291_v42, %v1990_v35  ;;  %v4659_v44 = vpop.eup %4658  ;;  %v1663_v41 = vadd.f32 -0.28449672, %v1659_v37  ;;  %v4524_v37 = vld [vmem:[%s5863_s9 + $0x8] sm:$0xff]  }
 0x9b0   : > { %v2001_v29 = vmul.f32 %v5275_v57, %v1997_v45  ;;  %v1996_v25 = vadd.f32 0.2548296, %v1992_v34  ;;  %v1702_v57 = vsub.f32 1.0, %v1698_v3  ;;  %v1712_v45 = vsel %vm1704_vm6, %v1700_v53, %v1708_v17 }
 0x9b1   : > { %v2019_v21 = vmul.f32 %v4653_v55, %v1999_v51  ;;  %v1998_v19 = vadd.f32 0.2548296, %v1994_v0  ;;  %v1685_v27 = vmul.f32 %v1681_v52, %v5235_v47  ;;  %v1661_v51 = vmul.f32 %v5280_v7, %v1657_v24  ;;  %v4521_v24 = vld [vmem:[%s5863_s9 + $0x80] sm:$0xff]  }
 0x9b2   : > { %v2021_v4 = vmul.f32 %v4655_v61, %v2001_v29  ;;  %v2000_v11 = vmul.f32 %v5283_v18, %v1996_v25  ;;  %v1710_v18 = vsub.f32 0.0, %v1702_v57  ;;  %v1716_v35 = vadd.f32 1.0, %v1712_v45 }
 0x9b3   : > { %v2023_v8 = vsub.f32 1.0, %v2019_v21  ;;  %v2002_v43 = vmul.f32 %v5291_v42, %v1998_v19  ;;  %v1691_v3 = vmul.f32 1.442695, %v1685_v27  ;;  %v1945_v53 = vmul.f32 0.5, %v5241_v54  ;;  %v4525_v27 = vld [vmem:[%s5863_s9 + $0x88] sm:$0xff]  }
 0x9b4   : > { %v2025_v23 = vsub.f32 1.0, %v2021_v4  ;;  %v2020_v56 = vmul.f32 %v4657_v5, %v2000_v11  ;;  %v1714_v47 = vsel %vm1706_vm7, %v1702_v57, %v1710_v18  ;;  %v1665_v25 = vadd.f32 -0.28449672, %v1661_v51  ;;  %v4520_v57 = vld [vmem:[%s5863_s9] sm:$0xff]   ;;  %v4526_v18 = vld [vmem:[%s5863_s9 + $0x50] sm:$0xff]  }
 0x9b5   : > { %v2031_v9 = vsub.f32 0.0, %v2023_v8  ;;  %v2022_v59 = vmul.f32 %v4659_v44, %v2002_v43  ;;  %v1718_v52 = vadd.f32 1.0, %v1714_v47  ;;  %v1667_v4 = vmul.f32 %v5270_v50, %v1663_v41  ;;  %v4529_v51 = vld [vmem:[%s5863_s9 + $0x90] sm:$0xff]   ;;  %v4534_v41 = vld [vmem:[%s5863_s9 + $0x60] sm:$0xff]  }
 0x9b6   : > { %v2033_v40 = vsub.f32 0.0, %v2025_v23  ;;  %v2024_v38 = vsub.f32 1.0, %v2020_v56  ;;  %4660 = vpow2.f32 %v1687_v46  ;;  %v1946_v54 = vmul.f32 0.5, %v5253_v2  ;;  %v4523_v56 = vld [vmem:[%s5863_s9 + $0xc8] sm:$0xff]   ;;  %v4530_v46 = vld [vmem:[%s5863_s9 + $0x58] sm:$0xff]   ;;  %v4535_v47 = vld [vmem:[%s5863_s9 + $0xe0] sm:$0xff]  }
 0x9b7   : > { %v2035_v39 = vsel %vm2027_vm8, %v2023_v8, %v2031_v9  ;;  %v2026_v29 = vsub.f32 1.0, %v2022_v59  ;;  %v1720_v8 = vmul.f32 %v1716_v35, %v5308_v48  ;;  %v1669_v16 = vmul.f32 %v5280_v7, %v1665_v25  ;;  %v4522_v48 = vld [vmem:[%s5863_s9 + $0x48] sm:$0xff]   ;;  %v4533_v35 = vld [vmem:[%s5863_s9 + $0x98] sm:$0xff]   ;;  %v4542_v25 = vld [vmem:[%s5863_s9 + $0x70] sm:$0xff]  }
 0x9b8   : > { %v2039_v34 = vadd.f32 1.0, %v2035_v39  ;;  %v2037_v55 = vsel %vm2029_vm9, %v2025_v23, %v2033_v40  ;;  %v2032_v42 = vsub.f32 0.0, %v2024_v38  ;;  %v1722_v23 = vmul.f32 %v1718_v52, %v1622_v49  ;;  %v4527_v39 = vld [vmem:[%s5863_s9 + $0xd0] sm:$0xff]   ;;  %v4541_v52 = vld [vmem:[%s5863_s9 + $0xa8] sm:$0xff]   ;;  %v2661_v49 = vld [vmem:[%s5861_s7 + $0x60] sm:$0xff] }
 0x9b9   : > { %v2041_v61 = vadd.f32 1.0, %v2037_v55  ;;  %v2034_v21 = vsub.f32 0.0, %v2026_v29  ;;  %v1671_v19 = vadd.f32 0.2548296, %v1667_v4  ;;  %4662 = vpow2.f32 %v1691_v3  ;;  %v4531_v55 = vld [vmem:[%s5863_s9 + $0xd8] sm:$0xff]   ;;  %v4536_v3 = vld [vmem:[%s5863_s9 + $0x20] sm:$0xff]  }
 0x9ba   : > { %v2036_v62 = vsel %vm2028_vm10, %v2024_v38, %v2032_v42  ;;  %v2043_v63 = vmul.f32 %v2039_v34, %v1943_v31  ;;  %v1724_v26 = vpack.c.bf16 %v1720_v8, %v1720_v8  ;;  %v1673_v40 = vadd.f32 0.2548296, %v1669_v16  ;;  %v4528_v38 = vld [vmem:[%s5863_s9 + $0x10] sm:$0xff]   ;;  %v4546_v8 = vld [vmem:[%s5863_s9 + $0x78] sm:$0xff]  }
 0x9bb   : > { %v2040_v58 = vadd.f32 1.0, %v2036_v62  ;;  %v2038_v0 = vsel %vm2030_vm11, %v2026_v29, %v2034_v21  ;;  %v2045_v60 = vmul.f32 %v2041_v61, %v1945_v53  ;;  %v1726_v43 = vpack.c.bf16 %v1722_v23, %v1722_v23  ;;  %v4538_v53 = vld [vmem:[%s5863_s9 + $0x68] sm:$0xff]   ;;  %v4537_v61 = vld [vmem:[%s5863_s9 + $0xa0] sm:$0xff]   ;;  %v4544_v4 = vld [vmem:[%s5863_s9 + $0x30] sm:$0xff]  }
 0x9bc   : > { %v2042_v11 = vadd.f32 1.0, %v2038_v0  ;;  %v2047_v5 = vpack.c.bf16 %v2043_v63, %v2043_v63  ;;  %v1675_v44 = vmul.f32 %v5270_v50, %v1671_v19  ;;  %v1677_v50 = vmul.f32 %v5280_v7, %v1673_v40  ;;  %v4532_v7 = vld [vmem:[%s5863_s9 + $0x18] sm:$0xff]   ;;  %v2665_v19 = vld [vmem:[%s5861_s7 + $0xe0] sm:$0xff]  ;;  %v2666_v40 = vld [vmem:[%s5861_s7 + $0xe8] sm:$0xff] }
 0x9bd   : > { %v2044_v32 = vmul.f32 %v2040_v58, %v1944_v6  ;;  %v2049_v9 = vpack.c.bf16 %v2045_v60, %v2045_v60  ;;  %v4539_v6 = vld [vmem:[%s5863_s9 + $0xe8] sm:$0xff]   ;;  %v1621_v23 = vmul.f32 0.5, %v5209_v28 }
 0x9be   : > { %v2046_v20 = vmul.f32 %v2042_v11, %v1946_v54  ;;  %v4540_v58 = vld [vmem:[%s5863_s9 + $0x28] sm:$0xff]   ;;  %v1619_v54 = vmul.f32 0.5, %v5203_v22  ;;  %v4545_v11 = vld [vmem:[%s5863_s9 + $0xb0] sm:$0xff]  }
 0x9bf   : > { %v2048_v17 = vpack.c.bf16 %v2044_v32, %v2044_v32  ;;  %v2660_v22 = vld [vmem:[%s5861_s7 + $0x28] sm:$0xff] }
 0x9c0   : > { %v2050_v2 = vpack.c.bf16 %v2046_v20, %v2046_v20  ;;  %v4661_v45 = vpop.eup %4660  ;;  %v2662_v20 = vld [vmem:[%s5861_s7 + $0x68] sm:$0xff] }
 0x9c1   : > { %2339 = vmatprep.mubr.bf16.mxu1 %v2048_v17  ;;  %v1695_v59 = vmul.f32 %v4661_v45, %v1675_v44  ;;  %v4547_v17 = vld [vmem:[%s5863_s9 + $0xf8] sm:$0xff]   ;;  %v4551_v45 = vld [vmem:[%s5863_s9 + $0x2c0] sm:$0xff]  }
 0x9c2   : > { %2340 = vmatmul.mubr.bf16.vlgmr.msra.gmra.mrb[28].mxu1 %v2047_v5  ;;  %2379 = vmatprep.mubr.bf16.mxu0 %v2050_v2  ;;  %v4078_v5 = vcombine.high %v2659_v36, %v2661_v49 }
 0x9c3   : > { %4235 = vmatpush3.bf16.msra.mxu1 %v4520_v57  ;;  %2611 = vmatprep.mubr.bf16.mxu1 %v1724_v26  ;;  %v4663_v34 = vpop.eup %4662  ;;  %v1699_v29 = vsub.f32 1.0, %v1695_v59  ;;  %v4548_v57 = vld [vmem:[%s5863_s9 + $0x38] sm:$0xff]   ;;  %v4554_v59 = vld [vmem:[%s5863_s9 + $0x248] sm:$0xff]  }
 0x9c4   : > { %4236 = vmatprep.subr.bf16.mxu1 %v4522_v48  ;;  %2380 = vmatmul.mubr.bf16.vlgmr.msra.gmra.mrb[28].mxu0 %v2049_v9  ;;  %v1697_v42 = vmul.f32 %v4663_v34, %v1677_v50  ;;  %v2663_v48 = vld [vmem:[%s5861_s7 + $0xa0] sm:$0xff]  ;;  %v4549_v26 = vld [vmem:[%s5863_s9 + $0xb8] sm:$0xff]   ;;  %v4080_v9 = vcombine.high %v2660_v22, %v2662_v20  ;;  %v4556_v34 = vld [vmem:[%s5863_s9 + $0x208] sm:$0xff]  }
 0x9c5   : > { %4257 = vmatpush3.bf16.msra.mxu0 %v4521_v24  ;;  %2651 = vmatprep.mubr.bf16.mxu0 %v1726_v43  ;;  %v1707_v62 = vsub.f32 0.0, %v1699_v29  ;;  %v4077_v24 = vcombine.low %v2659_v36, %v2661_v49  ;;  %v4082_v28 = vcombine.high %v2663_v48, %v2665_v19  ;;  %v4079_v43 = vcombine.low %v2660_v22, %v2662_v20  ;;  %v4552_v50 = vld [vmem:[%s5863_s9 + $0x200] sm:$0xff]   ;;  %v4580_v36 = vld [vmem:[%s5863_s9 + $0x238] sm:$0xff]  }
 0x9c6   : > { %4258 = vmatprep.subr.bf16.mxu0 %v4523_v56  ;;  %v1701_v31 = vsub.f32 1.0, %v1697_v42  ;;  %v4081_v44 = vcombine.low %v2663_v48, %v2665_v19  ;;  %v4559_v42 = vld [vmem:[%s5863_s9 + $0x2d0] sm:$0xff]   ;;  %v4581_v49 = vld [vmem:[%s5863_s9 + $0x2b8] sm:$0xff]  }
 0x9c7   : > { %4237 = vmatpush3.bf16.msra.mxu1 %v4524_v37  ;;  %v1711_v63 = vsel %vm1703_vm12, %v1699_v29, %v1707_v62  ;;  %v2664_v37 = vld [vmem:[%s5861_s7 + $0xa8] sm:$0xff]  ;;  %v4561_v29 = vld [vmem:[%s5863_s9 + $0x290] sm:$0xff]   ;;  %v4567_v62 = vld [vmem:[%s5863_s9 + $0x2e0] sm:$0xff]  }
 0x9c8   : > { %4238 = vmatprep.subr.bf16.mxu1 %v4526_v18  ;;  %v1709_v21 = vsub.f32 0.0, %v1701_v31  ;;  %v1715_v32 = vadd.f32 1.0, %v1711_v63  ;;  %v4573_v63 = vld [vmem:[%s5863_s9 + $0x2a8] sm:$0xff]  }
 0x9c9   : > { %4259 = vmatpush3.bf16.msra.mxu0 %v4525_v27  ;;  %v4084_v27 = vcombine.high %v2664_v37, %v2666_v40 }
 0x9ca   : > { %4260 = vmatprep.subr.bf16.mxu0 %v4527_v39  ;;  %v1713_v0 = vsel %vm1705_vm13, %v1701_v31, %v1709_v21  ;;  %v1719_v16 = vmul.f32 %v1715_v32, %v1619_v54  ;;  %v4083_v39 = vcombine.low %v2664_v37, %v2666_v40  ;;  %v4565_v31 = vld [vmem:[%s5863_s9 + $0x298] sm:$0xff]   ;;  %v4571_v21 = vld [vmem:[%s5863_s9 + $0x2e8] sm:$0xff]   ;;  %v4577_v32 = vld [vmem:[%s5863_s9 + $0x2b0] sm:$0xff]  }
 0x9cb   : > { %4239 = vmatpush3.bf16.msra.mxu1 %v4528_v38  ;;  %v1717_v60 = vadd.f32 1.0, %v1713_v0  ;;  %v4550_v38 = vld [vmem:[%s5863_s9 + $0x240] sm:$0xff]   ;;  %v4578_v0 = vld [vmem:[%s5863_s9 + $0x278] sm:$0xff]   ;;  %v5566_v54 = vld [vmem:[%s5861_s7 + $0x30] sm:$0xff] }
 0x9cc   : > { %4240 = vmatprep.subr.bf16.mxu1 %v4530_v46  ;;  %v1723_v56 = vpack.c.bf16 %v1719_v16, %v1719_v16  ;;  %v4553_v46 = vld [vmem:[%s5863_s9 + $0x280] sm:$0xff]  }
 0x9cd   : > { %4261 = vmatpush3.bf16.msra.mxu0 %v4529_v51  ;;  %v1721_v2 = vmul.f32 %v1717_v60, %v1621_v23  ;;  %v4555_v51 = vld [vmem:[%s5863_s9 + $0x2c8] sm:$0xff]   ;;  %v5576_v60 = vld [vmem:[%s5861_s7 + $0x38] sm:$0xff] }
 0x9ce   : > { %4262 = vmatprep.subr.bf16.mxu0 %v4531_v55  ;;  %v4557_v55 = vld [vmem:[%s5863_s9 + $0x288] sm:$0xff]  }
 0x9cf   : > { %4241 = vmatpush3.bf16.msra.mxu1 %v4532_v7  ;;  %v1725_v18 = vpack.c.bf16 %v1721_v2, %v1721_v2  ;;  %v4558_v7 = vld [vmem:[%s5863_s9 + $0x250] sm:$0xff]  }
 0x9d0   : > { %4242 = vmatprep.subr.bf16.mxu1 %v4534_v41  ;;  %v4560_v41 = vld [vmem:[%s5863_s9 + $0x210] sm:$0xff]  }
 0x9d1   : > { %4263 = vmatpush3.bf16.msra.mxu0 %v4533_v35  ;;  %v4562_v35 = vld [vmem:[%s5863_s9 + $0x258] sm:$0xff]  }
 0x9d2   : > { %4264 = vmatprep.subr.bf16.mxu0 %v4535_v47  ;;  %v4563_v47 = vld [vmem:[%s5863_s9 + $0x2d8] sm:$0xff]  }
 0x9d3   : > { %4243 = vmatpush3.bf16.msra.mxu1 %v4536_v3  ;;  %v4564_v3 = vld [vmem:[%s5863_s9 + $0x218] sm:$0xff]  }
 0x9d4   : > { %4244 = vmatprep.subr.bf16.mxu1 %v4538_v53  ;;  %v4566_v53 = vld [vmem:[%s5863_s9 + $0x260] sm:$0xff]  }
 0x9d5   : > { %4265 = vmatpush3.bf16.msra.mxu0 %v4537_v61  ;;  %v4568_v61 = vld [vmem:[%s5863_s9 + $0x220] sm:$0xff]  }
 0x9d6   : > { %4266 = vmatprep.subr.bf16.mxu0 %v4539_v6  ;;  %v4569_v6 = vld [vmem:[%s5863_s9 + $0x2a0] sm:$0xff]  }
 0x9d7   : > { %4245 = vmatpush3.bf16.msra.mxu1 %v4540_v58  ;;  %v4570_v58 = vld [vmem:[%s5863_s9 + $0x268] sm:$0xff]  }
 0x9d8   : > { %4246 = vmatprep.subr.bf16.mxu1 %v4542_v25  ;;  %v4572_v25 = vld [vmem:[%s5863_s9 + $0x228] sm:$0xff]  }
 0x9d9   : > { %4267 = vmatpush3.bf16.msra.mxu0 %v4541_v52  ;;  %v4574_v52 = vld [vmem:[%s5863_s9 + $0x270] sm:$0xff]  }
 0x9da   : > { %4268 = vmatprep.subr.bf16.mxu0 %v4543_v30  ;;  %v4575_v30 = vld [vmem:[%s5863_s9 + $0x2f0] sm:$0xff]  }
 0x9db   : > { %4247 = vmatpush3.bf16.msra.mxu1 %v4544_v4  ;;  %v4576_v4 = vld [vmem:[%s5863_s9 + $0x230] sm:$0xff]  }
 0x9dc   : > { %4248 = vmatprep.subr.bf16.mxu1 %v4546_v8  ;;  %v4579_v8 = vld [vmem:[%s5863_s9 + $0x2f8] sm:$0xff]  }
 0x9dd   : > { %4269 = vmatpush3.bf16.msra.mxu0 %v4545_v11  ;;  %v5571_v11 = vld [vmem:[%s5861_s7 + $0x70] sm:$0xff] }
 0x9de   : > { %4270 = vmatprep.subr.bf16.mxu0 %v4547_v17  ;;  %v4120_v17 = vcombine.high %v5566_v54, %v5571_v11  ;;  %v4119_v16 = vcombine.low %v5566_v54, %v5571_v11  ;;  %v4582_v54 = vld [vmem:[%s5863_s9 + $0x340] sm:$0xff]  }
 0x9df   : > { %4249 = vmatpush3.bf16.msra.mxu1 %v4548_v57  ;;  %v5583_v57 = vld [vmem:[%s5861_s7 + $0x78] sm:$0xff]  ;;  %v4583_v11 = vld [vmem:[%s5863_s9 + $0x3c0] sm:$0xff]  }
 0x9e0   : > { %2729 = vmatprep.subr.bf16.mxu1 %v4078_v5  ;;  %v4121_v5 = vcombine.low %v5576_v60, %v5583_v57  ;;  %v4122_v22 = vcombine.high %v5576_v60, %v5583_v57  ;;  %v4585_v60 = vld [vmem:[%s5863_s9 + $0x380] sm:$0xff]   ;;  %v4587_v57 = vld [vmem:[%s5863_s9 + $0x3c8] sm:$0xff]  }
 0x9e1   : > { %4271 = vmatpush3.bf16.msra.mxu0 %v4549_v26 }
 0x9e2   : > { %2612 = vmatmul.mubr.bf16.vlgmr.msra.gmra.mrb[32].mxu1 %v1723_v56  ;;  %2770 = vmatprep.subr.bf16.mxu0 %v4080_v9 }
 0x9e3   : > { %2730 = vmatpush1.bf16.msra.mxu1 %v4077_v24  ;;  %2761 = vmatprep.mubr.bf16.mxu1 %v4774_v15 }
 0x9e4   : > { %2731 = vmatprep.subr.bf16.mxu1 %v4082_v28  ;;  %2652 = vmatmul.mubr.bf16.vlgmr.msra.gmra.mrb[32].mxu0 %v1725_v18 }
 0x9e5   : > { %2771 = vmatpush1.bf16.msra.mxu0 %v4079_v43  ;;  %2802 = vmatprep.mubr.bf16.mxu0 %v4774_v15 }
 0x9e6   : > { %2772 = vmatprep.subr.bf16.mxu0 %v4084_v27  ;;  %v2667_v27 = vld [vmem:[%s5862_s8 + $0x8] sm:$0xf] }
 0x9e7   : > { %2732 = vmatpush1.bf16.msra.mxu1 %v4081_v44 }
 0x9e8   : > { %4278 = vmatprep.subr.bf16.mxu1 %v4550_v38 }
 0x9e9   : > { %2773 = vmatpush1.bf16.msra.mxu0 %v4083_v39 }
 0x9ea   : > { %4085 = vmatmul.mubr.msk.bf16.vlgmr.msra.gmra.mrb[36].mxu1 %vm462_vm1, %v5070_v33  ;;  %4300 = vmatprep.subr.bf16.mxu0 %v4551_v45 }
 0x9eb   : > { %4279 = vmatpush3.bf16.msra.mxu1 %v4552_v50 }
 0x9ec   : > { %4086 = vmatmul.mubr.msk.bf16.vlgmr.msra.gmra.mrb[36].mxu0 %vm462_vm1, %v5070_v33  ;;  %4280 = vmatprep.subr.bf16.mxu1 %v4554_v59 }
 0x9ed   : > { %4301 = vmatpush3.bf16.msra.mxu0 %v4553_v46 }
 0x9ee   : > { %4302 = vmatprep.subr.bf16.mxu0 %v4555_v51  ;;  %v2672_v51 = vrot.slane %v2667_v27, %v5185_v10 }
 0x9ef   : > { %4281 = vmatpush3.bf16.msra.mxu1 %v4556_v34 }
 0x9f0   : > { %4282 = vmatprep.subr.bf16.mxu1 %v4558_v7 }
 0x9f1   : > { %4303 = vmatpush3.bf16.msra.mxu0 %v4557_v55  ;;  %v2676_v55 = vrot.slane %v2667_v27, %v5191_v12 }
 0x9f2   : > { %4304 = vmatprep.subr.bf16.mxu0 %v4559_v42 }
 0x9f3   : > { %4283 = vmatpush3.bf16.msra.mxu1 %v4560_v41  ;;  %v2680_v41 = vrot.slane %v2667_v27, %v5197_v14 }
 0x9f4   : > { %4284 = vmatprep.subr.bf16.mxu1 %v4562_v35 }
 0x9f5   : > { %4305 = vmatpush3.bf16.msra.mxu0 %v4561_v29 }
 0x9f6   : > { %4306 = vmatprep.subr.bf16.mxu0 %v4563_v47  ;;  %v2684_v47 = vrot.slane %v2667_v27, %v5194_v13 }
 0x9f7   : > { %4285 = vmatpush3.bf16.msra.mxu1 %v4564_v3 }
 0x9f8   : > { %4286 = vmatprep.subr.bf16.mxu1 %v4566_v53 }
 0x9f9   : > { %4307 = vmatpush3.bf16.msra.mxu0 %v4565_v31 }
 0x9fa   : > { %4308 = vmatprep.subr.bf16.mxu0 %v4567_v62 }
 0x9fb   : > { %4287 = vmatpush3.bf16.msra.mxu1 %v4568_v61 }
 0x9fc   : > { %4288 = vmatprep.subr.bf16.mxu1 %v4570_v58 }
 0x9fd   : > { %4309 = vmatpush3.bf16.msra.mxu0 %v4569_v6 }
 0x9fe   : > { %4310 = vmatprep.subr.bf16.mxu0 %v4571_v21 }
 0x9ff   : > { %4289 = vmatpush3.bf16.msra.mxu1 %v4572_v25 }
 0xa00   : > { %4290 = vmatprep.subr.bf16.mxu1 %v4574_v52 }
 0xa01   : > { %4311 = vmatpush3.bf16.msra.mxu0 %v4573_v63 }
 0xa02   : > { %4312 = vmatprep.subr.bf16.mxu0 %v4575_v30 }
 0xa03   : > { %4291 = vmatpush3.bf16.msra.mxu1 %v4576_v4 }
 0xa04   : > { %4292 = vmatprep.subr.bf16.mxu1 %v4578_v0 }
 0xa05   : > { %4313 = vmatpush3.bf16.msra.mxu0 %v4577_v32 }
 0xa06   : > { %4314 = vmatprep.subr.bf16.mxu0 %v4579_v8 }
 0xa07   : > { %4293 = vmatpush3.bf16.msra.mxu1 %v4580_v36 }
 0xa08   : > { %3326 = vmatprep.subr.bf16.mxu1 %v4120_v17 }
 0xa09   : > { %4315 = vmatpush3.bf16.msra.mxu0 %v4581_v49 }
 0xa0a   : > { %3367 = vmatprep.subr.bf16.mxu0 %v4122_v22 }
 0xa95   : > { %v4206_v20 = vpop.f32.mrb[28].mxu1 }
 0xa96   : > { %v4207_v23 = vpop.f32.mrb[29].mxu1 }
 0xa97   : > { %v4208_v48 = vadd.f32 %v4207_v23, %v4206_v20  ;;  %v4209_v19 = vpop.f32.mrb[30].mxu1  ;;  %v4228_v26 = vpop.f32.mrb[28].mxu0 }
 0xa98   : > { %v4210_v2 = vpop.f32.mrb[31].mxu1  ;;  %v4229_v24 = vpop.f32.mrb[29].mxu0 }
 0xa99   : > { %v4230_v9 = vadd.f32 %v4229_v24, %v4228_v26  ;;  %v4231_v56 = vpop.f32.mrb[30].mxu0 }
 0xa9a   : > { %v4232_v28 = vpop.f32.mrb[31].mxu0 }
 0xa9b   : > { %v2382_v37 = vadd.f32 %v4230_v9, %v4208_v48 }
 0xab5   : > { %v4250_v40 = vpop.f32.mrb[32].mxu1 }
 0xab6   : > { %v4251_v43 = vpop.f32.mrb[33].mxu1 }
 0xab7   : > { %v4252_v18 = vadd.f32 %v4251_v43, %v4250_v40  ;;  %v4253_v44 = vpop.f32.mrb[34].mxu1  ;;  %v4272_v39 = vpop.f32.mrb[32].mxu0 }
 0xab8   : > { %v4254_v38 = vpop.f32.mrb[35].mxu1  ;;  %v4273_v50 = vpop.f32.mrb[33].mxu0 }
 0xab9   : > { %v2614_v45 = vadd.f32 %v4252_v18, %v2382_v37  ;;  %v4274_v46 = vadd.f32 %v4273_v50, %v4272_v39  ;;  %v4275_v59 = vpop.f32.mrb[34].mxu0 }
 0xaba   : > { %v4276_v34 = vpop.f32.mrb[35].mxu0 }
 0xabb   : > { %v5596_v7 = vadd.f32 %v4274_v46, %v2614_v45 }
 0xabd   : > { %v2763_v42 = vpop.f32.mrb[36].mxu1 }
 0xabe   : > { %v5599_v29 = vadd.f32 %v2763_v42, %v2672_v51  ;;  %v2765_v35 = vpop.f32.mrb[37].mxu1 }
 0xabf   : > { %v5602_v3 = vadd.f32 %v2765_v35, %v2676_v55  ;;  %v2767_v31 = vpop.f32.mrb[38].mxu1  ;;  %v2804_v62 = vpop.f32.mrb[36].mxu0 }
 0xac0   : > { %v5605_v53 = vmul.f32 0.70710677, %v5599_v29  ;;  %v2768_v61 = vpop.f32.mrb[39].mxu1  ;;  %v5607_v6 = vadd.f32 %v2804_v62, %v2680_v41  ;;  %v2806_v21 = vpop.f32.mrb[37].mxu0 }
 0xac1   : > { %v5610_v58 = vmul.f32 0.70710677, %v5602_v3  ;;  %v5613_v63 = vadd.f32 %v2806_v21, %v2684_v47  ;;  %v2808_v52 = vpop.f32.mrb[38].mxu0 }
 0xac2   : > { %v2819_v25 = vand.u32 2147483647, %v5605_v53  ;;  %v5616_v30 = vmul.f32 0.70710677, %v5607_v6  ;;  %v2809_v22 = vpop.f32.mrb[39].mxu0  ;;  %vm2895_vm14 = vcmp.ge.f32.partialorder %v5605_v53, 0.0 }
 0xac3   : > { %v2820_v4 = vand.u32 2147483647, %v5610_v58  ;;  %v5620_v0 = vmul.f32 0.70710677, %v5613_v63  ;;  %vm2896_vm15 = vcmp.ge.f32.partialorder %v5610_v58, 0.0  ;;  %v3260_v58 = vld [vmem:[%s5861_s7 + $0xb0] sm:$0xff] }
 0xac4   : > { %v2823_v32 = vmul.f32 0.3275911, %v2819_v25  ;;  %v2821_v8 = vand.u32 2147483647, %v5616_v30  ;;  %v2871_v2 = vsub.f32 0.0, %v2819_v25  ;;  %vm2897_vm0 = vcmp.ge.f32.partialorder %v5616_v30, 0.0 }
 0xac5   : > { %v2824_v36 = vmul.f32 0.3275911, %v2820_v4  ;;  %v2822_v17 = vand.u32 2147483647, %v5620_v0  ;;  %v2872_v24 = vsub.f32 0.0, %v2820_v4  ;;  %vm2898_vm2 = vcmp.ge.f32.partialorder %v5620_v0, 0.0 }
 0xac6   : > { %v2827_v49 = vadd.f32 1.0, %v2823_v32  ;;  %v2825_v20 = vmul.f32 0.3275911, %v2821_v8  ;;  %v2873_v9 = vsub.f32 0.0, %v2821_v8  ;;  %v2875_v28 = vmul.f32 %v2871_v2, %v2819_v25  ;;  %v3263_v0 = vld [vmem:[%s5861_s7 + $0xf8] sm:$0xff] }
 0xac7   : > { %v2828_v23 = vadd.f32 1.0, %v2824_v36  ;;  %v2826_v48 = vmul.f32 0.3275911, %v2822_v17  ;;  %v2876_v43 = vmul.f32 %v2872_v24, %v2820_v4  ;;  %v2874_v18 = vsub.f32 0.0, %v2822_v17 }
 0xac8   : > { %4664 = vrcp.f32 %v2827_v49  ;;  %v2829_v19 = vadd.f32 1.0, %v2825_v20  ;;  %v2877_v38 = vmul.f32 %v2873_v9, %v2821_v8  ;;  %v2879_v45 = vmul.f32 1.442695, %v2875_v28 }
 0xac9   : > { %4666 = vrcp.f32 %v2828_v23  ;;  %v2830_v26 = vadd.f32 1.0, %v2826_v48  ;;  %v2881_v51 = vmul.f32 1.442695, %v2876_v43  ;;  %v2878_v42 = vmul.f32 %v2874_v18, %v2822_v17 }
 0xaca   : > { %4668 = vrcp.f32 %v2829_v19  ;;  %v2883_v47 = vmul.f32 1.442695, %v2877_v38  ;;  %v2813_v30 = vmul.f32 0.5, %v5607_v6 }
 0xacb   : > { %4670 = vrcp.f32 %v2830_v26  ;;  %v2885_v4 = vmul.f32 1.442695, %v2878_v42 }
 0xacc   : > { %4672 = vpow2.f32 %v2879_v45 }
 0xacd   : > { %4674 = vpow2.f32 %v2881_v51 }
 0xace   : > { %4676 = vpow2.f32 %v2883_v47 }
 0xacf   : > { %4678 = vpow2.f32 %v2885_v4 }
 0xad2   : > { %v4665_v56 = vpop.eup %4664 }
 0xad3   : > { %v4667_v37 = vpop.eup %4666  ;;  %v2835_v40 = vmul.f32 1.0614054, %v4665_v56 }
 0xad4   : > { %v2836_v44 = vmul.f32 1.0614054, %v4667_v37  ;;  %v4669_v27 = vpop.eup %4668 }
 0xad5   : > { %v2839_v39 = vadd.f32 -1.4531521, %v2835_v40  ;;  %v2837_v50 = vmul.f32 1.0614054, %v4669_v27  ;;  %v4671_v34 = vpop.eup %4670 }
 0xad6   : > { %v2840_v46 = vadd.f32 -1.4531521, %v2836_v44  ;;  %v2838_v31 = vmul.f32 1.0614054, %v4671_v34  ;;  %v4673_v40 = vpop.eup %4672 }
 0xad7   : > { %v2843_v59 = vmul.f32 %v4665_v56, %v2839_v39  ;;  %v2841_v55 = vadd.f32 -1.4531521, %v2837_v50  ;;  %v4675_v44 = vpop.eup %4674 }
 0xad8   : > { %v2844_v41 = vmul.f32 %v4667_v37, %v2840_v46  ;;  %v2842_v25 = vadd.f32 -1.4531521, %v2838_v31  ;;  %v4677_v46 = vpop.eup %4676 }
 0xad9   : > { %v2847_v35 = vadd.f32 1.4214138, %v2843_v59  ;;  %v2845_v62 = vmul.f32 %v4669_v27, %v2841_v55  ;;  %v4679_v47 = vpop.eup %4678 }
 0xada   : > { %v2848_v61 = vadd.f32 1.4214138, %v2844_v41  ;;  %v2846_v36 = vmul.f32 %v4671_v34, %v2842_v25 }
 0xadb   : > { %v2851_v21 = vmul.f32 %v4665_v56, %v2847_v35  ;;  %v2849_v52 = vadd.f32 1.4214138, %v2845_v62 }
 0xadc   : > { %v2852_v32 = vmul.f32 %v4667_v37, %v2848_v61  ;;  %v2850_v17 = vadd.f32 1.4214138, %v2846_v36  ;;  %v2811_v61 = vmul.f32 0.5, %v5599_v29  ;;  %v3262_v29 = vld [vmem:[%s5861_s7 + $0xf0] sm:$0xff] }
 0xadd   : > { %v2855_v8 = vadd.f32 -0.28449672, %v2851_v21  ;;  %v2853_v49 = vmul.f32 %v4669_v27, %v2849_v52  ;;  %v2812_v52 = vmul.f32 0.5, %v5602_v3  ;;  %v4123_v6 = vcombine.low %v3260_v58, %v3262_v29 }
 0xade   : > { %v2856_v22 = vadd.f32 -0.28449672, %v2852_v32  ;;  %v2854_v26 = vmul.f32 %v4671_v34, %v2850_v17  ;;  %v2814_v17 = vmul.f32 0.5, %v5613_v63 }
 0xadf   : > { %v2859_v20 = vmul.f32 %v4665_v56, %v2855_v8  ;;  %v2857_v23 = vadd.f32 -0.28449672, %v2853_v49 }
 0xae0   : > { %v2860_v48 = vmul.f32 %v4667_v37, %v2856_v22  ;;  %v2858_v28 = vadd.f32 -0.28449672, %v2854_v26 }
 0xae1   : > { %v2863_v19 = vadd.f32 0.2548296, %v2859_v20  ;;  %v2861_v2 = vmul.f32 %v4669_v27, %v2857_v23 }
 0xae2   : > { %v2864_v24 = vadd.f32 0.2548296, %v2860_v48  ;;  %v2862_v38 = vmul.f32 %v4671_v34, %v2858_v28  ;;  %v4124_v48 = vcombine.high %v3260_v58, %v3262_v29 }
 0xae3   : > { %v2867_v9 = vmul.f32 %v4665_v56, %v2863_v19  ;;  %v2865_v43 = vadd.f32 0.2548296, %v2861_v2  ;;  %v3261_v2 = vld [vmem:[%s5861_s7 + $0xb8] sm:$0xff] }
 0xae4   : > { %v2868_v18 = vmul.f32 %v4667_v37, %v2864_v24  ;;  %v2866_v51 = vadd.f32 0.2548296, %v2862_v38  ;;  %v4125_v28 = vcombine.low %v3261_v2, %v3263_v0  ;;  %v4595_v38 = vld [vmem:[%s5863_s9 + $0x3d8] sm:$0xff]  }
 0xae5   : > { %v2887_v39 = vmul.f32 %v4673_v40, %v2867_v9  ;;  %v2869_v45 = vmul.f32 %v4669_v27, %v2865_v43  ;;  %v4126_v9 = vcombine.high %v3261_v2, %v3263_v0  ;;  %v4590_v40 = vld [vmem:[%s5863_s9 + $0x350] sm:$0xff]  }
 0xae6   : > { %v2888_v50 = vmul.f32 %v4675_v44, %v2868_v18  ;;  %v2870_v35 = vmul.f32 %v4671_v34, %v2866_v51  ;;  %v4591_v43 = vld [vmem:[%s5863_s9 + $0x3d0] sm:$0xff]   ;;  %v4600_v51 = vld [vmem:[%s5863_s9 + $0x320] sm:$0xff]  }
 0xae7   : > { %v2891_v59 = vsub.f32 1.0, %v2887_v39  ;;  %v2889_v55 = vmul.f32 %v4677_v46, %v2869_v45  ;;  %v4592_v18 = vld [vmem:[%s5863_s9 + $0x310] sm:$0xff]   ;;  %v4594_v39 = vld [vmem:[%s5863_s9 + $0x358] sm:$0xff]   ;;  %v4598_v46 = vld [vmem:[%s5863_s9 + $0x360] sm:$0xff]  }
 0xae8   : > { %v2892_v42 = vsub.f32 1.0, %v2888_v50  ;;  %v2890_v37 = vmul.f32 %v4679_v47, %v2870_v35  ;;  %v4593_v44 = vld [vmem:[%s5863_s9 + $0x390] sm:$0xff]   ;;  %v4596_v45 = vld [vmem:[%s5863_s9 + $0x318] sm:$0xff]   ;;  %v4604_v35 = vld [vmem:[%s5863_s9 + $0x328] sm:$0xff]  }
 0xae9   : > { %v2899_v41 = vsub.f32 0.0, %v2891_v59  ;;  %v2893_v56 = vsub.f32 1.0, %v2889_v55  ;;  %v4597_v50 = vld [vmem:[%s5863_s9 + $0x398] sm:$0xff]   ;;  %v4601_v55 = vld [vmem:[%s5863_s9 + $0x3a0] sm:$0xff]   ;;  %v4605_v47 = vld [vmem:[%s5863_s9 + $0x3a8] sm:$0xff]  }
 0xaea   : > { %v2900_v31 = vsub.f32 0.0, %v2892_v42  ;;  %v2894_v34 = vsub.f32 1.0, %v2890_v37  ;;  %v4609_v37 = vld [vmem:[%s5863_s9 + $0x3b0] sm:$0xff]  }
 0xaeb   : > { %v2903_v62 = vsel %vm2895_vm14, %v2891_v59, %v2899_v41  ;;  %v2901_v21 = vsub.f32 0.0, %v2893_v56  ;;  %v4599_v59 = vld [vmem:[%s5863_s9 + $0x3e0] sm:$0xff]   ;;  %v4603_v41 = vld [vmem:[%s5863_s9 + $0x3e8] sm:$0xff]  }
 0xaec   : > { %v2907_v27 = vadd.f32 1.0, %v2903_v62  ;;  %v2904_v25 = vsel %vm2896_vm15, %v2892_v42, %v2900_v31  ;;  %v2902_v49 = vsub.f32 0.0, %v2894_v34  ;;  %v4602_v42 = vld [vmem:[%s5863_s9 + $0x368] sm:$0xff]   ;;  %v4607_v31 = vld [vmem:[%s5863_s9 + $0x3f0] sm:$0xff]  }
 0xaed   : > { %v2908_v4 = vadd.f32 1.0, %v2904_v25  ;;  %v2905_v8 = vsel %vm2897_vm0, %v2893_v56, %v2901_v21  ;;  %v4606_v56 = vld [vmem:[%s5863_s9 + $0x370] sm:$0xff]   ;;  %v4612_v21 = vld [vmem:[%s5863_s9 + $0x338] sm:$0xff]  }
 0xaee   : > { %v2911_v32 = vmul.f32 %v2907_v27, %v2811_v61  ;;  %v2909_v53 = vadd.f32 1.0, %v2905_v8  ;;  %v2906_v22 = vsel %vm2898_vm2, %v2894_v34, %v2902_v49  ;;  %v4608_v62 = vld [vmem:[%s5863_s9 + $0x330] sm:$0xff]   ;;  %v4610_v61 = vld [vmem:[%s5863_s9 + $0x378] sm:$0xff]   ;;  %v3264_v8 = vld [vmem:[%s5862_s8 + $0xc] sm:$0xf] }
 0xaef   : > { %v2912_v36 = vmul.f32 %v2908_v4, %v2812_v52  ;;  %v2910_v23 = vadd.f32 1.0, %v2906_v22  ;;  %v4611_v27 = vld [vmem:[%s5863_s9 + $0x3f8] sm:$0xff]   ;;  %v3269_v49 = vrot.slane %v3264_v8, %v5185_v10  ;;  %v3273_v29 = vrot.slane %v3264_v8, %v5191_v12 }
 0xaf0   : > { %v2915_v20 = vpack.c.bf16 %v2911_v32, %v2911_v32  ;;  %v2913_v19 = vmul.f32 %v2909_v53, %v2813_v30  ;;  %v4613_v25 = vld [vmem:[%s5863_s9 + $0x3b8] sm:$0xff]   ;;  %v3281_v12 = vrot.slane %v3264_v8, %v5194_v13 }
 0xaf1   : > { %v2916_v3 = vpack.c.bf16 %v2912_v36, %v2912_v36  ;;  %v2914_v26 = vmul.f32 %v2910_v23, %v2814_v17 }
 0xaf2   : > { %v2917_v24 = vpack.c.bf16 %v2913_v19, %v2913_v19  ;;  %v3277_v19 = vrot.slane %v3264_v8, %v5197_v14 }
 0xaf3   : > { %3207 = vmatprep.mubr.bf16.mxu1 %v2916_v3  ;;  %v2918_v63 = vpack.c.bf16 %v2914_v26, %v2914_v26 }
 0xaf4   : > { %3208 = vmatmul.mubr.bf16.vlgmr.msra.gmra.mrb[40].mxu1 %v2915_v20 }
 0xaf5   : > { %3327 = vmatpush1.bf16.msra.mxu1 %v4119_v16  ;;  %3358 = vmatprep.mubr.bf16.mxu1 %v4774_v15  ;;  %v4588_v16 = vld [vmem:[%s5863_s9 + $0x308] sm:$0xff]  }
 0xaf6   : > { %3328 = vmatprep.subr.bf16.mxu1 %v4124_v48  ;;  %3247 = vmatprep.mubr.bf16.mxu0 %v2918_v63 }
 0xaf7   : > { %3248 = vmatmul.mubr.bf16.vlgmr.msra.gmra.mrb[40].mxu0 %v2917_v24 }
 0xaf8   : > { %3368 = vmatpush1.bf16.msra.mxu0 %v4121_v5  ;;  %3399 = vmatprep.mubr.bf16.mxu0 %v4774_v15  ;;  %v4584_v15 = vld [vmem:[%s5863_s9 + $0x300] sm:$0xff]   ;;  %v4589_v5 = vld [vmem:[%s5863_s9 + $0x388] sm:$0xff]  }
 0xaf9   : > { %3329 = vmatpush1.bf16.msra.mxu1 %v4123_v6  ;;  %3369 = vmatprep.subr.bf16.mxu0 %v4126_v9 }
 0xafa   : > { %4322 = vmatprep.subr.bf16.mxu1 %v4582_v54 }
 0xafc   : > { %4127 = vmatmul.mubr.msk.bf16.vlgmr.msra.gmra.mrb[44].mxu1 %vm462_vm1, %v5070_v33  ;;  %3370 = vmatpush1.bf16.msra.mxu0 %v4125_v28 }
 0xafd   : > { %4344 = vmatprep.subr.bf16.mxu0 %v4583_v11  ;;  %4323 = vmatpush3.bf16.msra.mxu1 %v4584_v15 }
 0xaff   : > { %4128 = vmatmul.mubr.msk.bf16.vlgmr.msra.gmra.mrb[44].mxu0 %vm462_vm1, %v5070_v33  ;;  %v4586_v33 = vld [vmem:[%s5863_s9 + $0x348] sm:$0xff]  }
 0xb00   : > { %4345 = vmatpush3.bf16.msra.mxu0 %v4585_v60  ;;  %4324 = vmatprep.subr.bf16.mxu1 %v4586_v33 }
 0xb01   : > { %4346 = vmatprep.subr.bf16.mxu0 %v4587_v57  ;;  %4325 = vmatpush3.bf16.msra.mxu1 %v4588_v16 }
 0xb02   : > { %4326 = vmatprep.subr.bf16.mxu1 %v4590_v40 }
 0xb04   : > { %4347 = vmatpush3.bf16.msra.mxu0 %v4589_v5 }
 0xb05   : > { %4348 = vmatprep.subr.bf16.mxu0 %v4591_v43  ;;  %4327 = vmatpush3.bf16.msra.mxu1 %v4592_v18 }
 0xb06   : > { %4328 = vmatprep.subr.bf16.mxu1 %v4594_v39 }
 0xb08   : > { %4349 = vmatpush3.bf16.msra.mxu0 %v4593_v44 }
 0xb09   : > { %4350 = vmatprep.subr.bf16.mxu0 %v4595_v38  ;;  %4329 = vmatpush3.bf16.msra.mxu1 %v4596_v45 }
 0xb0a   : > { %4330 = vmatprep.subr.bf16.mxu1 %v4598_v46 }
 0xb0c   : > { %4351 = vmatpush3.bf16.msra.mxu0 %v4597_v50 }
 0xb0d   : > { %4352 = vmatprep.subr.bf16.mxu0 %v4599_v59  ;;  %4331 = vmatpush3.bf16.msra.mxu1 %v4600_v51 }
 0xb0e   : > { %4332 = vmatprep.subr.bf16.mxu1 %v4602_v42 }
 0xb10   : > { %4353 = vmatpush3.bf16.msra.mxu0 %v4601_v55 }
 0xb11   : > { %4354 = vmatprep.subr.bf16.mxu0 %v4603_v41  ;;  %4333 = vmatpush3.bf16.msra.mxu1 %v4604_v35 }
 0xb12   : > { %4334 = vmatprep.subr.bf16.mxu1 %v4606_v56 }
 0xb14   : > { %4355 = vmatpush3.bf16.msra.mxu0 %v4605_v47 }
 0xb15   : > { %4356 = vmatprep.subr.bf16.mxu0 %v4607_v31  ;;  %4335 = vmatpush3.bf16.msra.mxu1 %v4608_v62 }
 0xb16   : > { %4336 = vmatprep.subr.bf16.mxu1 %v4610_v61 }
 0xb18   : > { %4357 = vmatpush3.bf16.msra.mxu0 %v4609_v37 }
 0xb19   : > { %4358 = vmatprep.subr.bf16.mxu0 %v4611_v27  ;;  %4337 = vmatpush3.bf16.msra.mxu1 %v4612_v21 }
 0xb1c   : > { %4359 = vmatpush3.bf16.msra.mxu0 %v4613_v25 }
 0xbc7   : > { %v4294_v52 = vpop.f32.mrb[40].mxu1 }
 0xbc8   : > { %v4295_v4 = vpop.f32.mrb[41].mxu1 }
 0xbc9   : > { %v4296_v34 = vadd.f32 %v4295_v4, %v4294_v52  ;;  %v4297_v32 = vpop.f32.mrb[42].mxu1 }
 0xbca   : > { %v4298_v53 = vpop.f32.mrb[43].mxu1  ;;  %v4316_v36 = vpop.f32.mrb[40].mxu0 }
 0xbcb   : > { %v4317_v58 = vpop.f32.mrb[41].mxu0 }
 0xbcc   : > { %v4318_v30 = vadd.f32 %v4317_v58, %v4316_v36  ;;  %v4319_v3 = vpop.f32.mrb[42].mxu0 }
 0xbcd   : > { %v4320_v22 = vpop.f32.mrb[43].mxu0 }
 0xbce   : > { %v3250_v17 = vadd.f32 %v4318_v30, %v4296_v34 }
 0xbcf   : > { %v3360_v20 = vpop.f32.mrb[44].mxu1 }
 0xbd0   : > { %v5757_v23 = vadd.f32 %v3360_v20, %v3269_v49  ;;  %v3362_v48 = vpop.f32.mrb[45].mxu1  ;;  %v5763_v0 = vadd.f32 %v3250_v17, %v5596_v7 }
 0xbd1   : > { %v5760_v26 = vadd.f32 %v3362_v48, %v3273_v29  ;;  %v3364_v2 = vpop.f32.mrb[46].mxu1 }
 0xbd2   : > { %v5766_v10 = vmul.f32 0.70710677, %v5757_v23  ;;  %v3365_v6 = vpop.f32.mrb[47].mxu1  ;;  %v3401_v9 = vpop.f32.mrb[44].mxu0 }
 0xbd3   : > { %v5770_v63 = vmul.f32 0.70710677, %v5760_v26  ;;  %v5773_v28 = vadd.f32 %v3401_v9, %v3277_v19  ;;  %v3403_v54 = vpop.f32.mrb[45].mxu0 }
 0xbd4   : > { %v3416_v24 = vand.u32 2147483647, %v5766_v10  ;;  %v5776_v7 = vadd.f32 %v3403_v54, %v3281_v12  ;;  %v3405_v15 = vpop.f32.mrb[46].mxu0  ;;  %vm3492_vm3 = vcmp.ge.f32.partialorder %v5766_v10, 0.0 }
 0xbd5   : > { %v3417_v14 = vand.u32 2147483647, %v5770_v63  ;;  %v5779_v60 = vmul.f32 0.70710677, %v5773_v28  ;;  %v3406_v16 = vpop.f32.mrb[47].mxu0  ;;  %vm3493_vm4 = vcmp.ge.f32.partialorder %v5770_v63, 0.0 }
 0xbd6   : > { %v3420_v11 = vmul.f32 0.3275911, %v3416_v24  ;;  %v5782_v57 = vmul.f32 0.70710677, %v5776_v7  ;;  %v3468_v45 = vsub.f32 0.0, %v3416_v24  ;;  %v3410_v63 = vmul.f32 0.5, %v5773_v28 }
 0xbd7   : > { %v3421_v13 = vmul.f32 0.3275911, %v3417_v14  ;;  %v3418_v5 = vand.u32 2147483647, %v5779_v60  ;;  %v3469_v50 = vsub.f32 0.0, %v3417_v14  ;;  %vm3494_vm5 = vcmp.ge.f32.partialorder %v5779_v60, 0.0 }
 0xbd8   : > { %v3424_v33 = vadd.f32 1.0, %v3420_v11  ;;  %v3419_v43 = vand.u32 2147483647, %v5782_v57  ;;  %v3472_v59 = vmul.f32 %v3468_v45, %v3416_v24  ;;  %vm3495_vm6 = vcmp.ge.f32.partialorder %v5782_v57, 0.0 }
 0xbd9   : > { %v3425_v40 = vadd.f32 1.0, %v3421_v13  ;;  %v3422_v18 = vmul.f32 0.3275911, %v3418_v5  ;;  %v3470_v42 = vsub.f32 0.0, %v3418_v5  ;;  %v3473_v41 = vmul.f32 %v3469_v50, %v3417_v14 }
 0xbda   : > { %4680 = vrcp.f32 %v3424_v33  ;;  %v3423_v44 = vmul.f32 0.3275911, %v3419_v43  ;;  %v3471_v35 = vsub.f32 0.0, %v3419_v43  ;;  %v3476_v31 = vmul.f32 1.442695, %v3472_v59 }
 0xbdb   : > { %4682 = vrcp.f32 %v3425_v40  ;;  %v3426_v39 = vadd.f32 1.0, %v3422_v18  ;;  %v3474_v27 = vmul.f32 %v3470_v42, %v3418_v5  ;;  %v3478_v21 = vmul.f32 1.442695, %v3473_v41 }
 0xbdc   : > { %v3427_v38 = vadd.f32 1.0, %v3423_v44  ;;  %v3475_v4 = vmul.f32 %v3471_v35, %v3419_v43 }
 0xbdd   : > { %4684 = vrcp.f32 %v3426_v39  ;;  %v3480_v58 = vmul.f32 1.442695, %v3474_v27 }
 0xbde   : > { %4686 = vrcp.f32 %v3427_v38  ;;  %v3482_v3 = vmul.f32 1.442695, %v3475_v4 }
 0xbdf   : > { %4688 = vpow2.f32 %v3476_v31  ;;  %v3408_v31 = vmul.f32 0.5, %v5757_v23 }
 0xbe0   : > { %4690 = vpow2.f32 %v3478_v21 }
 0xbe1   : > { %4692 = vpow2.f32 %v3480_v58 }
 0xbe2   : > { %4694 = vpow2.f32 %v3482_v3 }
 0xbe4   : > { %v4681_v46 = vpop.eup %4680 }
 0xbe5   : > { %v4683_v51 = vpop.eup %4682  ;;  %v3432_v55 = vmul.f32 1.0614054, %v4681_v46 }
 0xbe6   : > { %v3433_v47 = vmul.f32 1.0614054, %v4683_v51 }
 0xbe7   : > { %v3436_v56 = vadd.f32 -1.4531521, %v3432_v55  ;;  %v4685_v37 = vpop.eup %4684 }
 0xbe8   : > { %v3437_v62 = vadd.f32 -1.4531521, %v3433_v47  ;;  %v4687_v25 = vpop.eup %4686  ;;  %v3434_v52 = vmul.f32 1.0614054, %v4685_v37 }
 0xbe9   : > { %v3440_v61 = vmul.f32 %v4681_v46, %v3436_v56  ;;  %v3435_v8 = vmul.f32 1.0614054, %v4687_v25  ;;  %v4689_v33 = vpop.eup %4688 }
 0xbea   : > { %v3441_v34 = vmul.f32 %v4683_v51, %v3437_v62  ;;  %v3438_v53 = vadd.f32 -1.4531521, %v3434_v52  ;;  %v4691_v40 = vpop.eup %4690 }
 0xbeb   : > { %v3444_v32 = vadd.f32 1.4214138, %v3440_v61  ;;  %v3439_v29 = vadd.f32 -1.4531521, %v3435_v8  ;;  %v4693_v55 = vpop.eup %4692 }
 0xbec   : > { %v3445_v36 = vadd.f32 1.4214138, %v3441_v34  ;;  %v3442_v30 = vmul.f32 %v4685_v37, %v3438_v53  ;;  %v4695_v35 = vpop.eup %4694 }
 0xbed   : > { %v3448_v49 = vmul.f32 %v4681_v46, %v3444_v32  ;;  %v3443_v17 = vmul.f32 %v4687_v25, %v3439_v29 }
 0xbee   : > { %v3449_v22 = vmul.f32 %v4683_v51, %v3445_v36  ;;  %v3446_v48 = vadd.f32 1.4214138, %v3442_v30 }
 0xbef   : > { %v3452_v20 = vadd.f32 -0.28449672, %v3448_v49  ;;  %v3447_v12 = vadd.f32 1.4214138, %v3443_v17  ;;  %v3411_v49 = vmul.f32 0.5, %v5776_v7 }
 0xbf0   : > { %v3453_v19 = vadd.f32 -0.28449672, %v3449_v22  ;;  %v3450_v6 = vmul.f32 %v4685_v37, %v3446_v48 }
 0xbf1   : > { %v3456_v2 = vmul.f32 %v4681_v46, %v3452_v20  ;;  %v3451_v14 = vmul.f32 %v4687_v25, %v3447_v12 }
 0xbf2   : > { %v3457_v24 = vmul.f32 %v4683_v51, %v3453_v19  ;;  %v3454_v54 = vadd.f32 -0.28449672, %v3450_v6  ;;  %v4161_v6 = vld [vmem:[%s5864_s10] ss:$0 sm:$0xff] }
 0xbf3   : > { %v3460_v9 = vadd.f32 0.2548296, %v3456_v2  ;;  %v3455_v13 = vadd.f32 -0.28449672, %v3451_v14 }
 0xbf4   : > { %v3461_v11 = vadd.f32 0.2548296, %v3457_v24  ;;  %v3458_v16 = vmul.f32 %v4685_v37, %v3454_v54 }
 0xbf5   : > { %v3464_v15 = vmul.f32 %v4681_v46, %v3460_v9  ;;  %v3459_v18 = vmul.f32 %v4687_v25, %v3455_v13 }
 0xbf6   : > { %v3465_v5 = vmul.f32 %v4683_v51, %v3461_v11  ;;  %v3462_v44 = vadd.f32 0.2548296, %v3458_v16 }
 0xbf7   : > { %v3484_v43 = vmul.f32 %v4689_v33, %v3464_v15  ;;  %v3463_v45 = vadd.f32 0.2548296, %v3459_v18 }
 0xbf8   : > { %v3485_v39 = vmul.f32 %v4691_v40, %v3465_v5  ;;  %v3466_v50 = vmul.f32 %v4685_v37, %v3462_v44  ;;  %v3409_v37 = vmul.f32 0.5, %v5760_v26  ;;  %v4163_v44 = vld [vmem:[%s5866_s12] ss:$0 sm:$0xff] }
 0xbf9   : > { %v3488_v38 = vsub.f32 1.0, %v3484_v43  ;;  %v3467_v41 = vmul.f32 %v4687_v25, %v3463_v45 }
 0xbfa   : > { %v3489_v59 = vsub.f32 1.0, %v3485_v39  ;;  %v3486_v46 = vmul.f32 %v4693_v55, %v3466_v50 }
 0xbfb   : > { %v3496_v42 = vsub.f32 0.0, %v3488_v38  ;;  %v3487_v51 = vmul.f32 %v4695_v35, %v3467_v41 }
 0xbfc   : > { %v3497_v47 = vsub.f32 0.0, %v3489_v59  ;;  %v3490_v61 = vsub.f32 1.0, %v3486_v46 }
 0xbfd   : > { %v3500_v56 = vsel %vm3492_vm3, %v3488_v38, %v3496_v42  ;;  %v3491_v52 = vsub.f32 1.0, %v3487_v51 }
 0xbfe   : > { %v3504_v62 = vadd.f32 1.0, %v3500_v56  ;;  %v3501_v27 = vsel %vm3493_vm4, %v3489_v59, %v3497_v47  ;;  %v3498_v25 = vsub.f32 0.0, %v3490_v61 }
 0xbff   : > { %v3505_v21 = vadd.f32 1.0, %v3501_v27  ;;  %v3499_v34 = vsub.f32 0.0, %v3491_v52 }
 0xc00   : > { %v3508_v4 = vmul.f32 %v3504_v62, %v3408_v31  ;;  %v3502_v32 = vsel %vm3494_vm5, %v3490_v61, %v3498_v25 }
 0xc01   : > { %v3509_v10 = vmul.f32 %v3505_v21, %v3409_v37  ;;  %v3506_v8 = vadd.f32 1.0, %v3502_v32  ;;  %v3503_v53 = vsel %vm3495_vm6, %v3491_v52, %v3499_v34 }
 0xc02   : > { %v3512_v36 = vpack.c.bf16 %v3508_v4, %v3508_v4  ;;  %v3507_v26 = vadd.f32 1.0, %v3503_v53 }
 0xc03   : > { %v3513_v23 = vpack.c.bf16 %v3509_v10, %v3509_v10  ;;  %v3510_v58 = vmul.f32 %v3506_v8, %v3410_v63 }
 0xc04   : > { %v3511_v29 = vmul.f32 %v3507_v26, %v3411_v49 }
 0xc05   : > { %3804 = vmatprep.mubr.bf16.mxu1 %v3513_v23  ;;  %v3514_v60 = vpack.c.bf16 %v3510_v58, %v3510_v58 }
 0xc06   : > { %3805 = vmatmul.mubr.bf16.vlgmr.msra.gmra.mrb[48].mxu1 %v3512_v36  ;;  %v3515_v30 = vpack.c.bf16 %v3511_v29, %v3511_v29 }
 0xc08   : > { %3844 = vmatprep.mubr.bf16.mxu0 %v3515_v30 }
 0xc09   : > { %3845 = vmatmul.mubr.bf16.vlgmr.msra.gmra.mrb[48].mxu0 %v3514_v60 }
 0xcd9   : > { %v4338_v3 = vpop.f32.mrb[48].mxu1 }
 0xcda   : > { %v4339_v22 = vpop.f32.mrb[49].mxu1 }
 0xcdb   : > { %v4340_v57 = vadd.f32 %v4339_v22, %v4338_v3  ;;  %v4341_v20 = vpop.f32.mrb[50].mxu1 }
 0xcdc   : > { %v4342_v28 = vpop.f32.mrb[51].mxu1  ;;  %v4360_v17 = vpop.f32.mrb[48].mxu0 }
 0xcdd   : > { %v4361_v48 = vpop.f32.mrb[49].mxu0 }
 0xcde   : > { %v4362_v19 = vadd.f32 %v4361_v48, %v4360_v17  ;;  %v4363_v2 = vpop.f32.mrb[50].mxu0 }
 0xcdf   : > { %v4364_v12 = vpop.f32.mrb[51].mxu0 }
 0xce0   : > { %v3847_v7 = vadd.f32 %v4362_v19, %v4340_v57 }
 0xce2   : > { %v3852_v24 = vadd.f32 %v3847_v7, %v5763_v0 }
 0xce4   : > { %v3860_v9 = vadd.f32 %v4161_v6, %v3852_v24 }
 0xce6   : > { %v3861_v14 = vadd.f32 %v3860_v9, %v5066_v1  ;;  %v4162_v1 = vld [vmem:[%s5865_s11] ss:$0 sm:$0xff] }
 0xce8   : > { %v3864_v54 = vsel %vm462_vm1, %v3861_v14, 0.0 }
 0xce9   : > { %3865 = vadd.xlane.f32.xlu1 %v3864_v54 }
 0xd76   : > { %v3866_v11 = vpop.xlane.xlu1 %3865 }
 0xd77   : > { %v3867_v15 = vmul.f32 0.03125, %v3866_v11 }
 0xd79   : > { %v3868_v13 = vsub.f32 %v3861_v14, %v3867_v15 }
 0xd7b   : > { %v3869_v33 = vmul.f32 %v3868_v13, %v3868_v13 }
 0xd7d   : > { %v3870_v16 = vsel %vm462_vm1, %v3869_v33, 0.0  ;;  %vm3892_vm1 = vcmask 257024  }
 0xd7e   : > { %3871 = vadd.xlane.f32.xlu0 %v3870_v16 }
 0xe0b   : > { %v3872_v5 = vpop.xlane.xlu0 %3871 }
 0xe0c   : > { %v3873_v40 = vmul.f32 0.03125, %v3872_v5 }
 0xe0e   : > { %v3874_v43 = vadd.f32 1e-05, %v3873_v40 }
 0xe10   : > { %4696 = vrsqrt.f32 %v3874_v43 }
 0xe1a   : > { %v4697_v0 = vpop.eup %4696 }
 0xe1b   : > { %v3876_v18 = vmul.f32 %v4697_v0, %v3868_v13 }
 0xe1d   : > { %v3883_v39 = vmul.f32 %v4162_v1, %v3876_v18 }
 0xe1f   : > { %v3890_v38 = vadd.f32 %v4163_v44, %v3883_v39 }
 0xe21   : > { %v3891_v45 = vpack.c.bf16 %v3890_v38, %v3890_v38 }
 0xe23   : > { %3893 = vst.msk [vmem:[%s431_s15] sm:$0xf] %vm3892_vm1, %v3891_v45 }
 0xe24   : > { %4711 = shalt.err (!%p4708_p3)
}
 0xe25   : > { %s4712_s2 = scalar_lea.hbm %s5812_s3, 64  ;;  %s4716_s30 = scalar_lea.hbm %s5867_s13, 128 }
 0xe26   : > { %p4713_p4 = scmp.ne.s32.totalorder %s5812_s3, %s4712_s2  ;;  %p4717_p9 = scmp.lt.u32.totalorder %s5812_s3, %s5867_s13 }
 0xe27   : > { %p4718_p10 = scmp.lt.u32.totalorder %s4716_s30, %s4712_s2  ;;  %p4720_p12 = scmp.lt.u32.totalorder %s4712_s2, %s5812_s3 }
 0xe28   : > { %p4714_p7 = pnand %p4713_p4, %p4884_p5 }
 0xe29   : > { %p4719_p11 = por %p4718_p10, %p4717_p9 }
 0xe2a   : > { %p4715_p8 = pneg %p4714_p7 }
 0xe2b   : > { %p4721_p13 = por %p4720_p12, %p4719_p11 }
 0xe2d   : > { %p4722_p0 = pnand %p4721_p13, %p4715_p8 }
 0xe2f   : > { %4725 = shalt.err (!%p4722_p0)
}
 0xe30   : > { %4430 = dma.vmem_to_hbm [thread:$0]  (%p4884_p5), %s5814_s16, 64, %s5812_s3, %s3895_s0  }
 0xe31 PF: > { %p4436_p1 = scmp.ge.s32.totalorder %s4760_s28, 2  ;;  %s3920_s1 = sand.u32 1, %s4748_s25  }
 0xe32   : > { %s3921_s29 = scalar_lea.sflag [#allocation3], %s3920_s1 }
 0xe33   : > { %p4433_p2 = pnand %p4436_p1, %p4888_p6 }
 0xe35   : > { %4743 = dma.done.wait (!%p4433_p2), %s3921_s29, 64  }
 0xe36   : > { %4745 = vsyncadd (!%p4433_p2), %s3921_s29, 4294967232  ;;  %p23_p3 = scmp.ge.s32.totalorder %s4871_s14, 4   ;;  %s5878_s25 = smov %s4752_s26 }
 0xe37   : > { %s5879_s26 = smov %s4756_s27  ;;  %s5880_s27 = smov %s4882_s17 }
 0xe38   : > { %s5881_s28 = smov %s4871_s14  ;;  %25 = sbr.rel (!%p23_p3) target bundleno = 8 (0x8), region = 107 }
 0xe3f   :  { %3926 = vsyncpa [#allocation3], 1 }
 0xe40   :  { %3928 = vsyncpa [#allocation3 + $0x1], 1 }

// kernel: tpu_custom_call.1
= control target key start
LH: loop header
LB: loop body
LE: loop exit
PB: predicated region body
PF: predicated region fallthrough
CT: control target
= control target key end

     0   :  { %s5854_s0 = inlined_call_operand.vmem [shape: f32[2,8,32], index: 0, kind: input, shape index: {}]   ;;  %s5855_s1 = inlined_call_operand.vmem [shape: bf16[32,96], index: 1, kind: input, shape index: {}]   ;;  %s5856_s2 = inlined_call_operand.vmem [shape: f32[1,96], index: 2, kind: input, shape index: {}]   ;;  %s5857_s3 = inlined_call_operand.vmem [shape: bf16[32,32], index: 3, kind: input, shape index: {}]   ;;  %s5858_s4 = inlined_call_operand.vmem [shape: f32[1,32], index: 4, kind: input, shape index: {}]   ;;  %s5859_s5 = inlined_call_operand.vmem [shape: f32[1,32], index: 5, kind: input, shape index: {}]   ;;  %s5860_s6 = inlined_call_operand.vmem [shape: f32[1,32], index: 6, kind: input, shape index: {}]   ;;  %s5861_s7 = inlined_call_operand.vmem [shape: bf16[32,2048], index: 7, kind: input, shape index: {}]   ;;  %s5862_s8 = inlined_call_operand.vmem [shape: f32[1,2048], index: 8, kind: input, shape index: {}]   ;;  %s5863_s9 = inlined_call_operand.vmem [shape: bf16[2048,32], index: 9, kind: input, shape index: {}]   ;;  %s5864_s10 = inlined_call_operand.vmem [shape: f32[1,32], index: 10, kind: input, shape index: {}]   ;;  %s5865_s11 = inlined_call_operand.vmem [shape: f32[1,32], index: 11, kind: input, shape index: {}]   ;;  %s5866_s12 = inlined_call_operand.vmem [shape: f32[1,32], index: 12, kind: input, shape index: {}]   ;;  %s5867_s13 = inlined_call_operand.hbm [shape: bf16[2,8,32], index: 13, kind: output, shape index: {}]  }
   0x1   :  { %5868 = sst [smem:[#allocation5_spill]] %s5854_s0 }
   0x2   :  { %5869 = sst [smem:[#allocation6_spill]] %s5855_s1 }
   0x3   :  { %5870 = sst [smem:[#allocation7_spill]] %s5856_s2 }
   0x4   :  { %5871 = sst [smem:[#allocation8_spill]] %s5857_s3 }
   0x5   :  { %18 = vsyncpa [#allocation3], 0 }
   0x6   :  { %20 = vsyncpa [#allocation3 + $0x1], 0  ;;  %s4846_s25 = smov 0   ;;  %s4848_s26 = smov 0  }
   0x7   :  { %s4850_s27 = smov 0   ;;  %s4852_s28 = smov 0  }
   0x8 LB: > { %s4867_s29 = sadd.s32 4294967295, %s4760_s28   ;;  %s3967_s30 = sadd.s32 4294967294, %s4760_s28   ;;  %s4760_s28 = sphi %s4852_s28, %s5881_s28   ;;  %s4756_s27 = sphi %s4850_s27, %s5880_s27   ;;  %s4752_s26 = sphi %s4848_s26, %s5879_s26   ;;  %s4748_s25 = sphi %s4846_s25, %s5878_s25  }
   0x9   : > { %s4871_s14 = sadd.s32 1, %s4760_s28   ;;  %s311_s15 = sadd.s32 1, %s4756_s27 }
   0xa   : > { %s308_s16 = ssub.s32 %s4760_s28, %s4871_s14  ;;  %p321_p0 = scmp.ne.s32.totalorder %s4756_s27, %s4752_s26 }
   0xb   : > { %p309_p1 = scmp.eq.s32.totalorder %s308_s16, 0  ;;  %p322_p2 = scmp.eq.s32.totalorder %s4867_s29, 1 }
   0xc   : > { %p327_p3 = scmp.ne.s32.totalorder %s4752_s26, %s4748_s25  ;;  %p328_p4 = scmp.eq.s32.totalorder %s3967_s30, 1 }
   0xd   : > { %s4882_s17 = scalar_select %p309_p1, %s4756_s27, %s311_s15  }
   0xe   : > { %p4884_p5 = por %p322_p2, %p321_p0  ;;  %p4888_p6 = por %p328_p4, %p327_p3 }
   0xf   : > { %p3970_p7 = scmp.ge.s32.totalorder %s4760_s28, 1  ;;  %p389_p8 = scmp.lt.s32.totalorder %s4760_s28, 3 }
  0x11   : > { %p390_p9 = pnand %p3970_p7, %p389_p8 }
  0x12   : > { %s5874_s1 = sld [smem:[#allocation6_spill]] (!%p390_p9)  ;;  %v4762_v1 = vmov (!%p390_p9), 0.0   ;;  %vm4763_vm0 = vmmov (!%p390_p9), 0   ;;  %p432_p10 = scmp.lt.s32.totalorder (!%p390_p9), %s4867_s29, 1  ;;  %vm462_vm1 = vcmask (!%p390_p9), 261120   ;;  %vm594_vm2 = vcmask (!%p390_p9), 1043456  }
  0x13   : > { %393 = sbr.rel (%p390_p9) target bundleno = 3633 (0xe31), region = 72  ;;  %4366 = vmatprep.subr.bf16.mxu0 (!%p390_p9), %v4762_v1  ;;  %4374 = vmatprep.subr.bf16.mxu1 (!%p390_p9), %v4762_v1  ;;  %s5875_s0 = sld [smem:[#allocation5_spill]] (!%p390_p9)  ;;  %vm590_vm3 = vcmask (!%p390_p9), 64512   ;;  %vm1361_vm4 = vcmask (!%p390_p9), 130048   ;;  %vm1363_vm5 = vcmask (!%p390_p9), 195584  }
  0x14   : > { %4370 = vmatprep.mubr.msk.bf16.mxu0 (!%p390_p9), %vm4763_vm0, %v4762_v1  ;;  %4376 = vmatprep.mubr.msk.bf16.mxu1 (!%p390_p9), %vm4763_vm0, %v4762_v1  ;;  %s5876_s2 = sld [smem:[#allocation7_spill]] (!%p390_p9)  ;;  %s4764_s23 = smov (!%p390_p9), 104  }
  0x15   : > { %s4767_s15 = smov (!%p390_p9), 112   ;;  %s4768_s16 = smov (!%p390_p9), 64  }
  0x16   : > { %s5877_s3 = sld [smem:[#allocation8_spill]] (!%p390_p9)  ;;  %s429_s21 = sand.u32 (!%p390_p9), 1, %s4752_s26  }
  0x17   : > { %s3971_s22 = sshll.u32 (!%p390_p9), %s429_s21, 2 }
  0x18   : > { %v4482_v0 = vld [vmem:[%s5874_s1] sm:$0xff] (!%p390_p9)   ;;  %v4483_v2 = vld [vmem:[%s5874_s1 + $0x8] sm:$0xff] (!%p390_p9)  }
  0x19   : > { %4367 = vmatpush3.bf16.msra.mxu0 (!%p390_p9), %v4482_v0 }
  0x1a   : > { %4368 = vmatprep.subr.bf16.mxu0 %v4762_v1  ;;  %s433_s24 = scalar_select %p432_p10, %s4867_s29, 1  ;;  %v3973_v5 = vld [vmem:[%s5876_s2] ss:$0 sm:$0xff] }
  0x1c   : > { %s3972_s30 = sshll.u32 %s433_s24, 3  ;;  %s4765_s24 = smov 120  }
  0x1d   : > { %4369 = vmatpush3.bf16.msra.mxu0 %v4483_v2  ;;  %s435_s20 = scalar_lea.vmem %s5875_s0, %s3972_s30  ;;  %s4766_s30 = smov 96  }
  0x1e   : > { %4386 = vmatprep.subr.bf16.mxu0 %v4762_v1  ;;  %v4913_v3 = vld [vmem:[%s435_s20] sm:$0xff]  ;;  %s3895_s0 = scalar_lea.sflag [#allocation3], %s429_s21 }
  0x1f   : > { %v438_v4 = vpack.c.bf16 %v4913_v3, %v4913_v3 }
  0x21   : > { %4371 = vmatmul.mubr.msk.bf16.vlgmr.msra.gmra.mrb[0].mxu0 %vm462_vm1, %v438_v4 }
  0x22   : > { %4388 = vmatprep.mubr.msk.bf16.mxu0 %vm4763_vm0, %v4762_v1 }
  0xf4   : > { %v500_v6 = vpop.f32.mrb[0].mxu0 }
  0xf5   : > { %v501_v7 = vadd.f32 %v3973_v5, %v500_v6  ;;  %v4372_v8 = vpop.f32.mrb[1].mxu0 }
  0xf6   : > { %v503_v9 = vpop.f32.mrb[2].mxu0 }
  0xf7   : > { %v4923_v10 = vpack.c.bf16 %v501_v7, %v501_v7  ;;  %v4373_v11 = vpop.f32.mrb[3].mxu0 }
  0xf9   : > { %512 = vrot.lane.b32.xlu1 %v4923_v10, %s4764_s23  ;;  %508 = vrot.lane.b32.xlu0 %v4923_v10, %s4765_s24  ;;  %s4771_s24 = smov 16  }
  0xfd   : > { %514 = vrot.lane.b32.xlu1 %v4923_v10, %s4766_s30  ;;  %510 = vrot.lane.b32.xlu0 %v4923_v10, %s4767_s15  ;;  %s4773_s15 = smov 24  }
 0x16b   : > { %v4929_v12 = vpop.permute.xlu0 %508  ;;  %v4932_v13 = vpop.permute.xlu1 %512 }
 0x16c   : > { %516 = vrot.lane.b32.xlu0 %v4929_v12, %s4766_s30 }
 0x16f   : > { %v4934_v14 = vpop.permute.xlu0 %510  ;;  %v515_v15 = vpop.permute.xlu1 %514 }
 0x170   : > { %520 = vrot.lane.b32.xlu0 %v4932_v13, %s4766_s30  ;;  %518 = vrot.lane.b32.xlu1 %v4934_v14, %s4766_s30  ;;  %s4772_s30 = smov 8  }
 0x193   : > { %526 = vxpose.xlu1.c.b16.start.end [1/1] (short) (narrow) %v515_v15, 16 }
 0x1de   : > { %v517_v16 = vpop.permute.xlu0 %516 }
 0x1df   : > { %542 = vxpose.xlu0.c.b16.start.end [1/1] (short) (narrow) %v517_v16, 16 }
 0x1e2   : > { %v519_v17 = vpop.permute.xlu1 %518  ;;  %v521_v18 = vpop.permute.xlu0 %520 }
 0x1e3   : > { %558 = vxpose.xlu0.c.b16.start.end [1/1] (short) (narrow) %v519_v17, 16  ;;  %574 = vxpose.xlu1.c.b16.start.end [1/1] (short) (narrow) %v521_v18, 16 }
 0x1f9   : > { %v534_v19 = vpop.trf.xlu1 }
 0x1fa   : > { %v596_v20 = vsel %vm594_vm2, %v534_v19, 0 }
 0x1fb   : > { %4375 = vmatpush3.bf16.msra.mxu1 %v596_v20 }
 0x1fc   : > { %4380 = vmatprep.subr.bf16.mxu1 %v4762_v1 }
 0x1fe   : > { %4377 = vmatmul.mubr.msk.bf16.vlgmr.msra.gmra.mrb[0].mxu1 %vm590_vm3, %v4923_v10 }
 0x1ff   : > { %4382 = vmatprep.mubr.msk.bf16.mxu1 %vm4763_vm0, %v4762_v1 }
 0x245   : > { %v550_v21 = vpop.trf.xlu0 }
 0x246   : > { %v642_v22 = vsel %vm594_vm2, %v550_v21, 0 }
 0x247   : > { %4381 = vmatpush3.bf16.msra.mxu1 %v642_v22 }
 0x248   : > { %4392 = vmatprep.subr.bf16.mxu1 %v4762_v1 }
 0x249   : > { %v566_v23 = vpop.trf.xlu0  ;;  %v582_v24 = vpop.trf.xlu1 }
 0x24a   : > { %v688_v25 = vsel %vm594_vm2, %v566_v23, 0  ;;  %4383 = vmatmul.mubr.msk.bf16.vlgmr.msra.gmra.mrb[4].mxu1 %vm590_vm3, %v4929_v12  ;;  %v734_v26 = vsel %vm594_vm2, %v582_v24, 0 }
 0x24b   : > { %4387 = vmatpush3.bf16.msra.mxu0 %v688_v25  ;;  %4393 = vmatpush3.bf16.msra.mxu1 %v734_v26 }
 0x24c   : > { %4394 = vmatprep.mubr.msk.bf16.mxu1 %vm4763_vm0, %v4762_v1  ;;  %4398 = vmatprep.subr.bf16.mxu0 %v4762_v1 }
 0x24d   : > { %4404 = vmatprep.subr.bf16.mxu1 %v4762_v1 }
 0x24e   : > { %4389 = vmatmul.mubr.msk.bf16.vlgmr.msra.gmra.mrb[4].mxu0 %vm590_vm3, %v4934_v14 }
 0x24f   : > { %4400 = vmatprep.mubr.msk.bf16.mxu0 %vm4763_vm0, %v4762_v1 }
 0x252   : > { %4395 = vmatmul.mubr.msk.bf16.vlgmr.msra.gmra.mrb[8].mxu1 %vm590_vm3, %v4932_v13 }
 0x253   : > { %4406 = vmatprep.mubr.msk.bf16.mxu1 %vm4763_vm0, %v4762_v1 }
 0x2d1   : > { %v632_v27 = vpop.f32.mrb[0].mxu1 }
 0x2d2   : > { %v4378_v28 = vpop.f32.mrb[1].mxu1  ;;  %v776_v29 = vsel %vm590_vm3, %v632_v27, -inf }
 0x2d3   : > { %v635_v30 = vpop.f32.mrb[2].mxu1  ;;  %777 = vmax.xlane.f32.xlu0 %v776_v29 }
 0x2d4   : > { %v4379_v31 = vpop.f32.mrb[3].mxu1 }
 0x31d   : > { %v678_v32 = vpop.f32.mrb[4].mxu1 }
 0x31e   : > { %v4384_v33 = vpop.f32.mrb[5].mxu1  ;;  %v779_v34 = vsel %vm590_vm3, %v678_v32, -inf }
 0x31f   : > { %780 = vmax.xlane.f32.xlu1 %v779_v34  ;;  %v681_v35 = vpop.f32.mrb[6].mxu1 }
 0x320   : > { %v4385_v36 = vpop.f32.mrb[7].mxu1 }
 0x321   : > { %v724_v37 = vpop.f32.mrb[4].mxu0 }
 0x322   : > { %v4390_v38 = vpop.f32.mrb[5].mxu0  ;;  %v782_v39 = vsel %vm590_vm3, %v724_v37, -inf }
 0x323   : > { %783 = vmax.xlane.f32.xlu0 %v782_v39  ;;  %v727_v40 = vpop.f32.mrb[6].mxu0 }
 0x324   : > { %v4391_v41 = vpop.f32.mrb[7].mxu0 }
 0x325   : > { %v770_v42 = vpop.f32.mrb[8].mxu1 }
 0x326   : > { %v4396_v43 = vpop.f32.mrb[9].mxu1  ;;  %v785_v44 = vsel %vm590_vm3, %v770_v42, -inf }
 0x327   : > { %786 = vmax.xlane.f32.xlu1 %v785_v44  ;;  %v773_v45 = vpop.f32.mrb[10].mxu1 }
 0x328   : > { %v4397_v46 = vpop.f32.mrb[11].mxu1 }
 0x338   : > { %826 = vrot.lane.b32.xlu1 %v4929_v12, %s4768_s16 }
 0x339   : > { %824 = vrot.lane.b32.xlu0 %v4923_v10, %s4768_s16 }
 0x360   : > { %v778_v47 = vpop.xlane.xlu0 %777 }
 0x361   : > { %v788_v48 = vsub.f32 %v632_v27, %v778_v47 }
 0x363   : > { %v792_v49 = vmul.f32 1.442695, %v788_v48 }
 0x365   : > { %4614 = vpow2.f32 %v792_v49 }
 0x36f   : > { %v4615_v50 = vpop.eup %4614 }
 0x370   : > { %v800_v51 = vsel %vm590_vm3, %v4615_v50, 0.0 }
 0x371   : > { %801 = vadd.xlane.f32.xlu1 %v800_v51 }
 0x382   : > { %830 = vrot.lane.b32.xlu1 %v4932_v13, %s4768_s16 }
 0x3ac   : > { %v781_v52 = vpop.xlane.xlu1 %780 }
 0x3ad   : > { %v789_v53 = vsub.f32 %v678_v32, %v781_v52  ;;  %v1217_v52 = vlaneseq }
 0x3af   : > { %v794_v54 = vmul.f32 1.442695, %v789_v53  ;;  %v4770_v53 = vmov 1934713408  }
 0x3b0   : > { %v784_v55 = vpop.xlane.xlu0 %783 }
 0x3b1   : > { %4616 = vpow2.f32 %v794_v54  ;;  %v790_v56 = vsub.f32 %v724_v37, %v784_v55  ;;  %v1247_v54 = vunpack.c.l.s4 %v4770_v53 }
 0x3b3   : > { %v796_v57 = vmul.f32 1.442695, %v790_v56  ;;  %v4991_v56 = vshrl.u32 %v1217_v52, 7 }
 0x3b4   : > { %v787_v62 = vpop.xlane.xlu1 %786  ;;  %v825_v12 = vpop.permute.xlu0 %824 }
 0x3b5   : > { %4618 = vpow2.f32 %v796_v57  ;;  %v791_v63 = vsub.f32 %v770_v42, %v787_v62 }
 0x3b7   : > { %v798_v0 = vmul.f32 1.442695, %v791_v63 }
 0x3b8   : > { %v827_v2 = vpop.permute.xlu1 %826 }
 0x3b9   : > { %4620 = vpow2.f32 %v798_v0 }
 0x3bb   : > { %v4617_v58 = vpop.eup %4616 }
 0x3bc   : > { %v803_v59 = vsel %vm590_vm3, %v4617_v58, 0.0 }
 0x3bd   : > { %804 = vadd.xlane.f32.xlu0 %v803_v59  ;;  %v1248_v59 = vunpack.c.0.s8 %v1247_v54 }
 0x3bf   : > { %v4619_v60 = vpop.eup %4618 }
 0x3c0   : > { %v806_v61 = vsel %vm590_vm3, %v4619_v60, 0.0 }
 0x3c1   : > { %807 = vadd.xlane.f32.xlu1 %v806_v61 }
 0x3c3   : > { %v4621_v4 = vpop.eup %4620 }
 0x3c4   : > { %v809_v5 = vsel %vm590_vm3, %v4621_v4, 0.0 }
 0x3d3   : > { %828 = vrot.lane.b32.xlu0 %v4934_v14, %s4768_s16 }
 0x3ee   : > { %852 = vxpose.xlu1.c.b16.start.end [1/1] (short) (narrow) %v827_v2, 16 }
 0x3f2   : > { %810 = vadd.xlane.f32.xlu0 %v809_v5 }
 0x3fe   : > { %v802_v6 = vpop.xlane.xlu1 %801 }
 0x3ff   : > { %4622 = vrcp.f32 %v802_v6 }
 0x402   : > { %v831_v7 = vpop.permute.xlu1 %830 }
 0x403   : > { %884 = vxpose.xlu1.c.b16.start.end [1/1] (short) (narrow) %v831_v7, 16 }
 0x409   : > { %v4623_v8 = vpop.eup %4622 }
 0x40a   : > { %v816_v9 = vmul.f32 %v4623_v8, %v4615_v50  ;;  %v4769_v50 = vmov 1983009808  }
 0x40b   : > { %v1215_v51 = vunpack.c.l.s4 %v4769_v50 }
 0x40c   : > { %v820_v10 = vpack.c.bf16 %v816_v9, %v816_v9 }
 0x40d   : > { %v1216_v55 = vunpack.c.0.s8 %v1215_v51 }
 0x40e   : > { %v904_v11 = vsel %vm590_vm3, %v820_v10, 0 }
 0x40f   : > { %4399 = vmatpush3.bf16.xpose.msra.mxu0 %v904_v11 }
 0x410   : > { %4410 = vmatprep.subr.bf16.mxu0 %v4762_v1 }
 0x41f   : > { %836 = vxpose.xlu0.c.b16.start.end [1/1] (short) (narrow) %v825_v12, 16 }
 0x44a   : > { %v805_v13 = vpop.xlane.xlu0 %804 }
 0x44b   : > { %4624 = vrcp.f32 %v805_v13  ;;  %v4484_v13 = vld [vmem:[%s5877_s3] sm:$0xff]  }
 0x44e   : > { %v829_v14 = vpop.permute.xlu0 %828  ;;  %v808_v19 = vpop.xlane.xlu1 %807 }
 0x44f   : > { %868 = vxpose.xlu0.c.b16.start.end [1/1] (short) (narrow) %v829_v14, 16  ;;  %4626 = vrcp.f32 %v808_v19 }
 0x454   : > { %v860_v20 = vpop.trf.xlu1 }
 0x455   : > { %v4625_v15 = vpop.eup %4624 }
 0x456   : > { %v817_v16 = vmul.f32 %v4625_v15, %v4617_v58 }
 0x458   : > { %v821_v17 = vpack.c.bf16 %v817_v16, %v817_v16 }
 0x459   : > { %v4627_v21 = vpop.eup %4626 }
 0x45a   : > { %v950_v18 = vsel %vm590_vm3, %v821_v17, 0  ;;  %v818_v22 = vmul.f32 %v4627_v21, %v4619_v60  ;;  %v1219_v60 = vsub.s32 %v1216_v55, %v4991_v56 }
 0x45b   : > { %4405 = vmatpush3.bf16.xpose.msra.mxu1 %v950_v18 }
 0x45c   : > { %4416 = vmatprep.subr.bf16.mxu1 %v4762_v1  ;;  %v822_v24 = vpack.c.bf16 %v818_v22, %v818_v22  ;;  %v4485_v22 = vld [vmem:[%s5877_s3 + $0x8] sm:$0xff]  }
 0x45e   : > { %v996_v26 = vsel %vm590_vm3, %v822_v24, 0 }
 0x462   : > { %4407 = vmatmul.mubr.msk.bf16.vlgmr.msra.gmra.mrb[12].mxu1 %vm590_vm3, %v860_v20 }
 0x463   : > { %4418 = vmatprep.mubr.msk.bf16.mxu1 %vm4763_vm0, %v4762_v1 }
 0x469   : > { %v892_v31 = vpop.trf.xlu1 }
 0x47f   : > { %v811_v23 = vpop.xlane.xlu0 %810 }
 0x480   : > { %4628 = vrcp.f32 %v811_v23 }
 0x485   : > { %v844_v25 = vpop.trf.xlu0 }
 0x486   : > { %4401 = vmatmul.mubr.msk.bf16.vlgmr.msra.gmra.mrb[8].mxu0 %vm590_vm3, %v844_v25 }
 0x487   : > { %4411 = vmatpush3.bf16.xpose.msra.mxu0 %v996_v26  ;;  %4412 = vmatprep.mubr.msk.bf16.mxu0 %vm4763_vm0, %v4762_v1 }
 0x488   : > { %4422 = vmatprep.subr.bf16.mxu0 %v4762_v1 }
 0x48a   : > { %v4629_v27 = vpop.eup %4628 }
 0x48b   : > { %v819_v28 = vmul.f32 %v4629_v27, %v4621_v4  ;;  %v1251_v4 = vsub.s32 %v1248_v59, %v4991_v56  ;;  %v1464_v59 = vld [vmem:[%s5861_s7] sm:$0xff] }
 0x48d   : > { %v823_v29 = vpack.c.bf16 %v819_v28, %v819_v28 }
 0x48f   : > { %v1042_v30 = vsel %vm590_vm3, %v823_v29, 0 }
 0x490   : > { %4417 = vmatpush3.bf16.xpose.msra.mxu1 %v1042_v30 }
 0x497   : > { %4419 = vmatmul.mubr.msk.bf16.vlgmr.msra.gmra.mrb[16].mxu1 %vm590_vm3, %v892_v31 }
 0x4b5   : > { %v876_v32 = vpop.trf.xlu0 }
 0x4b6   : > { %4413 = vmatmul.mubr.msk.bf16.vlgmr.msra.gmra.mrb[12].mxu0 %vm590_vm3, %v876_v32 }
 0x4b7   : > { %4426 = vmatprep.mubr.msk.bf16.mxu0 %vm4763_vm0, %v4762_v1  ;;  %4423 = vmatpush3.bf16.msra.mxu0 %v4484_v13  ;;  %v1793_v13 = vld [vmem:[%s5861_s7 + $0x50] sm:$0xff] }
 0x4b8   : > { %4424 = vmatprep.subr.bf16.mxu0 %v4762_v1 }
 0x4bb   : > { %4425 = vmatpush3.bf16.msra.mxu0 %v4485_v22 }
 0x535   : > { %v986_v33 = vpop.f32.mrb[12].mxu1 }
 0x536   : > { %v4408_v34 = vpop.f32.mrb[13].mxu1  ;;  %1116 = vxpose.xlu1.b32.start.end [1/1] (short) (narrow) %v986_v33, 8 }
 0x537   : > { %v989_v35 = vpop.f32.mrb[14].mxu1 }
 0x538   : > { %v4409_v36 = vpop.f32.mrb[15].mxu1 }
 0x559   : > { %v940_v37 = vpop.f32.mrb[8].mxu0 }
 0x55a   : > { %v4402_v38 = vpop.f32.mrb[9].mxu0  ;;  %1084 = vxpose.xlu0.b32.start.end [1/1] (short) (narrow) %v940_v37, 8 }
 0x55b   : > { %v943_v39 = vpop.f32.mrb[10].mxu0 }
 0x55c   : > { %v4403_v40 = vpop.f32.mrb[11].mxu0 }
 0x56a   : > { %v1078_v41 = vpop.f32.mrb[16].mxu1 }
 0x56b   : > { %v4420_v42 = vpop.f32.mrb[17].mxu1 }
 0x56c   : > { %v1081_v43 = vpop.f32.mrb[18].mxu1 }
 0x56d   : > { %v4421_v44 = vpop.f32.mrb[19].mxu1 }
 0x589   : > { %v1032_v45 = vpop.f32.mrb[12].mxu0 }
 0x58a   : > { %1148 = vxpose.xlu0.b32.start.end [1/1] (short) (narrow) %v1032_v45, 8  ;;  %v4414_v46 = vpop.f32.mrb[13].mxu0  ;;  %v3987_v45 = vld [vmem:[%s5858_s4] ss:$0 sm:$0xff] }
 0x58b   : > { %v1035_v47 = vpop.f32.mrb[14].mxu0 }
 0x58c   : > { %v4415_v48 = vpop.f32.mrb[15].mxu0 }
 0x58e   : > { %1180 = vxpose.xlu0.b32.start.end [1/1] (short) (narrow) %v1078_v41, 8 }
 0x5b6   : > { %v1132_v58 = vpop.trf.xlu1 }
 0x5da   : > { %v1100_v49 = vpop.trf.xlu0 }
 0x60a   : > { %v1164_v57 = vpop.trf.xlu0 }
 0x60b   : > { %v1212_v61 = vcombine.low %v1100_v49, %v1164_v57  ;;  %v1213_v62 = vcombine.high %v1100_v49, %v1164_v57 }
 0x60d   : > { %v1220_v5 = vrot.slane %v1212_v61, %v1219_v60  ;;  %v1227_v6 = vrot.slane %v1213_v62, %v1219_v60  ;;  %v1467_v62 = vld [vmem:[%s5861_s7 + $0x48] sm:$0xff] }
 0x60e   : > { %v1196_v63 = vpop.trf.xlu0 }
 0x60f   : > { %v1228_v0 = vcombine.low %v1132_v58, %v1196_v63  ;;  %v1229_v2 = vcombine.high %v1132_v58, %v1196_v63 }
 0x611   : > { %v1236_v7 = vrot.slane %v1228_v0, %v1219_v60  ;;  %v1243_v8 = vrot.slane %v1229_v2, %v1219_v60 }
 0x613   : > { %v1244_v9 = vcombine.low %v1220_v5, %v1236_v7  ;;  %v1245_v10 = vcombine.high %v1220_v5, %v1236_v7  ;;  %v1260_v11 = vcombine.low %v1227_v6, %v1243_v8  ;;  %v1261_v12 = vcombine.high %v1227_v6, %v1243_v8  ;;  %v1470_v5 = vld [vmem:[%s5861_s7 + $0xc0] sm:$0xff]  ;;  %v1469_v6 = vld [vmem:[%s5861_s7 + $0x88] sm:$0xff] }
 0x614   : > { %v1471_v8 = vld [vmem:[%s5861_s7 + $0xc8] sm:$0xff] }
 0x615   : > { %v1252_v14 = vrot.slane %v1244_v9, %v1251_v4  ;;  %v1259_v15 = vrot.slane %v1245_v10, %v1251_v4  ;;  %v1268_v16 = vrot.slane %v1260_v11, %v1251_v4  ;;  %v1275_v17 = vrot.slane %v1261_v12, %v1251_v4  ;;  %v1791_v12 = vld [vmem:[%s5861_s7 + $0x10] sm:$0xff] }
 0x616   : > { %v3999_v10 = vcombine.low %v1469_v6, %v1471_v8  ;;  %v4000_v11 = vcombine.high %v1469_v6, %v1471_v8  ;;  %v4516_v6 = vld [vmem:[%s5863_s9 + $0x138] sm:$0xff]   ;;  %v4518_v8 = vld [vmem:[%s5863_s9 + $0x40] sm:$0xff]  }
 0x617   : > { %v1280_v18 = vcombine.low %v1252_v14, %v1259_v15  ;;  %v3985_v19 = vcombine.high %v1252_v14, %v1259_v15  ;;  %v1296_v20 = vcombine.low %v1268_v16, %v1275_v17  ;;  %v3986_v21 = vcombine.high %v1268_v16, %v1275_v17  ;;  %v1792_v14 = vld [vmem:[%s5861_s7 + $0x18] sm:$0xff] }
 0x618   : > { %v4774_v15 = vmov 0   ;;  %v4004_v16 = vcombine.high %v1791_v12, %v1793_v13  ;;  %v1794_v17 = vld [vmem:[%s5861_s7 + $0x58] sm:$0xff] }
 0x619   : > { %v1287_v23 = vrot.slane %v1280_v18, %v1219_v60  ;;  %v1295_v24 = vrot.slane %v3985_v19, %v1219_v60  ;;  %v1303_v25 = vrot.slane %v1296_v20, %v1219_v60  ;;  %v1311_v26 = vrot.slane %v3986_v21, %v1219_v60  ;;  %v1466_v60 = vld [vmem:[%s5861_s7 + $0x40] sm:$0xff]  ;;  %1569 = vmatprep.mubr.bf16.mxu1 %v4774_v15 }
 0x61a   : > { %v3994_v61 = vcombine.high %v1464_v59, %v1466_v60  ;;  %v3993_v63 = vcombine.low %v1464_v59, %v1466_v60  ;;  %v4003_v18 = vcombine.low %v1791_v12, %v1793_v13  ;;  %v4005_v19 = vcombine.low %v1792_v14, %v1794_v17  ;;  %v4506_v59 = vld [vmem:[%s5863_s9 + $0x168] sm:$0xff]  }
 0x61b   : > { %v1313_v27 = vcombine.high %v1287_v23, %v1295_v24  ;;  %v1329_v28 = vcombine.high %v1303_v25, %v1311_v26  ;;  %v1312_v29 = vcombine.low %v1287_v23, %v1295_v24  ;;  %v1328_v30 = vcombine.low %v1303_v25, %v1311_v26  ;;  %v3991_v25 = vld [vmem:[%s5859_s5] ss:$0 sm:$0xff]  ;;  %v4507_v60 = vld [vmem:[%s5863_s9 + $0x1e8] sm:$0xff]  }
 0x61c   : > { %1537 = vmatprep.subr.bf16.mxu1 %v3994_v61  ;;  %v4006_v20 = vcombine.high %v1792_v14, %v1794_v17  ;;  %v4509_v61 = vld [vmem:[%s5863_s9 + $0x1a8] sm:$0xff]   ;;  %v5191_v12 = vsub.s32 1, %v4991_v56  ;;  %v5194_v13 = vsub.s32 3, %v4991_v56  ;;  %v5197_v14 = vsub.s32 2, %v4991_v56 }
 0x61d   : > { %v1327_v31 = vrot.slane %v1313_v27, %v1251_v4  ;;  %v1343_v32 = vrot.slane %v1329_v28, %v1251_v4  ;;  %v1320_v1 = vrot.slane %v1312_v29, %v1251_v4  ;;  %v1336_v33 = vrot.slane %v1328_v30, %v1251_v4  ;;  %1538 = vmatpush1.bf16.msra.mxu1 %v3993_v63  ;;  %v1468_v4 = vld [vmem:[%s5861_s7 + $0x80] sm:$0xff]  ;;  %v1795_v29 = vld [vmem:[%s5861_s7 + $0x90] sm:$0xff] }
 0x61e   : > { %v3998_v7 = vcombine.high %v1468_v4, %v1470_v5  ;;  %v3997_v9 = vcombine.low %v1468_v4, %v1470_v5  ;;  %v3992_v27 = vld [vmem:[%s5860_s6] ss:$0 sm:$0xff]  ;;  %v1797_v30 = vld [vmem:[%s5861_s7 + $0xd0] sm:$0xff]  ;;  %v4514_v4 = vld [vmem:[%s5863_s9 + $0x178] sm:$0xff]  }
 0x61f   : > { %v1346_v34 = vcombine.low %v1327_v31, %v1343_v32  ;;  %v1345_v35 = vcombine.high %v1320_v1, %v1336_v33  ;;  %v1344_v36 = vcombine.low %v1320_v1, %v1336_v33  ;;  %v1347_v37 = vcombine.high %v1327_v31, %v1343_v32  ;;  %v1796_v31 = vld [vmem:[%s5861_s7 + $0x98] sm:$0xff]  ;;  %v4511_v63 = vld [vmem:[%s5863_s9 + $0x1f0] sm:$0xff]  }
 0x620   : > { %1539 = vmatprep.subr.bf16.mxu1 %v3998_v7  ;;  %v1798_v32 = vld [vmem:[%s5861_s7 + $0xd8] sm:$0xff] }
 0x621   : > { %1353 = vrot.lane.b32.xlu0 %v1346_v34, %s4771_s24  ;;  %1349 = vrot.lane.b32.xlu1 %v1345_v35, %s4772_s30  ;;  %v4008_v34 = vcombine.high %v1795_v29, %v1797_v30  ;;  %v4010_v35 = vcombine.high %v1796_v31, %v1798_v32  ;;  %v4515_v5 = vld [vmem:[%s5863_s9 + $0x1f8] sm:$0xff]   ;;  %s4165_s30 = sshll.u32 %s4867_s29, 6  ;;  %s4775_s29 = smov [#allocation2]  }
 0x622   : > { %1540 = vmatpush1.bf16.msra.mxu1 %v3997_v9  ;;  %v4517_v7 = vld [vmem:[%s5863_s9 + $0x1b8] sm:$0xff]   ;;  %v4519_v9 = vld [vmem:[%s5863_s9 + $0xc0] sm:$0xff]   ;;  %s5812_s3 = scalar_lea.hbm %s5867_s13, %s4165_s30 }
 0x623   : > { %1861 = vmatprep.subr.bf16.mxu1 %v4004_v16 }
 0x625   : > { %1357 = vrot.lane.b32.xlu1 %v1347_v37, %s4773_s15  ;;  %v4009_v37 = vcombine.low %v1796_v31, %v1798_v32  ;;  %s431_s15 = scalar_lea.vmem [#allocation2], %s3971_s22  ;;  %s4702_s22 = sshll.u32 %s4775_s29, 4  ;;  %s4703_s22 = int_to_ptr.vmem [resolvable:$false] %s4702_s22 }
 0x626   : > { %s3908_s16 = sshll.u32 %s431_s15, 4  ;;  %s4704_s23 = scalar_lea.vmem %s4703_s22, 128  ;;  %s5814_s16 = int_to_ptr.vmem [resolvable:$true] %s3908_s16 }
 0x627   : > { %s4698_s1 = scalar_lea.vmem %s5814_s16, 64  ;;  %p4705_p0 = scmp.lt.s32.totalorder %s5814_s16, %s4703_s22 }
 0x628   : > { %p4699_p11 = scmp.ne.s32.totalorder %s5814_s16, %s4698_s1  ;;  %p4706_p1 = scmp.lt.s32.totalorder %s4704_s23, %s4698_s1 }
 0x62a   : > { %p4700_p12 = pnand %p4699_p11, %p4884_p5  ;;  %p4707_p2 = por %p4706_p1, %p4705_p0 }
 0x62c   : > { %p4701_p13 = pneg %p4700_p12 }
 0x62e   : > { %p4708_p3 = pnand %p4707_p2, %p4701_p13 }
 0x693   : > { %v1350_v38 = vpop.permute.xlu1 %1349  ;;  %v1354_v39 = vpop.permute.xlu0 %1353 }
 0x694   : > { %v1360_v40 = vsel %vm590_vm3, %v1344_v36, %v1350_v38  ;;  %v4007_v36 = vcombine.low %v1795_v29, %v1797_v30  ;;  %v4486_v38 = vld [vmem:[%s5863_s9 + $0x140] sm:$0xff]  }
 0x695   : > { %v1362_v42 = vsel %vm1361_vm4, %v1360_v40, %v1354_v39  ;;  %v4487_v39 = vld [vmem:[%s5863_s9 + $0x1c0] sm:$0xff]  }
 0x696   : > { %v4488_v40 = vld [vmem:[%s5863_s9 + $0x100] sm:$0xff]  }
 0x697   : > { %v1358_v41 = vpop.permute.xlu1 %1357  ;;  %v1799_v29 = vld [vmem:[%s5862_s8 + $0x4] sm:$0xf] }
 0x698   : > { %v1364_v43 = vsel %vm1363_vm5, %v1362_v42, %v1358_v41  ;;  %v4489_v41 = vld [vmem:[%s5863_s9 + $0x180] sm:$0xff]   ;;  %v4490_v42 = vld [vmem:[%s5863_s9 + $0x148] sm:$0xff]  }
 0x699   : > { %v1365_v44 = vpack.c.bf16 %v1364_v43, %v1364_v43  ;;  %v4491_v43 = vld [vmem:[%s5863_s9 + $0x1c8] sm:$0xff]  }
 0x69b   : > { %4427 = vmatmul.mubr.msk.bf16.vlgmr.msra.gmra.mrb[16].mxu0 %vm462_vm1, %v1365_v44  ;;  %v4492_v44 = vld [vmem:[%s5863_s9 + $0x108] sm:$0xff]  }
 0x69c   : > { %1610 = vmatprep.mubr.bf16.mxu0 %v4774_v15 }
 0x76e   : > { %v1426_v46 = vpop.f32.mrb[16].mxu0 }
 0x76f   : > { %v1427_v47 = vadd.f32 %v3987_v45, %v1426_v46  ;;  %v4428_v48 = vpop.f32.mrb[17].mxu0  ;;  %v4493_v45 = vld [vmem:[%s5863_s9 + $0x188] sm:$0xff]   ;;  %v4494_v46 = vld [vmem:[%s5863_s9 + $0x150] sm:$0xff]  }
 0x770   : > { %v1429_v49 = vpop.f32.mrb[18].mxu0  ;;  %v4496_v48 = vld [vmem:[%s5863_s9 + $0x110] sm:$0xff]  }
 0x771   : > { %v4429_v50 = vpop.f32.mrb[19].mxu0  ;;  %v1432_v51 = vadd.f32 %v1427_v47, %v4913_v3  ;;  %v1465_v3 = vld [vmem:[%s5861_s7 + $0x8] sm:$0xff]  ;;  %v4495_v47 = vld [vmem:[%s5863_s9 + $0x1d0] sm:$0xff]  }
 0x772   : > { %v3995_v0 = vcombine.low %v1465_v3, %v1467_v62  ;;  %v3996_v2 = vcombine.high %v1465_v3, %v1467_v62  ;;  %v4497_v49 = vld [vmem:[%s5863_s9 + $0x190] sm:$0xff]   ;;  %v4498_v50 = vld [vmem:[%s5863_s9 + $0x158] sm:$0xff]   ;;  %v4508_v3 = vld [vmem:[%s5863_s9 + $0x128] sm:$0xff]  }
 0x773   : > { %v1435_v52 = vsel %vm462_vm1, %v1432_v51, 0.0  ;;  %v4510_v62 = vld [vmem:[%s5863_s9 + $0x170] sm:$0xff]  }
 0x774   : > { %1436 = vadd.xlane.f32.xlu1 %v1435_v52  ;;  %1578 = vmatprep.subr.bf16.mxu0 %v3996_v2  ;;  %v4500_v52 = vld [vmem:[%s5863_s9 + $0x118] sm:$0xff]   ;;  %v4513_v2 = vld [vmem:[%s5863_s9 + $0x1b0] sm:$0xff]  }
 0x775   : > { %1579 = vmatpush1.bf16.msra.mxu0 %v3995_v0  ;;  %v4512_v0 = vld [vmem:[%s5863_s9 + $0x130] sm:$0xff]  }
 0x776   : > { %1580 = vmatprep.subr.bf16.mxu0 %v4000_v11  ;;  %v1472_v11 = vld [vmem:[%s5862_s8] sm:$0xf] }
 0x777   : > { %v1481_v17 = vrot.slane %v1472_v11, %v5191_v12 }
 0x779   : > { %1581 = vmatpush1.bf16.msra.mxu0 %v3999_v10  ;;  %v5185_v10 = vsub.s32 0, %v4991_v56 }
 0x77a   : > { %1902 = vmatprep.subr.bf16.mxu0 %v4006_v20 }
 0x77b   : > { %v1477_v16 = vrot.slane %v1472_v11, %v5185_v10 }
 0x801   : > { %v1437_v53 = vpop.xlane.xlu1 %1436 }
 0x802   : > { %v1439_v54 = vmul.f32 0.03125, %v1437_v53  ;;  %v4501_v53 = vld [vmem:[%s5863_s9 + $0x198] sm:$0xff]  }
 0x804   : > { %v1440_v55 = vsub.f32 %v1432_v51, %v1439_v54  ;;  %v4499_v51 = vld [vmem:[%s5863_s9 + $0x1d8] sm:$0xff]   ;;  %v4502_v54 = vld [vmem:[%s5863_s9 + $0x160] sm:$0xff]  }
 0x806   : > { %v1441_v57 = vmul.f32 %v1440_v55, %v1440_v55 }
 0x808   : > { %v1442_v58 = vsel %vm462_vm1, %v1441_v57, 0.0  ;;  %v4504_v57 = vld [vmem:[%s5863_s9 + $0x120] sm:$0xff]  }
 0x809   : > { %1443 = vadd.xlane.f32.xlu0 %v1442_v58  ;;  %v4505_v58 = vld [vmem:[%s5863_s9 + $0x1a0] sm:$0xff]  }
 0x896   : > { %v1444_v21 = vpop.xlane.xlu0 %1443 }
 0x897   : > { %v1445_v22 = vmul.f32 0.03125, %v1444_v21 }
 0x899   : > { %v1446_v23 = vadd.f32 1e-05, %v1445_v22 }
 0x89b   : > { %4630 = vrsqrt.f32 %v1446_v23 }
 0x8a5   : > { %v4631_v24 = vpop.eup %4630 }
 0x8a6   : > { %v1448_v26 = vmul.f32 %v4631_v24, %v1440_v55  ;;  %v4503_v55 = vld [vmem:[%s5863_s9 + $0x1e0] sm:$0xff]  }
 0x8a8   : > { %v1455_v28 = vmul.f32 %v3991_v25, %v1448_v26 }
 0x8aa   : > { %v5066_v1 = vadd.f32 %v3992_v27, %v1455_v28 }
 0x8ac   : > { %v5070_v33 = vpack.c.bf16 %v5066_v1, %v5066_v1 }
 0x8ae   : > { %4001 = vmatmul.mubr.msk.bf16.vlgmr.msra.gmra.mrb[20].mxu1 %vm462_vm1, %v5070_v33  ;;  %4002 = vmatmul.mubr.msk.bf16.vlgmr.msra.gmra.mrb[20].mxu0 %vm462_vm1, %v5070_v33 }
 0x8af   : > { %1862 = vmatpush1.bf16.msra.mxu1 %v4003_v18  ;;  %1903 = vmatpush1.bf16.msra.mxu0 %v4005_v19  ;;  %v1489_v18 = vrot.slane %v1472_v11, %v5194_v13  ;;  %v1485_v19 = vrot.slane %v1472_v11, %v5197_v14 }
 0x8b0   : > { %1863 = vmatprep.subr.bf16.mxu1 %v4008_v34  ;;  %1904 = vmatprep.subr.bf16.mxu0 %v4010_v35 }
 0x8b1   : > { %1893 = vmatprep.mubr.bf16.mxu1 %v4774_v15  ;;  %1934 = vmatprep.mubr.bf16.mxu0 %v4774_v15 }
 0x8b3   : > { %1864 = vmatpush1.bf16.msra.mxu1 %v4007_v36  ;;  %1905 = vmatpush1.bf16.msra.mxu0 %v4009_v37  ;;  %v1804_v37 = vrot.slane %v1799_v29, %v5185_v10 }
 0x8b4   : > { %4190 = vmatprep.subr.bf16.mxu1 %v4486_v38  ;;  %4212 = vmatprep.subr.bf16.mxu0 %v4487_v39 }
 0x8b6   : > { %4011 = vmatmul.mubr.msk.bf16.vlgmr.msra.gmra.mrb[24].mxu1 %vm462_vm1, %v5070_v33  ;;  %4012 = vmatmul.mubr.msk.bf16.vlgmr.msra.gmra.mrb[24].mxu0 %vm462_vm1, %v5070_v33 }
 0x8b7   : > { %4191 = vmatpush3.bf16.msra.mxu1 %v4488_v40  ;;  %4213 = vmatpush3.bf16.msra.mxu0 %v4489_v41  ;;  %v1812_v40 = vrot.slane %v1799_v29, %v5197_v14 }
 0x8b8   : > { %4192 = vmatprep.subr.bf16.mxu1 %v4490_v42  ;;  %4214 = vmatprep.subr.bf16.mxu0 %v4491_v43 }
 0x8bb   : > { %4193 = vmatpush3.bf16.msra.mxu1 %v4492_v44  ;;  %4215 = vmatpush3.bf16.msra.mxu0 %v4493_v45  ;;  %v1808_v44 = vrot.slane %v1799_v29, %v5191_v12 }
 0x8bc   : > { %4194 = vmatprep.subr.bf16.mxu1 %v4494_v46  ;;  %4216 = vmatprep.subr.bf16.mxu0 %v4495_v47 }
 0x8bf   : > { %4195 = vmatpush3.bf16.msra.mxu1 %v4496_v48  ;;  %4217 = vmatpush3.bf16.msra.mxu0 %v4497_v49 }
 0x8c0   : > { %4196 = vmatprep.subr.bf16.mxu1 %v4498_v50  ;;  %4218 = vmatprep.subr.bf16.mxu0 %v4499_v51  ;;  %v1816_v51 = vrot.slane %v1799_v29, %v5194_v13 }
 0x8c3   : > { %4197 = vmatpush3.bf16.msra.mxu1 %v4500_v52  ;;  %4219 = vmatpush3.bf16.msra.mxu0 %v4501_v53 }
 0x8c4   : > { %4198 = vmatprep.subr.bf16.mxu1 %v4502_v54  ;;  %4220 = vmatprep.subr.bf16.mxu0 %v4503_v55 }
 0x8c7   : > { %4199 = vmatpush3.bf16.msra.mxu1 %v4504_v57  ;;  %4221 = vmatpush3.bf16.msra.mxu0 %v4505_v58 }
 0x8c8   : > { %4200 = vmatprep.subr.bf16.mxu1 %v4506_v59  ;;  %4222 = vmatprep.subr.bf16.mxu0 %v4507_v60 }
 0x8cb   : > { %4201 = vmatpush3.bf16.msra.mxu1 %v4508_v3  ;;  %4223 = vmatpush3.bf16.msra.mxu0 %v4509_v61 }
 0x8cc   : > { %4202 = vmatprep.subr.bf16.mxu1 %v4510_v62  ;;  %4224 = vmatprep.subr.bf16.mxu0 %v4511_v63 }
 0x8cf   : > { %4203 = vmatpush3.bf16.msra.mxu1 %v4512_v0  ;;  %4225 = vmatpush3.bf16.msra.mxu0 %v4513_v2 }
 0x8d0   : > { %4204 = vmatprep.subr.bf16.mxu1 %v4514_v4  ;;  %4226 = vmatprep.subr.bf16.mxu0 %v4515_v5 }
 0x8d3   : > { %4205 = vmatpush3.bf16.msra.mxu1 %v4516_v6  ;;  %4227 = vmatpush3.bf16.msra.mxu0 %v4517_v7 }
 0x8d4   : > { %4234 = vmatprep.subr.bf16.mxu1 %v4518_v8  ;;  %4256 = vmatprep.subr.bf16.mxu0 %v4519_v9 }
 0x981   : > { %v1571_v20 = vpop.f32.mrb[20].mxu1  ;;  %v1612_v21 = vpop.f32.mrb[20].mxu0 }
 0x982   : > { %v5203_v22 = vadd.f32 %v1571_v20, %v1477_v16  ;;  %v1573_v23 = vpop.f32.mrb[21].mxu1  ;;  %v1614_v24 = vpop.f32.mrb[21].mxu0  ;;  %v5209_v28 = vadd.f32 %v1612_v21, %v1485_v19 }
 0x983   : > { %v5205_v25 = vadd.f32 %v1573_v23, %v1481_v17  ;;  %v5207_v26 = vadd.f32 %v1614_v24, %v1489_v18  ;;  %v1575_v56 = vpop.f32.mrb[22].mxu1  ;;  %v1616_v27 = vpop.f32.mrb[22].mxu0 }
 0x984   : > { %v5215_v30 = vmul.f32 0.70710677, %v5203_v22  ;;  %v5226_v36 = vmul.f32 0.70710677, %v5209_v28  ;;  %v1576_v42 = vpop.f32.mrb[23].mxu1  ;;  %v1617_v43 = vpop.f32.mrb[23].mxu0 }
 0x985   : > { %v5218_v31 = vmul.f32 0.70710677, %v5205_v25  ;;  %v5221_v32 = vmul.f32 0.70710677, %v5207_v26 }
 0x986   : > { %v5230_v38 = vand.u32 2147483647, %v5215_v30  ;;  %v5235_v47 = vand.u32 2147483647, %v5226_v36  ;;  %vm1703_vm12 = vcmp.ge.f32.partialorder %v5215_v30, 0.0  ;;  %vm1705_vm13 = vcmp.ge.f32.partialorder %v5226_v36, 0.0 }
 0x987   : > { %v1628_v34 = vand.u32 2147483647, %v5218_v31  ;;  %v1630_v35 = vand.u32 2147483647, %v5221_v32  ;;  %vm1704_vm6 = vcmp.ge.f32.partialorder %v5218_v31, 0.0  ;;  %vm1706_vm7 = vcmp.ge.f32.partialorder %v5221_v32, 0.0 }
 0x988   : > { %v1631_v53 = vmul.f32 0.3275911, %v5230_v38  ;;  %v1633_v63 = vmul.f32 0.3275911, %v5235_v47  ;;  %v4543_v30 = vld [vmem:[%s5863_s9 + $0xf0] sm:$0xff]   ;;  %v2659_v36 = vld [vmem:[%s5861_s7 + $0x20] sm:$0xff] }
 0x989   : > { %v1632_v39 = vmul.f32 0.3275911, %v1628_v34  ;;  %v1634_v41 = vmul.f32 0.3275911, %v1630_v35  ;;  %v1895_v45 = vpop.f32.mrb[24].mxu1  ;;  %v1936_v46 = vpop.f32.mrb[24].mxu0 }
 0x98a   : > { %v5237_v49 = vadd.f32 %v1895_v45, %v1804_v37  ;;  %v1897_v50 = vpop.f32.mrb[25].mxu1  ;;  %v1938_v52 = vpop.f32.mrb[25].mxu0  ;;  %v5241_v54 = vadd.f32 %v1936_v46, %v1812_v40  ;;  %v1635_v4 = vadd.f32 1.0, %v1631_v53  ;;  %v1637_v17 = vadd.f32 1.0, %v1633_v63 }
 0x98b   : > { %v1636_v48 = vadd.f32 1.0, %v1632_v39  ;;  %v1899_v55 = vpop.f32.mrb[26].mxu1  ;;  %v1940_v57 = vpop.f32.mrb[26].mxu0  ;;  %v1638_v58 = vadd.f32 1.0, %v1634_v41  ;;  %v5246_v60 = vadd.f32 %v1897_v50, %v1808_v44  ;;  %v5253_v2 = vadd.f32 %v1938_v52, %v1816_v51 }
 0x98c   : > { %v5244_v59 = vmul.f32 0.70710677, %v5237_v49  ;;  %v1900_v3 = vpop.f32.mrb[27].mxu1  ;;  %v1941_v61 = vpop.f32.mrb[27].mxu0  ;;  %v5249_v62 = vmul.f32 0.70710677, %v5241_v54 }
 0x98d   : > { %4632 = vrcp.f32 %v1636_v48  ;;  %v5257_v6 = vmul.f32 0.70710677, %v5246_v60  ;;  %v5261_v16 = vmul.f32 0.70710677, %v5253_v2  ;;  %v1680_v20 = vsub.f32 0.0, %v1628_v34 }
 0x98e   : > { %v1951_v0 = vand.u32 2147483647, %v5244_v59  ;;  %v1953_v5 = vand.u32 2147483647, %v5249_v62  ;;  %4634 = vrcp.f32 %v1638_v58  ;;  %v1682_v24 = vsub.f32 0.0, %v1630_v35 }
 0x98f   : > { %v1952_v9 = vand.u32 2147483647, %v5257_v6  ;;  %4636 = vrcp.f32 %v1635_v4  ;;  %v1954_v21 = vand.u32 2147483647, %v5261_v16  ;;  %v1684_v29 = vmul.f32 %v1680_v20, %v1628_v34 }
 0x990   : > { %v1955_v7 = vmul.f32 0.3275911, %v1951_v0  ;;  %v1957_v8 = vmul.f32 0.3275911, %v1953_v5  ;;  %v2003_v39 = vsub.f32 0.0, %v1951_v0  ;;  %v1686_v42 = vmul.f32 %v1682_v24, %v1630_v35 }
 0x991   : > { %v1956_v19 = vmul.f32 0.3275911, %v1952_v9  ;;  %v1958_v56 = vmul.f32 0.3275911, %v1954_v21  ;;  %v2005_v43 = vsub.f32 0.0, %v1953_v5  ;;  %v2004_v46 = vsub.f32 0.0, %v1952_v9 }
 0x992   : > { %v1959_v11 = vadd.f32 1.0, %v1955_v7  ;;  %v1961_v18 = vadd.f32 1.0, %v1957_v8  ;;  %v1689_v45 = vmul.f32 1.442695, %v1684_v29  ;;  %v2007_v51 = vmul.f32 %v2003_v39, %v1951_v0 }
 0x993   : > { %v1960_v23 = vadd.f32 1.0, %v1956_v19  ;;  %v1962_v37 = vadd.f32 1.0, %v1958_v56  ;;  %v1693_v53 = vmul.f32 1.442695, %v1686_v42  ;;  %v2009_v58 = vmul.f32 %v2005_v43, %v1953_v5 }
 0x994   : > { %4638 = vrcp.f32 %v1959_v11  ;;  %v2008_v63 = vmul.f32 %v2004_v46, %v1952_v9  ;;  %v2011_v8 = vmul.f32 1.442695, %v2007_v51  ;;  %v2006_v11 = vsub.f32 0.0, %v1954_v21 }
 0x995   : > { %4640 = vrcp.f32 %v1961_v18  ;;  %v2015_v24 = vmul.f32 1.442695, %v2009_v58  ;;  %vm2027_vm8 = vcmp.ge.f32.partialorder %v5244_v59, 0.0  ;;  %vm2029_vm9 = vcmp.ge.f32.partialorder %v5249_v62, 0.0 }
 0x996   : > { %4642 = vrcp.f32 %v1637_v17  ;;  %v2013_v39 = vmul.f32 1.442695, %v2008_v63  ;;  %vm2028_vm10 = vcmp.ge.f32.partialorder %v5257_v6, 0.0  ;;  %v1943_v31 = vmul.f32 0.5, %v5237_v49 }
 0x997   : > { %v5264_v27 = vpop.eup %4632  ;;  %4644 = vrcp.f32 %v1960_v23  ;;  %v1944_v6 = vmul.f32 0.5, %v5246_v60  ;;  %vm2030_vm11 = vcmp.ge.f32.partialorder %v5261_v16, 0.0  ;;  %v1622_v49 = vmul.f32 0.5, %v5207_v26 }
 0x998   : > { %v1644_v40 = vmul.f32 1.0614054, %v5264_v27  ;;  %v5267_v41 = vpop.eup %4634  ;;  %4646 = vrcp.f32 %v1962_v37 }
 0x999   : > { %v1646_v48 = vmul.f32 1.0614054, %v5267_v41  ;;  %v5270_v50 = vpop.eup %4636  ;;  %4648 = vpow2.f32 %v1689_v45 }
 0x99a   : > { %v1648_v44 = vadd.f32 -1.4531521, %v1644_v40  ;;  %v1643_v19 = vmul.f32 1.0614054, %v5270_v50  ;;  %4650 = vpow2.f32 %v1693_v53 }
 0x99b   : > { %v1650_v55 = vadd.f32 -1.4531521, %v1646_v48  ;;  %4652 = vpow2.f32 %v2011_v8 }
 0x99c   : > { %v1652_v34 = vmul.f32 %v5264_v27, %v1648_v44  ;;  %v2010_v44 = vmul.f32 %v2006_v11, %v1954_v21  ;;  %4654 = vpow2.f32 %v2015_v24  ;;  %v1647_v58 = vadd.f32 -1.4531521, %v1643_v19 }
 0x99d   : > { %v1654_v4 = vmul.f32 %v5267_v41, %v1650_v55  ;;  %4656 = vpow2.f32 %v2013_v39 }
 0x99e   : > { %v5273_v52 = vpop.eup %4638  ;;  %v1656_v3 = vadd.f32 1.4214138, %v1652_v34  ;;  %v1651_v39 = vmul.f32 %v5270_v50, %v1647_v58 }
 0x99f   : > { %v5275_v57 = vpop.eup %4640  ;;  %v1967_v35 = vmul.f32 1.0614054, %v5273_v52  ;;  %v1658_v20 = vadd.f32 1.4214138, %v1654_v4  ;;  %v2017_v4 = vmul.f32 1.442695, %v2010_v44 }
 0x9a0   : > { %v1969_v61 = vmul.f32 1.0614054, %v5275_v57  ;;  %v5280_v7 = vpop.eup %4642  ;;  %v1660_v17 = vmul.f32 %v5264_v27, %v1656_v3 }
 0x9a1   : > { %v1971_v0 = vadd.f32 -1.4531521, %v1967_v35  ;;  %v5283_v18 = vpop.eup %4644  ;;  %v1645_v29 = vmul.f32 1.0614054, %v5280_v7  ;;  %v1662_v40 = vmul.f32 %v5267_v41, %v1658_v20  ;;  %4658 = vpow2.f32 %v2017_v4 }
 0x9a2   : > { %v1973_v5 = vadd.f32 -1.4531521, %v1969_v61  ;;  %v1968_v9 = vmul.f32 1.0614054, %v5283_v18  ;;  %v1664_v56 = vadd.f32 -0.28449672, %v1660_v17  ;;  %v5291_v42 = vpop.eup %4646 }
 0x9a3   : > { %v1975_v23 = vmul.f32 %v5273_v52, %v1971_v0  ;;  %v1970_v51 = vmul.f32 1.0614054, %v5291_v42  ;;  %v1666_v34 = vadd.f32 -0.28449672, %v1662_v40  ;;  %v4649_v11 = vpop.eup %4648 }
 0x9a4   : > { %v1977_v37 = vmul.f32 %v5275_v57, %v1973_v5  ;;  %v1972_v45 = vadd.f32 -1.4531521, %v1968_v9  ;;  %v1668_v46 = vmul.f32 %v5264_v27, %v1664_v56  ;;  %v4651_v9 = vpop.eup %4650 }
 0x9a5   : > { %v1979_v43 = vadd.f32 1.4214138, %v1975_v23  ;;  %v1974_v61 = vadd.f32 -1.4531521, %v1970_v51  ;;  %v1670_v21 = vmul.f32 %v5267_v41, %v1666_v34 }
 0x9a6   : > { %v1981_v48 = vadd.f32 1.4214138, %v1977_v37  ;;  %v1976_v55 = vmul.f32 %v5283_v18, %v1972_v45  ;;  %v1672_v35 = vadd.f32 0.2548296, %v1668_v46 }
 0x9a7   : > { %v1983_v53 = vmul.f32 %v5273_v52, %v1979_v43  ;;  %v1978_v5 = vmul.f32 %v5291_v42, %v1974_v61  ;;  %v1674_v20 = vadd.f32 0.2548296, %v1670_v21  ;;  %v1649_v43 = vadd.f32 -1.4531521, %v1645_v29 }
 0x9a8   : > { %v1985_v3 = vmul.f32 %v5275_v57, %v1981_v48  ;;  %v1980_v0 = vadd.f32 1.4214138, %v1976_v55  ;;  %v1676_v8 = vmul.f32 %v5264_v27, %v1672_v35  ;;  %v5308_v48 = vmul.f32 0.5, %v5205_v25  ;;  %v4653_v55 = vpop.eup %4652 }
 0x9a9   : > { %v1987_v63 = vadd.f32 -0.28449672, %v1983_v53  ;;  %v1982_v37 = vadd.f32 1.4214138, %v1978_v5  ;;  %v1678_v40 = vmul.f32 %v5267_v41, %v1674_v20  ;;  %v1679_v41 = vsub.f32 0.0, %v5230_v38  ;;  %v4655_v61 = vpop.eup %4654 }
 0x9aa   : > { %v1989_v17 = vadd.f32 -0.28449672, %v1985_v3  ;;  %v1984_v19 = vmul.f32 %v5283_v18, %v1980_v0  ;;  %v1696_v24 = vmul.f32 %v4649_v11, %v1676_v8  ;;  %v1653_v58 = vmul.f32 %v5280_v7, %v1649_v43  ;;  %v4657_v5 = vpop.eup %4656 }
 0x9ab   : > { %v1991_v23 = vmul.f32 %v5273_v52, %v1987_v63  ;;  %v1986_v46 = vmul.f32 %v5291_v42, %v1982_v37  ;;  %v1698_v3 = vmul.f32 %v4651_v9, %v1678_v40  ;;  %v1655_v63 = vadd.f32 1.4214138, %v1651_v39 }
 0x9ac   : > { %v1993_v56 = vmul.f32 %v5275_v57, %v1989_v17  ;;  %v1988_v27 = vadd.f32 -0.28449672, %v1984_v19  ;;  %v1700_v53 = vsub.f32 1.0, %v1696_v24  ;;  %v1683_v20 = vmul.f32 %v1679_v41, %v5230_v38 }
 0x9ad   : > { %v1995_v44 = vadd.f32 0.2548296, %v1991_v23  ;;  %v1990_v35 = vadd.f32 -0.28449672, %v1986_v46  ;;  %v1657_v24 = vadd.f32 1.4214138, %v1653_v58  ;;  %v1659_v37 = vmul.f32 %v5270_v50, %v1655_v63 }
 0x9ae   : > { %v1997_v45 = vadd.f32 0.2548296, %v1993_v56  ;;  %v1992_v34 = vmul.f32 %v5283_v18, %v1988_v27  ;;  %v1708_v17 = vsub.f32 0.0, %v1700_v53  ;;  %v1687_v46 = vmul.f32 1.442695, %v1683_v20 }
 0x9af   : > { %v1999_v51 = vmul.f32 %v5273_v52, %v1995_v44  ;;  %v1681_v52 = vsub.f32 0.0, %v5235_v47  ;;  %v1994_v0 = vmul.f32 %v5291_v42, %v1990_v35  ;;  %v4659_v44 = vpop.eup %4658  ;;  %v1663_v41 = vadd.f32 -0.28449672, %v1659_v37  ;;  %v4524_v37 = vld [vmem:[%s5863_s9 + $0x8] sm:$0xff]  }
 0x9b0   : > { %v2001_v29 = vmul.f32 %v5275_v57, %v1997_v45  ;;  %v1996_v25 = vadd.f32 0.2548296, %v1992_v34  ;;  %v1702_v57 = vsub.f32 1.0, %v1698_v3  ;;  %v1712_v45 = vsel %vm1704_vm6, %v1700_v53, %v1708_v17 }
 0x9b1   : > { %v2019_v21 = vmul.f32 %v4653_v55, %v1999_v51  ;;  %v1998_v19 = vadd.f32 0.2548296, %v1994_v0  ;;  %v1685_v27 = vmul.f32 %v1681_v52, %v5235_v47  ;;  %v1661_v51 = vmul.f32 %v5280_v7, %v1657_v24  ;;  %v4521_v24 = vld [vmem:[%s5863_s9 + $0x80] sm:$0xff]  }
 0x9b2   : > { %v2021_v4 = vmul.f32 %v4655_v61, %v2001_v29  ;;  %v2000_v11 = vmul.f32 %v5283_v18, %v1996_v25  ;;  %v1710_v18 = vsub.f32 0.0, %v1702_v57  ;;  %v1716_v35 = vadd.f32 1.0, %v1712_v45 }
 0x9b3   : > { %v2023_v8 = vsub.f32 1.0, %v2019_v21  ;;  %v2002_v43 = vmul.f32 %v5291_v42, %v1998_v19  ;;  %v1691_v3 = vmul.f32 1.442695, %v1685_v27  ;;  %v1945_v53 = vmul.f32 0.5, %v5241_v54  ;;  %v4525_v27 = vld [vmem:[%s5863_s9 + $0x88] sm:$0xff]  }
 0x9b4   : > { %v2025_v23 = vsub.f32 1.0, %v2021_v4  ;;  %v2020_v56 = vmul.f32 %v4657_v5, %v2000_v11  ;;  %v1714_v47 = vsel %vm1706_vm7, %v1702_v57, %v1710_v18  ;;  %v1665_v25 = vadd.f32 -0.28449672, %v1661_v51  ;;  %v4520_v57 = vld [vmem:[%s5863_s9] sm:$0xff]   ;;  %v4526_v18 = vld [vmem:[%s5863_s9 + $0x50] sm:$0xff]  }
 0x9b5   : > { %v2031_v9 = vsub.f32 0.0, %v2023_v8  ;;  %v2022_v59 = vmul.f32 %v4659_v44, %v2002_v43  ;;  %v1718_v52 = vadd.f32 1.0, %v1714_v47  ;;  %v1667_v4 = vmul.f32 %v5270_v50, %v1663_v41  ;;  %v4529_v51 = vld [vmem:[%s5863_s9 + $0x90] sm:$0xff]   ;;  %v4534_v41 = vld [vmem:[%s5863_s9 + $0x60] sm:$0xff]  }
 0x9b6   : > { %v2033_v40 = vsub.f32 0.0, %v2025_v23  ;;  %v2024_v38 = vsub.f32 1.0, %v2020_v56  ;;  %4660 = vpow2.f32 %v1687_v46  ;;  %v1946_v54 = vmul.f32 0.5, %v5253_v2  ;;  %v4523_v56 = vld [vmem:[%s5863_s9 + $0xc8] sm:$0xff]   ;;  %v4530_v46 = vld [vmem:[%s5863_s9 + $0x58] sm:$0xff]   ;;  %v4535_v47 = vld [vmem:[%s5863_s9 + $0xe0] sm:$0xff]  }
 0x9b7   : > { %v2035_v39 = vsel %vm2027_vm8, %v2023_v8, %v2031_v9  ;;  %v2026_v29 = vsub.f32 1.0, %v2022_v59  ;;  %v1720_v8 = vmul.f32 %v1716_v35, %v5308_v48  ;;  %v1669_v16 = vmul.f32 %v5280_v7, %v1665_v25  ;;  %v4522_v48 = vld [vmem:[%s5863_s9 + $0x48] sm:$0xff]   ;;  %v4533_v35 = vld [vmem:[%s5863_s9 + $0x98] sm:$0xff]   ;;  %v4542_v25 = vld [vmem:[%s5863_s9 + $0x70] sm:$0xff]  }
 0x9b8   : > { %v2039_v34 = vadd.f32 1.0, %v2035_v39  ;;  %v2037_v55 = vsel %vm2029_vm9, %v2025_v23, %v2033_v40  ;;  %v2032_v42 = vsub.f32 0.0, %v2024_v38  ;;  %v1722_v23 = vmul.f32 %v1718_v52, %v1622_v49  ;;  %v4527_v39 = vld [vmem:[%s5863_s9 + $0xd0] sm:$0xff]   ;;  %v4541_v52 = vld [vmem:[%s5863_s9 + $0xa8] sm:$0xff]   ;;  %v2661_v49 = vld [vmem:[%s5861_s7 + $0x60] sm:$0xff] }
 0x9b9   : > { %v2041_v61 = vadd.f32 1.0, %v2037_v55  ;;  %v2034_v21 = vsub.f32 0.0, %v2026_v29  ;;  %v1671_v19 = vadd.f32 0.2548296, %v1667_v4  ;;  %4662 = vpow2.f32 %v1691_v3  ;;  %v4531_v55 = vld [vmem:[%s5863_s9 + $0xd8] sm:$0xff]   ;;  %v4536_v3 = vld [vmem:[%s5863_s9 + $0x20] sm:$0xff]  }
 0x9ba   : > { %v2036_v62 = vsel %vm2028_vm10, %v2024_v38, %v2032_v42  ;;  %v2043_v63 = vmul.f32 %v2039_v34, %v1943_v31  ;;  %v1724_v26 = vpack.c.bf16 %v1720_v8, %v1720_v8  ;;  %v1673_v40 = vadd.f32 0.2548296, %v1669_v16  ;;  %v4528_v38 = vld [vmem:[%s5863_s9 + $0x10] sm:$0xff]   ;;  %v4546_v8 = vld [vmem:[%s5863_s9 + $0x78] sm:$0xff]  }
 0x9bb   : > { %v2040_v58 = vadd.f32 1.0, %v2036_v62  ;;  %v2038_v0 = vsel %vm2030_vm11, %v2026_v29, %v2034_v21  ;;  %v2045_v60 = vmul.f32 %v2041_v61, %v1945_v53  ;;  %v1726_v43 = vpack.c.bf16 %v1722_v23, %v1722_v23  ;;  %v4538_v53 = vld [vmem:[%s5863_s9 + $0x68] sm:$0xff]   ;;  %v4537_v61 = vld [vmem:[%s5863_s9 + $0xa0] sm:$0xff]   ;;  %v4544_v4 = vld [vmem:[%s5863_s9 + $0x30] sm:$0xff]  }
 0x9bc   : > { %v2042_v11 = vadd.f32 1.0, %v2038_v0  ;;  %v2047_v5 = vpack.c.bf16 %v2043_v63, %v2043_v63  ;;  %v1675_v44 = vmul.f32 %v5270_v50, %v1671_v19  ;;  %v1677_v50 = vmul.f32 %v5280_v7, %v1673_v40  ;;  %v4532_v7 = vld [vmem:[%s5863_s9 + $0x18] sm:$0xff]   ;;  %v2665_v19 = vld [vmem:[%s5861_s7 + $0xe0] sm:$0xff]  ;;  %v2666_v40 = vld [vmem:[%s5861_s7 + $0xe8] sm:$0xff] }
 0x9bd   : > { %v2044_v32 = vmul.f32 %v2040_v58, %v1944_v6  ;;  %v2049_v9 = vpack.c.bf16 %v2045_v60, %v2045_v60  ;;  %v4539_v6 = vld [vmem:[%s5863_s9 + $0xe8] sm:$0xff]   ;;  %v1621_v23 = vmul.f32 0.5, %v5209_v28 }
 0x9be   : > { %v2046_v20 = vmul.f32 %v2042_v11, %v1946_v54  ;;  %v4540_v58 = vld [vmem:[%s5863_s9 + $0x28] sm:$0xff]   ;;  %v1619_v54 = vmul.f32 0.5, %v5203_v22  ;;  %v4545_v11 = vld [vmem:[%s5863_s9 + $0xb0] sm:$0xff]  }
 0x9bf   : > { %v2048_v17 = vpack.c.bf16 %v2044_v32, %v2044_v32  ;;  %v2660_v22 = vld [vmem:[%s5861_s7 + $0x28] sm:$0xff] }
 0x9c0   : > { %v2050_v2 = vpack.c.bf16 %v2046_v20, %v2046_v20  ;;  %v4661_v45 = vpop.eup %4660  ;;  %v2662_v20 = vld [vmem:[%s5861_s7 + $0x68] sm:$0xff] }
 0x9c1   : > { %2339 = vmatprep.mubr.bf16.mxu1 %v2048_v17  ;;  %v1695_v59 = vmul.f32 %v4661_v45, %v1675_v44  ;;  %v4547_v17 = vld [vmem:[%s5863_s9 + $0xf8] sm:$0xff]   ;;  %v4551_v45 = vld [vmem:[%s5863_s9 + $0x2c0] sm:$0xff]  }
 0x9c2   : > { %2340 = vmatmul.mubr.bf16.vlgmr.msra.gmra.mrb[28].mxu1 %v2047_v5  ;;  %2379 = vmatprep.mubr.bf16.mxu0 %v2050_v2  ;;  %v4078_v5 = vcombine.high %v2659_v36, %v2661_v49 }
 0x9c3   : > { %4235 = vmatpush3.bf16.msra.mxu1 %v4520_v57  ;;  %2611 = vmatprep.mubr.bf16.mxu1 %v1724_v26  ;;  %v4663_v34 = vpop.eup %4662  ;;  %v1699_v29 = vsub.f32 1.0, %v1695_v59  ;;  %v4548_v57 = vld [vmem:[%s5863_s9 + $0x38] sm:$0xff]   ;;  %v4554_v59 = vld [vmem:[%s5863_s9 + $0x248] sm:$0xff]  }
 0x9c4   : > { %4236 = vmatprep.subr.bf16.mxu1 %v4522_v48  ;;  %2380 = vmatmul.mubr.bf16.vlgmr.msra.gmra.mrb[28].mxu0 %v2049_v9  ;;  %v1697_v42 = vmul.f32 %v4663_v34, %v1677_v50  ;;  %v2663_v48 = vld [vmem:[%s5861_s7 + $0xa0] sm:$0xff]  ;;  %v4549_v26 = vld [vmem:[%s5863_s9 + $0xb8] sm:$0xff]   ;;  %v4080_v9 = vcombine.high %v2660_v22, %v2662_v20  ;;  %v4556_v34 = vld [vmem:[%s5863_s9 + $0x208] sm:$0xff]  }
 0x9c5   : > { %4257 = vmatpush3.bf16.msra.mxu0 %v4521_v24  ;;  %2651 = vmatprep.mubr.bf16.mxu0 %v1726_v43  ;;  %v1707_v62 = vsub.f32 0.0, %v1699_v29  ;;  %v4077_v24 = vcombine.low %v2659_v36, %v2661_v49  ;;  %v4082_v28 = vcombine.high %v2663_v48, %v2665_v19  ;;  %v4079_v43 = vcombine.low %v2660_v22, %v2662_v20  ;;  %v4552_v50 = vld [vmem:[%s5863_s9 + $0x200] sm:$0xff]   ;;  %v4580_v36 = vld [vmem:[%s5863_s9 + $0x238] sm:$0xff]  }
 0x9c6   : > { %4258 = vmatprep.subr.bf16.mxu0 %v4523_v56  ;;  %v1701_v31 = vsub.f32 1.0, %v1697_v42  ;;  %v4081_v44 = vcombine.low %v2663_v48, %v2665_v19  ;;  %v4559_v42 = vld [vmem:[%s5863_s9 + $0x2d0] sm:$0xff]   ;;  %v4581_v49 = vld [vmem:[%s5863_s9 + $0x2b8] sm:$0xff]  }
 0x9c7   : > { %4237 = vmatpush3.bf16.msra.mxu1 %v4524_v37  ;;  %v1711_v63 = vsel %vm1703_vm12, %v1699_v29, %v1707_v62  ;;  %v2664_v37 = vld [vmem:[%s5861_s7 + $0xa8] sm:$0xff]  ;;  %v4561_v29 = vld [vmem:[%s5863_s9 + $0x290] sm:$0xff]   ;;  %v4567_v62 = vld [vmem:[%s5863_s9 + $0x2e0] sm:$0xff]  }
 0x9c8   : > { %4238 = vmatprep.subr.bf16.mxu1 %v4526_v18  ;;  %v1709_v21 = vsub.f32 0.0, %v1701_v31  ;;  %v1715_v32 = vadd.f32 1.0, %v1711_v63  ;;  %v4573_v63 = vld [vmem:[%s5863_s9 + $0x2a8] sm:$0xff]  }
 0x9c9   : > { %4259 = vmatpush3.bf16.msra.mxu0 %v4525_v27  ;;  %v4084_v27 = vcombine.high %v2664_v37, %v2666_v40 }
 0x9ca   : > { %4260 = vmatprep.subr.bf16.mxu0 %v4527_v39  ;;  %v1713_v0 = vsel %vm1705_vm13, %v1701_v31, %v1709_v21  ;;  %v1719_v16 = vmul.f32 %v1715_v32, %v1619_v54  ;;  %v4083_v39 = vcombine.low %v2664_v37, %v2666_v40  ;;  %v4565_v31 = vld [vmem:[%s5863_s9 + $0x298] sm:$0xff]   ;;  %v4571_v21 = vld [vmem:[%s5863_s9 + $0x2e8] sm:$0xff]   ;;  %v4577_v32 = vld [vmem:[%s5863_s9 + $0x2b0] sm:$0xff]  }
 0x9cb   : > { %4239 = vmatpush3.bf16.msra.mxu1 %v4528_v38  ;;  %v1717_v60 = vadd.f32 1.0, %v1713_v0  ;;  %v4550_v38 = vld [vmem:[%s5863_s9 + $0x240] sm:$0xff]   ;;  %v4578_v0 = vld [vmem:[%s5863_s9 + $0x278] sm:$0xff]   ;;  %v5566_v54 = vld [vmem:[%s5861_s7 + $0x30] sm:$0xff] }
 0x9cc   : > { %4240 = vmatprep.subr.bf16.mxu1 %v4530_v46  ;;  %v1723_v56 = vpack.c.bf16 %v1719_v16, %v1719_v16  ;;  %v4553_v46 = vld [vmem:[%s5863_s9 + $0x280] sm:$0xff]  }
 0x9cd   : > { %4261 = vmatpush3.bf16.msra.mxu0 %v4529_v51  ;;  %v1721_v2 = vmul.f32 %v1717_v60, %v1621_v23  ;;  %v4555_v51 = vld [vmem:[%s5863_s9 + $0x2c8] sm:$0xff]   ;;  %v5576_v60 = vld [vmem:[%s5861_s7 + $0x38] sm:$0xff] }
 0x9ce   : > { %4262 = vmatprep.subr.bf16.mxu0 %v4531_v55  ;;  %v4557_v55 = vld [vmem:[%s5863_s9 + $0x288] sm:$0xff]  }
 0x9cf   : > { %4241 = vmatpush3.bf16.msra.mxu1 %v4532_v7  ;;  %v1725_v18 = vpack.c.bf16 %v1721_v2, %v1721_v2  ;;  %v4558_v7 = vld [vmem:[%s5863_s9 + $0x250] sm:$0xff]  }
 0x9d0   : > { %4242 = vmatprep.subr.bf16.mxu1 %v4534_v41  ;;  %v4560_v41 = vld [vmem:[%s5863_s9 + $0x210] sm:$0xff]  }
 0x9d1   : > { %4263 = vmatpush3.bf16.msra.mxu0 %v4533_v35  ;;  %v4562_v35 = vld [vmem:[%s5863_s9 + $0x258] sm:$0xff]  }
 0x9d2   : > { %4264 = vmatprep.subr.bf16.mxu0 %v4535_v47  ;;  %v4563_v47 = vld [vmem:[%s5863_s9 + $0x2d8] sm:$0xff]  }
 0x9d3   : > { %4243 = vmatpush3.bf16.msra.mxu1 %v4536_v3  ;;  %v4564_v3 = vld [vmem:[%s5863_s9 + $0x218] sm:$0xff]  }
 0x9d4   : > { %4244 = vmatprep.subr.bf16.mxu1 %v4538_v53  ;;  %v4566_v53 = vld [vmem:[%s5863_s9 + $0x260] sm:$0xff]  }
 0x9d5   : > { %4265 = vmatpush3.bf16.msra.mxu0 %v4537_v61  ;;  %v4568_v61 = vld [vmem:[%s5863_s9 + $0x220] sm:$0xff]  }
 0x9d6   : > { %4266 = vmatprep.subr.bf16.mxu0 %v4539_v6  ;;  %v4569_v6 = vld [vmem:[%s5863_s9 + $0x2a0] sm:$0xff]  }
 0x9d7   : > { %4245 = vmatpush3.bf16.msra.mxu1 %v4540_v58  ;;  %v4570_v58 = vld [vmem:[%s5863_s9 + $0x268] sm:$0xff]  }
 0x9d8   : > { %4246 = vmatprep.subr.bf16.mxu1 %v4542_v25  ;;  %v4572_v25 = vld [vmem:[%s5863_s9 + $0x228] sm:$0xff]  }
 0x9d9   : > { %4267 = vmatpush3.bf16.msra.mxu0 %v4541_v52  ;;  %v4574_v52 = vld [vmem:[%s5863_s9 + $0x270] sm:$0xff]  }
 0x9da   : > { %4268 = vmatprep.subr.bf16.mxu0 %v4543_v30  ;;  %v4575_v30 = vld [vmem:[%s5863_s9 + $0x2f0] sm:$0xff]  }
 0x9db   : > { %4247 = vmatpush3.bf16.msra.mxu1 %v4544_v4  ;;  %v4576_v4 = vld [vmem:[%s5863_s9 + $0x230] sm:$0xff]  }
 0x9dc   : > { %4248 = vmatprep.subr.bf16.mxu1 %v4546_v8  ;;  %v4579_v8 = vld [vmem:[%s5863_s9 + $0x2f8] sm:$0xff]  }
 0x9dd   : > { %4269 = vmatpush3.bf16.msra.mxu0 %v4545_v11  ;;  %v5571_v11 = vld [vmem:[%s5861_s7 + $0x70] sm:$0xff] }
 0x9de   : > { %4270 = vmatprep.subr.bf16.mxu0 %v4547_v17  ;;  %v4120_v17 = vcombine.high %v5566_v54, %v5571_v11  ;;  %v4119_v16 = vcombine.low %v5566_v54, %v5571_v11  ;;  %v4582_v54 = vld [vmem:[%s5863_s9 + $0x340] sm:$0xff]  }
 0x9df   : > { %4249 = vmatpush3.bf16.msra.mxu1 %v4548_v57  ;;  %v5583_v57 = vld [vmem:[%s5861_s7 + $0x78] sm:$0xff]  ;;  %v4583_v11 = vld [vmem:[%s5863_s9 + $0x3c0] sm:$0xff]  }
 0x9e0   : > { %2729 = vmatprep.subr.bf16.mxu1 %v4078_v5  ;;  %v4121_v5 = vcombine.low %v5576_v60, %v5583_v57  ;;  %v4122_v22 = vcombine.high %v5576_v60, %v5583_v57  ;;  %v4585_v60 = vld [vmem:[%s5863_s9 + $0x380] sm:$0xff]   ;;  %v4587_v57 = vld [vmem:[%s5863_s9 + $0x3c8] sm:$0xff]  }
 0x9e1   : > { %4271 = vmatpush3.bf16.msra.mxu0 %v4549_v26 }
 0x9e2   : > { %2612 = vmatmul.mubr.bf16.vlgmr.msra.gmra.mrb[32].mxu1 %v1723_v56  ;;  %2770 = vmatprep.subr.bf16.mxu0 %v4080_v9 }
 0x9e3   : > { %2730 = vmatpush1.bf16.msra.mxu1 %v4077_v24  ;;  %2761 = vmatprep.mubr.bf16.mxu1 %v4774_v15 }
 0x9e4   : > { %2731 = vmatprep.subr.bf16.mxu1 %v4082_v28  ;;  %2652 = vmatmul.mubr.bf16.vlgmr.msra.gmra.mrb[32].mxu0 %v1725_v18 }
 0x9e5   : > { %2771 = vmatpush1.bf16.msra.mxu0 %v4079_v43  ;;  %2802 = vmatprep.mubr.bf16.mxu0 %v4774_v15 }
 0x9e6   : > { %2772 = vmatprep.subr.bf16.mxu0 %v4084_v27  ;;  %v2667_v27 = vld [vmem:[%s5862_s8 + $0x8] sm:$0xf] }
 0x9e7   : > { %2732 = vmatpush1.bf16.msra.mxu1 %v4081_v44 }
 0x9e8   : > { %4278 = vmatprep.subr.bf16.mxu1 %v4550_v38 }
 0x9e9   : > { %2773 = vmatpush1.bf16.msra.mxu0 %v4083_v39 }
 0x9ea   : > { %4085 = vmatmul.mubr.msk.bf16.vlgmr.msra.gmra.mrb[36].mxu1 %vm462_vm1, %v5070_v33  ;;  %4300 = vmatprep.subr.bf16.mxu0 %v4551_v45 }
 0x9eb   : > { %4279 = vmatpush3.bf16.msra.mxu1 %v4552_v50 }
 0x9ec   : > { %4086 = vmatmul.mubr.msk.bf16.vlgmr.msra.gmra.mrb[36].mxu0 %vm462_vm1, %v5070_v33  ;;  %4280 = vmatprep.subr.bf16.mxu1 %v4554_v59 }
 0x9ed   : > { %4301 = vmatpush3.bf16.msra.mxu0 %v4553_v46 }
 0x9ee   : > { %4302 = vmatprep.subr.bf16.mxu0 %v4555_v51  ;;  %v2672_v51 = vrot.slane %v2667_v27, %v5185_v10 }
 0x9ef   : > { %4281 = vmatpush3.bf16.msra.mxu1 %v4556_v34 }
 0x9f0   : > { %4282 = vmatprep.subr.bf16.mxu1 %v4558_v7 }
 0x9f1   : > { %4303 = vmatpush3.bf16.msra.mxu0 %v4557_v55  ;;  %v2676_v55 = vrot.slane %v2667_v27, %v5191_v12 }
 0x9f2   : > { %4304 = vmatprep.subr.bf16.mxu0 %v4559_v42 }
 0x9f3   : > { %4283 = vmatpush3.bf16.msra.mxu1 %v4560_v41  ;;  %v2680_v41 = vrot.slane %v2667_v27, %v5197_v14 }
 0x9f4   : > { %4284 = vmatprep.subr.bf16.mxu1 %v4562_v35 }
 0x9f5   : > { %4305 = vmatpush3.bf16.msra.mxu0 %v4561_v29 }
 0x9f6   : > { %4306 = vmatprep.subr.bf16.mxu0 %v4563_v47  ;;  %v2684_v47 = vrot.slane %v2667_v27, %v5194_v13 }
 0x9f7   : > { %4285 = vmatpush3.bf16.msra.mxu1 %v4564_v3 }
 0x9f8   : > { %4286 = vmatprep.subr.bf16.mxu1 %v4566_v53 }
 0x9f9   : > { %4307 = vmatpush3.bf16.msra.mxu0 %v4565_v31 }
 0x9fa   : > { %4308 = vmatprep.subr.bf16.mxu0 %v4567_v62 }
 0x9fb   : > { %4287 = vmatpush3.bf16.msra.mxu1 %v4568_v61 }
 0x9fc   : > { %4288 = vmatprep.subr.bf16.mxu1 %v4570_v58 }
 0x9fd   : > { %4309 = vmatpush3.bf16.msra.mxu0 %v4569_v6 }
 0x9fe   : > { %4310 = vmatprep.subr.bf16.mxu0 %v4571_v21 }
 0x9ff   : > { %4289 = vmatpush3.bf16.msra.mxu1 %v4572_v25 }
 0xa00   : > { %4290 = vmatprep.subr.bf16.mxu1 %v4574_v52 }
 0xa01   : > { %4311 = vmatpush3.bf16.msra.mxu0 %v4573_v63 }
 0xa02   : > { %4312 = vmatprep.subr.bf16.mxu0 %v4575_v30 }
 0xa03   : > { %4291 = vmatpush3.bf16.msra.mxu1 %v4576_v4 }
 0xa04   : > { %4292 = vmatprep.subr.bf16.mxu1 %v4578_v0 }
 0xa05   : > { %4313 = vmatpush3.bf16.msra.mxu0 %v4577_v32 }
 0xa06   : > { %4314 = vmatprep.subr.bf16.mxu0 %v4579_v8 }
 0xa07   : > { %4293 = vmatpush3.bf16.msra.mxu1 %v4580_v36 }
 0xa08   : > { %3326 = vmatprep.subr.bf16.mxu1 %v4120_v17 }
 0xa09   : > { %4315 = vmatpush3.bf16.msra.mxu0 %v4581_v49 }
 0xa0a   : > { %3367 = vmatprep.subr.bf16.mxu0 %v4122_v22 }
 0xa95   : > { %v4206_v20 = vpop.f32.mrb[28].mxu1 }
 0xa96   : > { %v4207_v23 = vpop.f32.mrb[29].mxu1 }
 0xa97   : > { %v4208_v48 = vadd.f32 %v4207_v23, %v4206_v20  ;;  %v4209_v19 = vpop.f32.mrb[30].mxu1  ;;  %v4228_v26 = vpop.f32.mrb[28].mxu0 }
 0xa98   : > { %v4210_v2 = vpop.f32.mrb[31].mxu1  ;;  %v4229_v24 = vpop.f32.mrb[29].mxu0 }
 0xa99   : > { %v4230_v9 = vadd.f32 %v4229_v24, %v4228_v26  ;;  %v4231_v56 = vpop.f32.mrb[30].mxu0 }
 0xa9a   : > { %v4232_v28 = vpop.f32.mrb[31].mxu0 }
 0xa9b   : > { %v2382_v37 = vadd.f32 %v4230_v9, %v4208_v48 }
 0xab5   : > { %v4250_v40 = vpop.f32.mrb[32].mxu1 }
 0xab6   : > { %v4251_v43 = vpop.f32.mrb[33].mxu1 }
 0xab7   : > { %v4252_v18 = vadd.f32 %v4251_v43, %v4250_v40  ;;  %v4253_v44 = vpop.f32.mrb[34].mxu1  ;;  %v4272_v39 = vpop.f32.mrb[32].mxu0 }
 0xab8   : > { %v4254_v38 = vpop.f32.mrb[35].mxu1  ;;  %v4273_v50 = vpop.f32.mrb[33].mxu0 }
 0xab9   : > { %v2614_v45 = vadd.f32 %v4252_v18, %v2382_v37  ;;  %v4274_v46 = vadd.f32 %v4273_v50, %v4272_v39  ;;  %v4275_v59 = vpop.f32.mrb[34].mxu0 }
 0xaba   : > { %v4276_v34 = vpop.f32.mrb[35].mxu0 }
 0xabb   : > { %v5596_v7 = vadd.f32 %v4274_v46, %v2614_v45 }
 0xabd   : > { %v2763_v42 = vpop.f32.mrb[36].mxu1 }
 0xabe   : > { %v5599_v29 = vadd.f32 %v2763_v42, %v2672_v51  ;;  %v2765_v35 = vpop.f32.mrb[37].mxu1 }
 0xabf   : > { %v5602_v3 = vadd.f32 %v2765_v35, %v2676_v55  ;;  %v2767_v31 = vpop.f32.mrb[38].mxu1  ;;  %v2804_v62 = vpop.f32.mrb[36].mxu0 }
 0xac0   : > { %v5605_v53 = vmul.f32 0.70710677, %v5599_v29  ;;  %v2768_v61 = vpop.f32.mrb[39].mxu1  ;;  %v5607_v6 = vadd.f32 %v2804_v62, %v2680_v41  ;;  %v2806_v21 = vpop.f32.mrb[37].mxu0 }
 0xac1   : > { %v5610_v58 = vmul.f32 0.70710677, %v5602_v3  ;;  %v5613_v63 = vadd.f32 %v2806_v21, %v2684_v47  ;;  %v2808_v52 = vpop.f32.mrb[38].mxu0 }
 0xac2   : > { %v2819_v25 = vand.u32 2147483647, %v5605_v53  ;;  %v5616_v30 = vmul.f32 0.70710677, %v5607_v6  ;;  %v2809_v22 = vpop.f32.mrb[39].mxu0  ;;  %vm2895_vm14 = vcmp.ge.f32.partialorder %v5605_v53, 0.0 }
 0xac3   : > { %v2820_v4 = vand.u32 2147483647, %v5610_v58  ;;  %v5620_v0 = vmul.f32 0.70710677, %v5613_v63  ;;  %vm2896_vm15 = vcmp.ge.f32.partialorder %v5610_v58, 0.0  ;;  %v3260_v58 = vld [vmem:[%s5861_s7 + $0xb0] sm:$0xff] }
 0xac4   : > { %v2823_v32 = vmul.f32 0.3275911, %v2819_v25  ;;  %v2821_v8 = vand.u32 2147483647, %v5616_v30  ;;  %v2871_v2 = vsub.f32 0.0, %v2819_v25  ;;  %vm2897_vm0 = vcmp.ge.f32.partialorder %v5616_v30, 0.0 }
 0xac5   : > { %v2824_v36 = vmul.f32 0.3275911, %v2820_v4  ;;  %v2822_v17 = vand.u32 2147483647, %v5620_v0  ;;  %v2872_v24 = vsub.f32 0.0, %v2820_v4  ;;  %vm2898_vm2 = vcmp.ge.f32.partialorder %v5620_v0, 0.0 }
 0xac6   : > { %v2827_v49 = vadd.f32 1.0, %v2823_v32  ;;  %v2825_v20 = vmul.f32 0.3275911, %v2821_v8  ;;  %v2873_v9 = vsub.f32 0.0, %v2821_v8  ;;  %v2875_v28 = vmul.f32 %v2871_v2, %v2819_v25  ;;  %v3263_v0 = vld [vmem:[%s5861_s7 + $0xf8] sm:$0xff] }
 0xac7   : > { %v2828_v23 = vadd.f32 1.0, %v2824_v36  ;;  %v2826_v48 = vmul.f32 0.3275911, %v2822_v17  ;;  %v2876_v43 = vmul.f32 %v2872_v24, %v2820_v4  ;;  %v2874_v18 = vsub.f32 0.0, %v2822_v17 }
 0xac8   : > { %4664 = vrcp.f32 %v2827_v49  ;;  %v2829_v19 = vadd.f32 1.0, %v2825_v20  ;;  %v2877_v38 = vmul.f32 %v2873_v9, %v2821_v8  ;;  %v2879_v45 = vmul.f32 1.442695, %v2875_v28 }
 0xac9   : > { %4666 = vrcp.f32 %v2828_v23  ;;  %v2830_v26 = vadd.f32 1.0, %v2826_v48  ;;  %v2881_v51 = vmul.f32 1.442695, %v2876_v43  ;;  %v2878_v42 = vmul.f32 %v2874_v18, %v2822_v17 }
 0xaca   : > { %4668 = vrcp.f32 %v2829_v19  ;;  %v2883_v47 = vmul.f32 1.442695, %v2877_v38  ;;  %v2813_v30 = vmul.f32 0.5, %v5607_v6 }
 0xacb   : > { %4670 = vrcp.f32 %v2830_v26  ;;  %v2885_v4 = vmul.f32 1.442695, %v2878_v42 }
 0xacc   : > { %4672 = vpow2.f32 %v2879_v45 }
 0xacd   : > { %4674 = vpow2.f32 %v2881_v51 }
 0xace   : > { %4676 = vpow2.f32 %v2883_v47 }
 0xacf   : > { %4678 = vpow2.f32 %v2885_v4 }
 0xad2   : > { %v4665_v56 = vpop.eup %4664 }
 0xad3   : > { %v4667_v37 = vpop.eup %4666  ;;  %v2835_v40 = vmul.f32 1.0614054, %v4665_v56 }
 0xad4   : > { %v2836_v44 = vmul.f32 1.0614054, %v4667_v37  ;;  %v4669_v27 = vpop.eup %4668 }
 0xad5   : > { %v2839_v39 = vadd.f32 -1.4531521, %v2835_v40  ;;  %v2837_v50 = vmul.f32 1.0614054, %v4669_v27  ;;  %v4671_v34 = vpop.eup %4670 }
 0xad6   : > { %v2840_v46 = vadd.f32 -1.4531521, %v2836_v44  ;;  %v2838_v31 = vmul.f32 1.0614054, %v4671_v34  ;;  %v4673_v40 = vpop.eup %4672 }
 0xad7   : > { %v2843_v59 = vmul.f32 %v4665_v56, %v2839_v39  ;;  %v2841_v55 = vadd.f32 -1.4531521, %v2837_v50  ;;  %v4675_v44 = vpop.eup %4674 }
 0xad8   : > { %v2844_v41 = vmul.f32 %v4667_v37, %v2840_v46  ;;  %v2842_v25 = vadd.f32 -1.4531521, %v2838_v31  ;;  %v4677_v46 = vpop.eup %4676 }
 0xad9   : > { %v2847_v35 = vadd.f32 1.4214138, %v2843_v59  ;;  %v2845_v62 = vmul.f32 %v4669_v27, %v2841_v55  ;;  %v4679_v47 = vpop.eup %4678 }
 0xada   : > { %v2848_v61 = vadd.f32 1.4214138, %v2844_v41  ;;  %v2846_v36 = vmul.f32 %v4671_v34, %v2842_v25 }
 0xadb   : > { %v2851_v21 = vmul.f32 %v4665_v56, %v2847_v35  ;;  %v2849_v52 = vadd.f32 1.4214138, %v2845_v62 }
 0xadc   : > { %v2852_v32 = vmul.f32 %v4667_v37, %v2848_v61  ;;  %v2850_v17 = vadd.f32 1.4214138, %v2846_v36  ;;  %v2811_v61 = vmul.f32 0.5, %v5599_v29  ;;  %v3262_v29 = vld [vmem:[%s5861_s7 + $0xf0] sm:$0xff] }
 0xadd   : > { %v2855_v8 = vadd.f32 -0.28449672, %v2851_v21  ;;  %v2853_v49 = vmul.f32 %v4669_v27, %v2849_v52  ;;  %v2812_v52 = vmul.f32 0.5, %v5602_v3  ;;  %v4123_v6 = vcombine.low %v3260_v58, %v3262_v29 }
 0xade   : > { %v2856_v22 = vadd.f32 -0.28449672, %v2852_v32  ;;  %v2854_v26 = vmul.f32 %v4671_v34, %v2850_v17  ;;  %v2814_v17 = vmul.f32 0.5, %v5613_v63 }
 0xadf   : > { %v2859_v20 = vmul.f32 %v4665_v56, %v2855_v8  ;;  %v2857_v23 = vadd.f32 -0.28449672, %v2853_v49 }
 0xae0   : > { %v2860_v48 = vmul.f32 %v4667_v37, %v2856_v22  ;;  %v2858_v28 = vadd.f32 -0.28449672, %v2854_v26 }
 0xae1   : > { %v2863_v19 = vadd.f32 0.2548296, %v2859_v20  ;;  %v2861_v2 = vmul.f32 %v4669_v27, %v2857_v23 }
 0xae2   : > { %v2864_v24 = vadd.f32 0.2548296, %v2860_v48  ;;  %v2862_v38 = vmul.f32 %v4671_v34, %v2858_v28  ;;  %v4124_v48 = vcombine.high %v3260_v58, %v3262_v29 }
 0xae3   : > { %v2867_v9 = vmul.f32 %v4665_v56, %v2863_v19  ;;  %v2865_v43 = vadd.f32 0.2548296, %v2861_v2  ;;  %v3261_v2 = vld [vmem:[%s5861_s7 + $0xb8] sm:$0xff] }
 0xae4   : > { %v2868_v18 = vmul.f32 %v4667_v37, %v2864_v24  ;;  %v2866_v51 = vadd.f32 0.2548296, %v2862_v38  ;;  %v4125_v28 = vcombine.low %v3261_v2, %v3263_v0  ;;  %v4595_v38 = vld [vmem:[%s5863_s9 + $0x3d8] sm:$0xff]  }
 0xae5   : > { %v2887_v39 = vmul.f32 %v4673_v40, %v2867_v9  ;;  %v2869_v45 = vmul.f32 %v4669_v27, %v2865_v43  ;;  %v4126_v9 = vcombine.high %v3261_v2, %v3263_v0  ;;  %v4590_v40 = vld [vmem:[%s5863_s9 + $0x350] sm:$0xff]  }
 0xae6   : > { %v2888_v50 = vmul.f32 %v4675_v44, %v2868_v18  ;;  %v2870_v35 = vmul.f32 %v4671_v34, %v2866_v51  ;;  %v4591_v43 = vld [vmem:[%s5863_s9 + $0x3d0] sm:$0xff]   ;;  %v4600_v51 = vld [vmem:[%s5863_s9 + $0x320] sm:$0xff]  }
 0xae7   : > { %v2891_v59 = vsub.f32 1.0, %v2887_v39  ;;  %v2889_v55 = vmul.f32 %v4677_v46, %v2869_v45  ;;  %v4592_v18 = vld [vmem:[%s5863_s9 + $0x310] sm:$0xff]   ;;  %v4594_v39 = vld [vmem:[%s5863_s9 + $0x358] sm:$0xff]   ;;  %v4598_v46 = vld [vmem:[%s5863_s9 + $0x360] sm:$0xff]  }
 0xae8   : > { %v2892_v42 = vsub.f32 1.0, %v2888_v50  ;;  %v2890_v37 = vmul.f32 %v4679_v47, %v2870_v35  ;;  %v4593_v44 = vld [vmem:[%s5863_s9 + $0x390] sm:$0xff]   ;;  %v4596_v45 = vld [vmem:[%s5863_s9 + $0x318] sm:$0xff]   ;;  %v4604_v35 = vld [vmem:[%s5863_s9 + $0x328] sm:$0xff]  }
 0xae9   : > { %v2899_v41 = vsub.f32 0.0, %v2891_v59  ;;  %v2893_v56 = vsub.f32 1.0, %v2889_v55  ;;  %v4597_v50 = vld [vmem:[%s5863_s9 + $0x398] sm:$0xff]   ;;  %v4601_v55 = vld [vmem:[%s5863_s9 + $0x3a0] sm:$0xff]   ;;  %v4605_v47 = vld [vmem:[%s5863_s9 + $0x3a8] sm:$0xff]  }
 0xaea   : > { %v2900_v31 = vsub.f32 0.0, %v2892_v42  ;;  %v2894_v34 = vsub.f32 1.0, %v2890_v37  ;;  %v4609_v37 = vld [vmem:[%s5863_s9 + $0x3b0] sm:$0xff]  }
 0xaeb   : > { %v2903_v62 = vsel %vm2895_vm14, %v2891_v59, %v2899_v41  ;;  %v2901_v21 = vsub.f32 0.0, %v2893_v56  ;;  %v4599_v59 = vld [vmem:[%s5863_s9 + $0x3e0] sm:$0xff]   ;;  %v4603_v41 = vld [vmem:[%s5863_s9 + $0x3e8] sm:$0xff]  }
 0xaec   : > { %v2907_v27 = vadd.f32 1.0, %v2903_v62  ;;  %v2904_v25 = vsel %vm2896_vm15, %v2892_v42, %v2900_v31  ;;  %v2902_v49 = vsub.f32 0.0, %v2894_v34  ;;  %v4602_v42 = vld [vmem:[%s5863_s9 + $0x368] sm:$0xff]   ;;  %v4607_v31 = vld [vmem:[%s5863_s9 + $0x3f0] sm:$0xff]  }
 0xaed   : > { %v2908_v4 = vadd.f32 1.0, %v2904_v25  ;;  %v2905_v8 = vsel %vm2897_vm0, %v2893_v56, %v2901_v21  ;;  %v4606_v56 = vld [vmem:[%s5863_s9 + $0x370] sm:$0xff]   ;;  %v4612_v21 = vld [vmem:[%s5863_s9 + $0x338] sm:$0xff]  }
 0xaee   : > { %v2911_v32 = vmul.f32 %v2907_v27, %v2811_v61  ;;  %v2909_v53 = vadd.f32 1.0, %v2905_v8  ;;  %v2906_v22 = vsel %vm2898_vm2, %v2894_v34, %v2902_v49  ;;  %v4608_v62 = vld [vmem:[%s5863_s9 + $0x330] sm:$0xff]   ;;  %v4610_v61 = vld [vmem:[%s5863_s9 + $0x378] sm:$0xff]   ;;  %v3264_v8 = vld [vmem:[%s5862_s8 + $0xc] sm:$0xf] }
 0xaef   : > { %v2912_v36 = vmul.f32 %v2908_v4, %v2812_v52  ;;  %v2910_v23 = vadd.f32 1.0, %v2906_v22  ;;  %v4611_v27 = vld [vmem:[%s5863_s9 + $0x3f8] sm:$0xff]   ;;  %v3269_v49 = vrot.slane %v3264_v8, %v5185_v10  ;;  %v3273_v29 = vrot.slane %v3264_v8, %v5191_v12 }
 0xaf0   : > { %v2915_v20 = vpack.c.bf16 %v2911_v32, %v2911_v32  ;;  %v2913_v19 = vmul.f32 %v2909_v53, %v2813_v30  ;;  %v4613_v25 = vld [vmem:[%s5863_s9 + $0x3b8] sm:$0xff]   ;;  %v3281_v12 = vrot.slane %v3264_v8, %v5194_v13 }
 0xaf1   : > { %v2916_v3 = vpack.c.bf16 %v2912_v36, %v2912_v36  ;;  %v2914_v26 = vmul.f32 %v2910_v23, %v2814_v17 }
 0xaf2   : > { %v2917_v24 = vpack.c.bf16 %v2913_v19, %v2913_v19  ;;  %v3277_v19 = vrot.slane %v3264_v8, %v5197_v14 }
 0xaf3   : > { %3207 = vmatprep.mubr.bf16.mxu1 %v2916_v3  ;;  %v2918_v63 = vpack.c.bf16 %v2914_v26, %v2914_v26 }
 0xaf4   : > { %3208 = vmatmul.mubr.bf16.vlgmr.msra.gmra.mrb[40].mxu1 %v2915_v20 }
 0xaf5   : > { %3327 = vmatpush1.bf16.msra.mxu1 %v4119_v16  ;;  %3358 = vmatprep.mubr.bf16.mxu1 %v4774_v15  ;;  %v4588_v16 = vld [vmem:[%s5863_s9 + $0x308] sm:$0xff]  }
 0xaf6   : > { %3328 = vmatprep.subr.bf16.mxu1 %v4124_v48  ;;  %3247 = vmatprep.mubr.bf16.mxu0 %v2918_v63 }
 0xaf7   : > { %3248 = vmatmul.mubr.bf16.vlgmr.msra.gmra.mrb[40].mxu0 %v2917_v24 }
 0xaf8   : > { %3368 = vmatpush1.bf16.msra.mxu0 %v4121_v5  ;;  %3399 = vmatprep.mubr.bf16.mxu0 %v4774_v15  ;;  %v4584_v15 = vld [vmem:[%s5863_s9 + $0x300] sm:$0xff]   ;;  %v4589_v5 = vld [vmem:[%s5863_s9 + $0x388] sm:$0xff]  }
 0xaf9   : > { %3329 = vmatpush1.bf16.msra.mxu1 %v4123_v6  ;;  %3369 = vmatprep.subr.bf16.mxu0 %v4126_v9 }
 0xafa   : > { %4322 = vmatprep.subr.bf16.mxu1 %v4582_v54 }
 0xafc   : > { %4127 = vmatmul.mubr.msk.bf16.vlgmr.msra.gmra.mrb[44].mxu1 %vm462_vm1, %v5070_v33  ;;  %3370 = vmatpush1.bf16.msra.mxu0 %v4125_v28 }
 0xafd   : > { %4344 = vmatprep.subr.bf16.mxu0 %v4583_v11  ;;  %4323 = vmatpush3.bf16.msra.mxu1 %v4584_v15 }
 0xaff   : > { %4128 = vmatmul.mubr.msk.bf16.vlgmr.msra.gmra.mrb[44].mxu0 %vm462_vm1, %v5070_v33  ;;  %v4586_v33 = vld [vmem:[%s5863_s9 + $0x348] sm:$0xff]  }
 0xb00   : > { %4345 = vmatpush3.bf16.msra.mxu0 %v4585_v60  ;;  %4324 = vmatprep.subr.bf16.mxu1 %v4586_v33 }
 0xb01   : > { %4346 = vmatprep.subr.bf16.mxu0 %v4587_v57  ;;  %4325 = vmatpush3.bf16.msra.mxu1 %v4588_v16 }
 0xb02   : > { %4326 = vmatprep.subr.bf16.mxu1 %v4590_v40 }
 0xb04   : > { %4347 = vmatpush3.bf16.msra.mxu0 %v4589_v5 }
 0xb05   : > { %4348 = vmatprep.subr.bf16.mxu0 %v4591_v43  ;;  %4327 = vmatpush3.bf16.msra.mxu1 %v4592_v18 }
 0xb06   : > { %4328 = vmatprep.subr.bf16.mxu1 %v4594_v39 }
 0xb08   : > { %4349 = vmatpush3.bf16.msra.mxu0 %v4593_v44 }
 0xb09   : > { %4350 = vmatprep.subr.bf16.mxu0 %v4595_v38  ;;  %4329 = vmatpush3.bf16.msra.mxu1 %v4596_v45 }
 0xb0a   : > { %4330 = vmatprep.subr.bf16.mxu1 %v4598_v46 }
 0xb0c   : > { %4351 = vmatpush3.bf16.msra.mxu0 %v4597_v50 }
 0xb0d   : > { %4352 = vmatprep.subr.bf16.mxu0 %v4599_v59  ;;  %4331 = vmatpush3.bf16.msra.mxu1 %v4600_v51 }
 0xb0e   : > { %4332 = vmatprep.subr.bf16.mxu1 %v4602_v42 }
 0xb10   : > { %4353 = vmatpush3.bf16.msra.mxu0 %v4601_v55 }
 0xb11   : > { %4354 = vmatprep.subr.bf16.mxu0 %v4603_v41  ;;  %4333 = vmatpush3.bf16.msra.mxu1 %v4604_v35 }
 0xb12   : > { %4334 = vmatprep.subr.bf16.mxu1 %v4606_v56 }
 0xb14   : > { %4355 = vmatpush3.bf16.msra.mxu0 %v4605_v47 }
 0xb15   : > { %4356 = vmatprep.subr.bf16.mxu0 %v4607_v31  ;;  %4335 = vmatpush3.bf16.msra.mxu1 %v4608_v62 }
 0xb16   : > { %4336 = vmatprep.subr.bf16.mxu1 %v4610_v61 }
 0xb18   : > { %4357 = vmatpush3.bf16.msra.mxu0 %v4609_v37 }
 0xb19   : > { %4358 = vmatprep.subr.bf16.mxu0 %v4611_v27  ;;  %4337 = vmatpush3.bf16.msra.mxu1 %v4612_v21 }
 0xb1c   : > { %4359 = vmatpush3.bf16.msra.mxu0 %v4613_v25 }
 0xbc7   : > { %v4294_v52 = vpop.f32.mrb[40].mxu1 }
 0xbc8   : > { %v4295_v4 = vpop.f32.mrb[41].mxu1 }
 0xbc9   : > { %v4296_v34 = vadd.f32 %v4295_v4, %v4294_v52  ;;  %v4297_v32 = vpop.f32.mrb[42].mxu1 }
 0xbca   : > { %v4298_v53 = vpop.f32.mrb[43].mxu1  ;;  %v4316_v36 = vpop.f32.mrb[40].mxu0 }
 0xbcb   : > { %v4317_v58 = vpop.f32.mrb[41].mxu0 }
 0xbcc   : > { %v4318_v30 = vadd.f32 %v4317_v58, %v4316_v36  ;;  %v4319_v3 = vpop.f32.mrb[42].mxu0 }
 0xbcd   : > { %v4320_v22 = vpop.f32.mrb[43].mxu0 }
 0xbce   : > { %v3250_v17 = vadd.f32 %v4318_v30, %v4296_v34 }
 0xbcf   : > { %v3360_v20 = vpop.f32.mrb[44].mxu1 }
 0xbd0   : > { %v5757_v23 = vadd.f32 %v3360_v20, %v3269_v49  ;;  %v3362_v48 = vpop.f32.mrb[45].mxu1  ;;  %v5763_v0 = vadd.f32 %v3250_v17, %v5596_v7 }
 0xbd1   : > { %v5760_v26 = vadd.f32 %v3362_v48, %v3273_v29  ;;  %v3364_v2 = vpop.f32.mrb[46].mxu1 }
 0xbd2   : > { %v5766_v10 = vmul.f32 0.70710677, %v5757_v23  ;;  %v3365_v6 = vpop.f32.mrb[47].mxu1  ;;  %v3401_v9 = vpop.f32.mrb[44].mxu0 }
 0xbd3   : > { %v5770_v63 = vmul.f32 0.70710677, %v5760_v26  ;;  %v5773_v28 = vadd.f32 %v3401_v9, %v3277_v19  ;;  %v3403_v54 = vpop.f32.mrb[45].mxu0 }
 0xbd4   : > { %v3416_v24 = vand.u32 2147483647, %v5766_v10  ;;  %v5776_v7 = vadd.f32 %v3403_v54, %v3281_v12  ;;  %v3405_v15 = vpop.f32.mrb[46].mxu0  ;;  %vm3492_vm3 = vcmp.ge.f32.partialorder %v5766_v10, 0.0 }
 0xbd5   : > { %v3417_v14 = vand.u32 2147483647, %v5770_v63  ;;  %v5779_v60 = vmul.f32 0.70710677, %v5773_v28  ;;  %v3406_v16 = vpop.f32.mrb[47].mxu0  ;;  %vm3493_vm4 = vcmp.ge.f32.partialorder %v5770_v63, 0.0 }
 0xbd6   : > { %v3420_v11 = vmul.f32 0.3275911, %v3416_v24  ;;  %v5782_v57 = vmul.f32 0.70710677, %v5776_v7  ;;  %v3468_v45 = vsub.f32 0.0, %v3416_v24  ;;  %v3410_v63 = vmul.f32 0.5, %v5773_v28 }
 0xbd7   : > { %v3421_v13 = vmul.f32 0.3275911, %v3417_v14  ;;  %v3418_v5 = vand.u32 2147483647, %v5779_v60  ;;  %v3469_v50 = vsub.f32 0.0, %v3417_v14  ;;  %vm3494_vm5 = vcmp.ge.f32.partialorder %v5779_v60, 0.0 }
 0xbd8   : > { %v3424_v33 = vadd.f32 1.0, %v3420_v11  ;;  %v3419_v43 = vand.u32 2147483647, %v5782_v57  ;;  %v3472_v59 = vmul.f32 %v3468_v45, %v3416_v24  ;;  %vm3495_vm6 = vcmp.ge.f32.partialorder %v5782_v57, 0.0 }
 0xbd9   : > { %v3425_v40 = vadd.f32 1.0, %v3421_v13  ;;  %v3422_v18 = vmul.f32 0.3275911, %v3418_v5  ;;  %v3470_v42 = vsub.f32 0.0, %v3418_v5  ;;  %v3473_v41 = vmul.f32 %v3469_v50, %v3417_v14 }
 0xbda   : > { %4680 = vrcp.f32 %v3424_v33  ;;  %v3423_v44 = vmul.f32 0.3275911, %v3419_v43  ;;  %v3471_v35 = vsub.f32 0.0, %v3419_v43  ;;  %v3476_v31 = vmul.f32 1.442695, %v3472_v59 }
 0xbdb   : > { %4682 = vrcp.f32 %v3425_v40  ;;  %v3426_v39 = vadd.f32 1.0, %v3422_v18  ;;  %v3474_v27 = vmul.f32 %v3470_v42, %v3418_v5  ;;  %v3478_v21 = vmul.f32 1.442695, %v3473_v41 }
 0xbdc   : > { %v3427_v38 = vadd.f32 1.0, %v3423_v44  ;;  %v3475_v4 = vmul.f32 %v3471_v35, %v3419_v43 }
 0xbdd   : > { %4684 = vrcp.f32 %v3426_v39  ;;  %v3480_v58 = vmul.f32 1.442695, %v3474_v27 }
 0xbde   : > { %4686 = vrcp.f32 %v3427_v38  ;;  %v3482_v3 = vmul.f32 1.442695, %v3475_v4 }
 0xbdf   : > { %4688 = vpow2.f32 %v3476_v31  ;;  %v3408_v31 = vmul.f32 0.5, %v5757_v23 }
 0xbe0   : > { %4690 = vpow2.f32 %v3478_v21 }
 0xbe1   : > { %4692 = vpow2.f32 %v3480_v58 }
 0xbe2   : > { %4694 = vpow2.f32 %v3482_v3 }
 0xbe4   : > { %v4681_v46 = vpop.eup %4680 }
 0xbe5   : > { %v4683_v51 = vpop.eup %4682  ;;  %v3432_v55 = vmul.f32 1.0614054, %v4681_v46 }
 0xbe6   : > { %v3433_v47 = vmul.f32 1.0614054, %v4683_v51 }
 0xbe7   : > { %v3436_v56 = vadd.f32 -1.4531521, %v3432_v55  ;;  %v4685_v37 = vpop.eup %4684 }
 0xbe8   : > { %v3437_v62 = vadd.f32 -1.4531521, %v3433_v47  ;;  %v4687_v25 = vpop.eup %4686  ;;  %v3434_v52 = vmul.f32 1.0614054, %v4685_v37 }
 0xbe9   : > { %v3440_v61 = vmul.f32 %v4681_v46, %v3436_v56  ;;  %v3435_v8 = vmul.f32 1.0614054, %v4687_v25  ;;  %v4689_v33 = vpop.eup %4688 }
 0xbea   : > { %v3441_v34 = vmul.f32 %v4683_v51, %v3437_v62  ;;  %v3438_v53 = vadd.f32 -1.4531521, %v3434_v52  ;;  %v4691_v40 = vpop.eup %4690 }
 0xbeb   : > { %v3444_v32 = vadd.f32 1.4214138, %v3440_v61  ;;  %v3439_v29 = vadd.f32 -1.4531521, %v3435_v8  ;;  %v4693_v55 = vpop.eup %4692 }
 0xbec   : > { %v3445_v36 = vadd.f32 1.4214138, %v3441_v34  ;;  %v3442_v30 = vmul.f32 %v4685_v37, %v3438_v53  ;;  %v4695_v35 = vpop.eup %4694 }
 0xbed   : > { %v3448_v49 = vmul.f32 %v4681_v46, %v3444_v32  ;;  %v3443_v17 = vmul.f32 %v4687_v25, %v3439_v29 }
 0xbee   : > { %v3449_v22 = vmul.f32 %v4683_v51, %v3445_v36  ;;  %v3446_v48 = vadd.f32 1.4214138, %v3442_v30 }
 0xbef   : > { %v3452_v20 = vadd.f32 -0.28449672, %v3448_v49  ;;  %v3447_v12 = vadd.f32 1.4214138, %v3443_v17  ;;  %v3411_v49 = vmul.f32 0.5, %v5776_v7 }
 0xbf0   : > { %v3453_v19 = vadd.f32 -0.28449672, %v3449_v22  ;;  %v3450_v6 = vmul.f32 %v4685_v37, %v3446_v48 }
 0xbf1   : > { %v3456_v2 = vmul.f32 %v4681_v46, %v3452_v20  ;;  %v3451_v14 = vmul.f32 %v4687_v25, %v3447_v12 }
 0xbf2   : > { %v3457_v24 = vmul.f32 %v4683_v51, %v3453_v19  ;;  %v3454_v54 = vadd.f32 -0.28449672, %v3450_v6  ;;  %v4161_v6 = vld [vmem:[%s5864_s10] ss:$0 sm:$0xff] }
 0xbf3   : > { %v3460_v9 = vadd.f32 0.2548296, %v3456_v2  ;;  %v3455_v13 = vadd.f32 -0.28449672, %v3451_v14 }
 0xbf4   : > { %v3461_v11 = vadd.f32 0.2548296, %v3457_v24  ;;  %v3458_v16 = vmul.f32 %v4685_v37, %v3454_v54 }
 0xbf5   : > { %v3464_v15 = vmul.f32 %v4681_v46, %v3460_v9  ;;  %v3459_v18 = vmul.f32 %v4687_v25, %v3455_v13 }
 0xbf6   : > { %v3465_v5 = vmul.f32 %v4683_v51, %v3461_v11  ;;  %v3462_v44 = vadd.f32 0.2548296, %v3458_v16 }
 0xbf7   : > { %v3484_v43 = vmul.f32 %v4689_v33, %v3464_v15  ;;  %v3463_v45 = vadd.f32 0.2548296, %v3459_v18 }
 0xbf8   : > { %v3485_v39 = vmul.f32 %v4691_v40, %v3465_v5  ;;  %v3466_v50 = vmul.f32 %v4685_v37, %v3462_v44  ;;  %v3409_v37 = vmul.f32 0.5, %v5760_v26  ;;  %v4163_v44 = vld [vmem:[%s5866_s12] ss:$0 sm:$0xff] }
 0xbf9   : > { %v3488_v38 = vsub.f32 1.0, %v3484_v43  ;;  %v3467_v41 = vmul.f32 %v4687_v25, %v3463_v45 }
 0xbfa   : > { %v3489_v59 = vsub.f32 1.0, %v3485_v39  ;;  %v3486_v46 = vmul.f32 %v4693_v55, %v3466_v50 }
 0xbfb   : > { %v3496_v42 = vsub.f32 0.0, %v3488_v38  ;;  %v3487_v51 = vmul.f32 %v4695_v35, %v3467_v41 }
 0xbfc   : > { %v3497_v47 = vsub.f32 0.0, %v3489_v59  ;;  %v3490_v61 = vsub.f32 1.0, %v3486_v46 }
 0xbfd   : > { %v3500_v56 = vsel %vm3492_vm3, %v3488_v38, %v3496_v42  ;;  %v3491_v52 = vsub.f32 1.0, %v3487_v51 }
 0xbfe   : > { %v3504_v62 = vadd.f32 1.0, %v3500_v56  ;;  %v3501_v27 = vsel %vm3493_vm4, %v3489_v59, %v3497_v47  ;;  %v3498_v25 = vsub.f32 0.0, %v3490_v61 }
 0xbff   : > { %v3505_v21 = vadd.f32 1.0, %v3501_v27  ;;  %v3499_v34 = vsub.f32 0.0, %v3491_v52 }
 0xc00   : > { %v3508_v4 = vmul.f32 %v3504_v62, %v3408_v31  ;;  %v3502_v32 = vsel %vm3494_vm5, %v3490_v61, %v3498_v25 }
 0xc01   : > { %v3509_v10 = vmul.f32 %v3505_v21, %v3409_v37  ;;  %v3506_v8 = vadd.f32 1.0, %v3502_v32  ;;  %v3503_v53 = vsel %vm3495_vm6, %v3491_v52, %v3499_v34 }
 0xc02   : > { %v3512_v36 = vpack.c.bf16 %v3508_v4, %v3508_v4  ;;  %v3507_v26 = vadd.f32 1.0, %v3503_v53 }
 0xc03   : > { %v3513_v23 = vpack.c.bf16 %v3509_v10, %v3509_v10  ;;  %v3510_v58 = vmul.f32 %v3506_v8, %v3410_v63 }
 0xc04   : > { %v3511_v29 = vmul.f32 %v3507_v26, %v3411_v49 }
 0xc05   : > { %3804 = vmatprep.mubr.bf16.mxu1 %v3513_v23  ;;  %v3514_v60 = vpack.c.bf16 %v3510_v58, %v3510_v58 }
 0xc06   : > { %3805 = vmatmul.mubr.bf16.vlgmr.msra.gmra.mrb[48].mxu1 %v3512_v36  ;;  %v3515_v30 = vpack.c.bf16 %v3511_v29, %v3511_v29 }
 0xc08   : > { %3844 = vmatprep.mubr.bf16.mxu0 %v3515_v30 }
 0xc09   : > { %3845 = vmatmul.mubr.bf16.vlgmr.msra.gmra.mrb[48].mxu0 %v3514_v60 }
 0xcd9   : > { %v4338_v3 = vpop.f32.mrb[48].mxu1 }
 0xcda   : > { %v4339_v22 = vpop.f32.mrb[49].mxu1 }
 0xcdb   : > { %v4340_v57 = vadd.f32 %v4339_v22, %v4338_v3  ;;  %v4341_v20 = vpop.f32.mrb[50].mxu1 }
 0xcdc   : > { %v4342_v28 = vpop.f32.mrb[51].mxu1  ;;  %v4360_v17 = vpop.f32.mrb[48].mxu0 }
 0xcdd   : > { %v4361_v48 = vpop.f32.mrb[49].mxu0 }
 0xcde   : > { %v4362_v19 = vadd.f32 %v4361_v48, %v4360_v17  ;;  %v4363_v2 = vpop.f32.mrb[50].mxu0 }
 0xcdf   : > { %v4364_v12 = vpop.f32.mrb[51].mxu0 }
 0xce0   : > { %v3847_v7 = vadd.f32 %v4362_v19, %v4340_v57 }
 0xce2   : > { %v3852_v24 = vadd.f32 %v3847_v7, %v5763_v0 }
 0xce4   : > { %v3860_v9 = vadd.f32 %v4161_v6, %v3852_v24 }
 0xce6   : > { %v3861_v14 = vadd.f32 %v3860_v9, %v5066_v1  ;;  %v4162_v1 = vld [vmem:[%s5865_s11] ss:$0 sm:$0xff] }
 0xce8   : > { %v3864_v54 = vsel %vm462_vm1, %v3861_v14, 0.0 }
 0xce9   : > { %3865 = vadd.xlane.f32.xlu1 %v3864_v54 }
 0xd76   : > { %v3866_v11 = vpop.xlane.xlu1 %3865 }
 0xd77   : > { %v3867_v15 = vmul.f32 0.03125, %v3866_v11 }
 0xd79   : > { %v3868_v13 = vsub.f32 %v3861_v14, %v3867_v15 }
 0xd7b   : > { %v3869_v33 = vmul.f32 %v3868_v13, %v3868_v13 }
 0xd7d   : > { %v3870_v16 = vsel %vm462_vm1, %v3869_v33, 0.0  ;;  %vm3892_vm1 = vcmask 257024  }
 0xd7e   : > { %3871 = vadd.xlane.f32.xlu0 %v3870_v16 }
 0xe0b   : > { %v3872_v5 = vpop.xlane.xlu0 %3871 }
 0xe0c   : > { %v3873_v40 = vmul.f32 0.03125, %v3872_v5 }
 0xe0e   : > { %v3874_v43 = vadd.f32 1e-05, %v3873_v40 }
 0xe10   : > { %4696 = vrsqrt.f32 %v3874_v43 }
 0xe1a   : > { %v4697_v0 = vpop.eup %4696 }
 0xe1b   : > { %v3876_v18 = vmul.f32 %v4697_v0, %v3868_v13 }
 0xe1d   : > { %v3883_v39 = vmul.f32 %v4162_v1, %v3876_v18 }
 0xe1f   : > { %v3890_v38 = vadd.f32 %v4163_v44, %v3883_v39 }
 0xe21   : > { %v3891_v45 = vpack.c.bf16 %v3890_v38, %v3890_v38 }
 0xe23   : > { %3893 = vst.msk [vmem:[%s431_s15] sm:$0xf] %vm3892_vm1, %v3891_v45 }
 0xe24   : > { %4711 = shalt.err (!%p4708_p3)
}
 0xe25   : > { %s4712_s2 = scalar_lea.hbm %s5812_s3, 64  ;;  %s4716_s30 = scalar_lea.hbm %s5867_s13, 128 }
 0xe26   : > { %p4713_p4 = scmp.ne.s32.totalorder %s5812_s3, %s4712_s2  ;;  %p4717_p9 = scmp.lt.u32.totalorder %s5812_s3, %s5867_s13 }
 0xe27   : > { %p4718_p10 = scmp.lt.u32.totalorder %s4716_s30, %s4712_s2  ;;  %p4720_p12 = scmp.lt.u32.totalorder %s4712_s2, %s5812_s3 }
 0xe28   : > { %p4714_p7 = pnand %p4713_p4, %p4884_p5 }
 0xe29   : > { %p4719_p11 = por %p4718_p10, %p4717_p9 }
 0xe2a   : > { %p4715_p8 = pneg %p4714_p7 }
 0xe2b   : > { %p4721_p13 = por %p4720_p12, %p4719_p11 }
 0xe2d   : > { %p4722_p0 = pnand %p4721_p13, %p4715_p8 }
 0xe2f   : > { %4725 = shalt.err (!%p4722_p0)
}
 0xe30   : > { %4430 = dma.vmem_to_hbm [thread:$0]  (%p4884_p5), %s5814_s16, 64, %s5812_s3, %s3895_s0  }
 0xe31 PF: > { %p4436_p1 = scmp.ge.s32.totalorder %s4760_s28, 2  ;;  %s3920_s1 = sand.u32 1, %s4748_s25  }
 0xe32   : > { %s3921_s29 = scalar_lea.sflag [#allocation3], %s3920_s1 }
 0xe33   : > { %p4433_p2 = pnand %p4436_p1, %p4888_p6 }
 0xe35   : > { %4743 = dma.done.wait (!%p4433_p2), %s3921_s29, 64  }
 0xe36   : > { %4745 = vsyncadd (!%p4433_p2), %s3921_s29, 4294967232  ;;  %p23_p3 = scmp.ge.s32.totalorder %s4871_s14, 4   ;;  %s5878_s25 = smov %s4752_s26 }
 0xe37   : > { %s5879_s26 = smov %s4756_s27  ;;  %s5880_s27 = smov %s4882_s17 }
 0xe38   : > { %s5881_s28 = smov %s4871_s14  ;;  %25 = sbr.rel (!%p23_p3) target bundleno = 8 (0x8), region = 107 }
 0xe3f   :  { %3926 = vsyncpa [#allocation3], 1 }
 0xe40   :  { %3928 = vsyncpa [#allocation3 + $0x1], 1 }

</bundles_post_ra>
